<compile_context>
chip_gen: v7x
topology: tpu7x:2x2x1
jax: 0.10.0
libtpu: 0.0.40
codegen_flags: <defaults>
</compile_context>

<pallas_src>
import functools

import jax
import jax.numpy as jnp
import numpy as np
from jax.experimental import pallas as pl
from jax.experimental.pallas import tpu as pltpu


def _round_up(x, m):
    return (x + m - 1) // m * m


# ----------------------------------------------------------------------------
# Trace-time per-stage constants.
#
# Activation layout inside the kernel (per image): (C, Hp*Wp) f32 with
# Hp = H + 2, Wp = W + 2 the zero-padded image flattened row-major.  The pad
# ring holds exact zeros, so every 3x3 tap is just a lane-shifted slice.
# ----------------------------------------------------------------------------
def _stage_consts(h, w, pad_next):
    hp, wp = h + 2, w + 2
    pp = hp * wp
    m = wp + 1                       # first conv-output position (flat coords)
    lc = pp - 2 * m                  # conv-output slab length

    # Validity mask over the conv-output slab: 1 on true interior pixels,
    # 0 on the left/right "wrap" columns (used only for the ECA mean).
    q = np.arange(lc) + m
    ip = q // wp
    jp = q % wp
    vmask = (((ip >= 1) & (ip <= h) & (jp >= 1) & (jp <= w))
             .astype(np.float32).reshape(1, lc))

    # Decimation + re-padding matrix: pooled value at (i_o, j_o) lives at
    # m2-index 2*i_o*wp + 2*j_o; it is routed to the NEXT stage's padded flat
    # position (i_o+pad, j_o+pad).  Pad columns are all-zero -> exact zeros.
    lm2 = lc - 1 - wp
    ho, wo = h // 2, w // 2
    hpn = ho + 2 * pad_next
    wpn = wo + 2 * pad_next
    ppn = hpn * wpn
    if lm2 == 1 and ppn == 1:        # final 1x1 stage: repack is the identity
        dsel = None
    else:
        dsel = np.zeros((lm2, ppn), np.float32)
        for i_o in range(ho):
            for j_o in range(wo):
                dsel[2 * i_o * wp + 2 * j_o,
                     (i_o + pad_next) * wpn + (j_o + pad_next)] = 1.0
    return vmask, dsel


# ----------------------------------------------------------------------------
# One stage (conv3x3 + bias + ReLU + ECA + 2x2 maxpool) on a single image,
# operating purely on values already resident in VMEM/vregs.
# ----------------------------------------------------------------------------
def _run_stage(x, w_ref, b_ref, e0, e1, e2, vm_ref, d_ref, h, w):
    hp, wp = h + 2, w + 2
    pp = hp * wp
    m = wp + 1
    lc = pp - 2 * m

    # ---- 3x3 conv as ONE matmul on the 9-tap stacked input ----
    taps = []
    for kh in range(3):
        for kw in range(3):
            s = m + (kh - 1) * wp + (kw - 1)
            taps.append(x[:, s:s + lc])                    # (cin, lc)
    xs = jnp.concatenate(taps, axis=0)                     # (9*cin, lc)
    acc = jnp.dot(w_ref[...], xs, preferred_element_type=jnp.float32)
    acc = jnp.maximum(acc + b_ref[...], 0.0)               # bias + ReLU

    # ---- ECA: masked global mean -> 1D channel conv -> sigmoid -> scale ----
    y = (jnp.sum(acc * vm_ref[...], axis=1, keepdims=True)
         * (1.0 / float(h * w)))                           # (cout, 1)
    zrow = jnp.zeros((1, 1), jnp.float32)
    y_prev = jnp.concatenate([zrow, y[:-1, :]], axis=0)    # y[c-1]
    y_next = jnp.concatenate([y[1:, :], zrow], axis=0)     # y[c+1]
    a = jax.nn.sigmoid(e0 * y_prev + e1 * y + e2 * y_next)  # (cout, 1)
    scaled = acc * a                                       # lane broadcast

    # ---- 2x2 stride-2 maxpool + repack into next stage's padded layout ----
    m1 = jnp.maximum(scaled[:, :lc - 1], scaled[:, 1:])
    m2 = jnp.maximum(m1[:, :lc - 1 - wp], m1[:, wp:])      # (cout, lm2)
    if d_ref is None:                                      # final 1x1 stage
        return m2
    return jnp.dot(m2, d_ref[...], preferred_element_type=jnp.float32)


# ----------------------------------------------------------------------------
# Whole-network kernel: runs the 5 stages + classifier for one image.
# ----------------------------------------------------------------------------
def _vgg_kernel(*refs, hws, has_d):
    x_ref, ew_ref, wlt_ref, bl_ref = refs[:4]
    o_ref = refs[-1]
    srefs = refs[4:-1]

    x = x_ref[0]                                           # (cin_pad, hp0*wp0)
    r = 0
    for s, (h, w) in enumerate(hws):
        w_ref, b_ref, vm_ref = srefs[r], srefs[r + 1], srefs[r + 2]
        r += 3
        d_ref = None
        if has_d[s]:
            d_ref = srefs[r]
            r += 1
        x = _run_stage(x, w_ref, b_ref,
                       ew_ref[s, 0], ew_ref[s, 1], ew_ref[s, 2],
                       vm_ref, d_ref, h, w)

    # Classifier on the (C_last*Hf*Wf, 1) feature column (torch NCHW flatten).
    feat = x.reshape(-1, 1)                                # (feat_dim, 1)
    prod = wlt_ref[...] * feat                             # (feat_dim, nc)
    logits = jnp.sum(prod, axis=0, keepdims=True) + bl_ref[...]   # (1, nc)
    o_ref[...] = logits[None]                              # (1, 1, nc)


# ----------------------------------------------------------------------------
# Builder: prepack weights/constants ONCE (outside jit) and return a
# jittable forward(x_nchw, fixed_operands).
# ----------------------------------------------------------------------------
def build_vgg_eca_forward(convs, classifier, input_hw):
    h0, w0 = input_hw
    cin0 = int(convs[0][0].shape[1])
    cin_pad = _round_up(cin0, 8)           # sublane-aligned conv stacking
    wl, bl = classifier
    nc = int(wl.shape[0])

    operands = []
    op_specs = []
    hws = []
    has_d = []

    # ECA weights packed (num_stages, 3) into SMEM (scalar reads).
    ew = jnp.concatenate([jnp.reshape(e, (1, 3)) for (_, _, e) in convs],
                         axis=0)

    h, w = h0, w0
    cin_s = cin_pad
    for idx, (wgt, b, _) in enumerate(convs):
        cout = int(wgt.shape[0])
        pad_next = 0 if idx == len(convs) - 1 else 1
        wg = wgt
        if int(wg.shape[1]) != cin_s:      # pad input channels with zeros
            wg = jnp.pad(wg, ((0, 0), (0, cin_s - int(wg.shape[1])),
                              (0, 0), (0, 0)))
        # (cout,cin,3,3) -> (cout,kh,kw,cin) -> (cout, 9*cin): matches the
        # tap-major / cin-minor stacking done inside the kernel.
        w2 = jnp.transpose(wg, (0, 2, 3, 1)).reshape(cout, 9 * cin_s)
        b2 = jnp.reshape(b, (cout, 1))
        vmask, dsel = _stage_consts(h, w, pad_next)

        operands += [w2, b2, jnp.asarray(vmask)]
        op_specs += [pl.BlockSpec((cout, 9 * cin_s), lambda i: (0, 0)),
                     pl.BlockSpec((cout, 1), lambda i: (0, 0)),
                     pl.BlockSpec(vmask.shape, lambda i: (0, 0))]
        if dsel is not None:
            operands.append(jnp.asarray(dsel))
            op_specs.append(pl.BlockSpec(dsel.shape, lambda i: (0, 0)))
            has_d.append(True)
        else:
            has_d.append(False)

        hws.append((h, w))
        cin_s = cout
        h //= 2
        w //= 2

    feat_dim = cin_s * h * w
    assert int(wl.shape[1]) == feat_dim
    wlt = jnp.transpose(wl)                # (feat_dim, nc), transposed ONCE
    bl2 = jnp.reshape(bl, (1, nc))

    kernel = functools.partial(_vgg_kernel, hws=tuple(hws),
                               has_d=tuple(has_d))
    pp0 = (h0 + 2) * (w0 + 2)
    fixed_operands = tuple([ew, wlt, bl2] + operands)

    def forward(x_nchw, fixed):
        ew_, wlt_, bl_ = fixed[0], fixed[1], fixed[2]
        stage_ops = fixed[3:]
        n = x_nchw.shape[0]

        # One-time glue: NCHW -> zero-padded flat (N, Cpad, (H+2)*(W+2)).
        xp = jnp.pad(x_nchw,
                     ((0, 0), (0, cin_pad - cin0), (1, 1), (1, 1)))
        xp = xp.reshape(n, cin_pad, pp0)

        in_specs = ([pl.BlockSpec((1, cin_pad, pp0), lambda i: (i, 0, 0)),
                     pl.BlockSpec(memory_space=pltpu.MemorySpace.SMEM),
                     pl.BlockSpec((feat_dim, nc), lambda i: (0, 0)),
                     pl.BlockSpec((1, nc), lambda i: (0, 0))]
                    + op_specs)

        out = pl.pallas_call(
            kernel,
            out_shape=jax.ShapeDtypeStruct((n, 1, nc), jnp.float32),
            grid=(n,),
            in_specs=in_specs,
            out_specs=pl.BlockSpec((1, 1, nc), lambda i: (i, 0, 0)),
            compiler_params=pltpu.CompilerParams(
                dimension_semantics=("parallel",)),
        )(xp, ew_, wlt_, bl_, *stage_ops)
        return out.reshape(n, nc)

    return forward, fixed_operands


# ----------------------------------------------------------------------------
# Parameters + pure-JAX reference (identical semantics, for the check).
# ----------------------------------------------------------------------------
def init_params(key, cfg, num_classes, hw):
    convs = []
    k = key
    for (cin, cout) in cfg:
        k, k1, k2, k3 = jax.random.split(k, 4)
        wgt = jax.random.normal(k1, (cout, cin, 3, 3), jnp.float32) / (3.0 * (cin ** 0.5))
        b = jax.random.normal(k2, (cout,), jnp.float32) * 0.01
        eca_w = jax.random.normal(k3, (1, 3), jnp.float32) * 0.5
        convs.append((wgt, b, eca_w))
    h_f, w_f = hw[0] // (2 ** len(cfg)), hw[1] // (2 ** len(cfg))
    assert h_f >= 1 and w_f >= 1
    in_feat = cfg[-1][1] * h_f * w_f
    k, k1, k2 = jax.random.split(k, 3)
    wl = jax.random.normal(k1, (num_classes, in_feat), jnp.float32) / (in_feat ** 0.5)
    bl = jax.random.normal(k2, (num_classes,), jnp.float32) * 0.01
    return convs, (wl, bl)


def ref_forward(x_nchw, convs, classifier):
    x = jnp.transpose(x_nchw, (0, 2, 3, 1))
    for (w, b, eca_w) in convs:
        w_hwio = jnp.transpose(w, (2, 3, 1, 0))
        x = jax.lax.conv_general_dilated(
            x, w_hwio, (1, 1), "SAME",
            dimension_numbers=("NHWC", "HWIO", "NHWC"),
            precision=jax.lax.Precision.HIGHEST)
        x = jnp.maximum(x + b, 0.0)
        y = jnp.mean(x, axis=(1, 2))                              # (N, C)
        yp = jnp.pad(y, ((0, 0), (1, 1)))
        z = (eca_w[0, 0] * yp[:, :-2] + eca_w[0, 1] * yp[:, 1:-1]
             + eca_w[0, 2] * yp[:, 2:])
        a = jax.nn.sigmoid(z)
        x = x * a[:, None, None, :]
        x = jax.lax.reduce_window(x, -jnp.inf, jax.lax.max,
                                  (1, 2, 2, 1), (1, 2, 2, 1), "VALID")
    x = jnp.transpose(x, (0, 3, 1, 2)).reshape(x.shape[0], -1)
    wl, bl = classifier
    return jnp.dot(x, wl.T, precision=jax.lax.Precision.HIGHEST) + bl


if __name__ == "__main__":
    key = jax.random.PRNGKey(0)
    kx, kp = jax.random.split(key)

    # Small VGG-ECA: 5 conv/ECA/pool stages; spatial 32 -> 1 after 5 pools.
    cfg = [(3, 8), (8, 16), (16, 16), (16, 32), (32, 32)]
    num_classes = 10
    hin = win = 32
    convs, classifier = init_params(kp, cfg, num_classes, (hin, win))

    x = jax.random.normal(kx, (2, 3, hin, win), jnp.float32)   # NCHW like torch

    forward, fixed = build_vgg_eca_forward(convs, classifier, (hin, win))
    fwd = jax.jit(forward)
    out = jax.block_until_ready(fwd(x, fixed))

    ref = ref_forward(x, convs, classifier)
    assert out.shape == (2, num_classes)
    assert bool(jnp.allclose(out, ref, rtol=2e-4, atol=2e-4)), (out, ref)

    print("KERNEL_OK")
</pallas_src>

<mosaic_0001>
module attributes {stable_mosaic.version = 11 : i64} {
  func.func @_vgg_kernel(%arg0: i32, %arg1: memref<1x8x1156xf32, #tpu.memory_space<vmem>>, %arg2: memref<5x3xf32, #tpu.memory_space<smem>>, %arg3: memref<32x10xf32, #tpu.memory_space<vmem>>, %arg4: memref<1x10xf32, #tpu.memory_space<vmem>>, %arg5: memref<8x72xf32, #tpu.memory_space<vmem>>, %arg6: memref<8x1xf32, #tpu.memory_space<vmem>>, %arg7: memref<1x1086xf32, #tpu.memory_space<vmem>>, %arg8: memref<1051x324xf32, #tpu.memory_space<vmem>>, %arg9: memref<16x72xf32, #tpu.memory_space<vmem>>, %arg10: memref<16x1xf32, #tpu.memory_space<vmem>>, %arg11: memref<1x286xf32, #tpu.memory_space<vmem>>, %arg12: memref<267x100xf32, #tpu.memory_space<vmem>>, %arg13: memref<16x144xf32, #tpu.memory_space<vmem>>, %arg14: memref<16x1xf32, #tpu.memory_space<vmem>>, %arg15: memref<1x78xf32, #tpu.memory_space<vmem>>, %arg16: memref<67x36xf32, #tpu.memory_space<vmem>>, %arg17: memref<32x144xf32, #tpu.memory_space<vmem>>, %arg18: memref<32x1xf32, #tpu.memory_space<vmem>>, %arg19: memref<1x22xf32, #tpu.memory_space<vmem>>, %arg20: memref<15x16xf32, #tpu.memory_space<vmem>>, %arg21: memref<32x288xf32, #tpu.memory_space<vmem>>, %arg22: memref<32x1xf32, #tpu.memory_space<vmem>>, %arg23: memref<1x6xf32, #tpu.memory_space<vmem>>, %arg24: memref<1x1x10xf32, #tpu.memory_space<vmem>>) attributes {dimension_semantics = [#tpu.dimension_semantics<parallel>], iteration_bounds = array<i64: 2>, scalar_prefetch = 0 : i64, scratch_operands = 0 : i64, tpu.core_type = #tpu.core_type<tc>, window_params = [{transform_indices = @transform_0, window_bounds = array<i64: 1, 8, 1156>}, {transform_indices = @transform_1, window_bounds = array<i64: 5, 3>}, {pipeline_mode = #tpu.pipeline_mode<synchronous>, transform_indices = @transform_2, window_bounds = array<i64: 32, 10>}, {pipeline_mode = #tpu.pipeline_mode<synchronous>, transform_indices = @transform_3, window_bounds = array<i64: 1, 10>}, {pipeline_mode = #tpu.pipeline_mode<synchronous>, transform_indices = @transform_4, window_bounds = array<i64: 8, 72>}, {pipeline_mode = #tpu.pipeline_mode<synchronous>, transform_indices = @transform_5, window_bounds = array<i64: 8, 1>}, {pipeline_mode = #tpu.pipeline_mode<synchronous>, transform_indices = @transform_6, window_bounds = array<i64: 1, 1086>}, {pipeline_mode = #tpu.pipeline_mode<synchronous>, transform_indices = @transform_7, window_bounds = array<i64: 1051, 324>}, {pipeline_mode = #tpu.pipeline_mode<synchronous>, transform_indices = @transform_8, window_bounds = array<i64: 16, 72>}, {pipeline_mode = #tpu.pipeline_mode<synchronous>, transform_indices = @transform_9, window_bounds = array<i64: 16, 1>}, {pipeline_mode = #tpu.pipeline_mode<synchronous>, transform_indices = @transform_10, window_bounds = array<i64: 1, 286>}, {pipeline_mode = #tpu.pipeline_mode<synchronous>, transform_indices = @transform_11, window_bounds = array<i64: 267, 100>}, {pipeline_mode = #tpu.pipeline_mode<synchronous>, transform_indices = @transform_12, window_bounds = array<i64: 16, 144>}, {pipeline_mode = #tpu.pipeline_mode<synchronous>, transform_indices = @transform_13, window_bounds = array<i64: 16, 1>}, {pipeline_mode = #tpu.pipeline_mode<synchronous>, transform_indices = @transform_14, window_bounds = array<i64: 1, 78>}, {pipeline_mode = #tpu.pipeline_mode<synchronous>, transform_indices = @transform_15, window_bounds = array<i64: 67, 36>}, {pipeline_mode = #tpu.pipeline_mode<synchronous>, transform_indices = @transform_16, window_bounds = array<i64: 32, 144>}, {pipeline_mode = #tpu.pipeline_mode<synchronous>, transform_indices = @transform_17, window_bounds = array<i64: 32, 1>}, {pipeline_mode = #tpu.pipeline_mode<synchronous>, transform_indices = @transform_18, window_bounds = array<i64: 1, 22>}, {pipeline_mode = #tpu.pipeline_mode<synchronous>, transform_indices = @transform_19, window_bounds = array<i64: 15, 16>}, {pipeline_mode = #tpu.pipeline_mode<synchronous>, transform_indices = @transform_20, window_bounds = array<i64: 32, 288>}, {pipeline_mode = #tpu.pipeline_mode<synchronous>, transform_indices = @transform_21, window_bounds = array<i64: 32, 1>}, {pipeline_mode = #tpu.pipeline_mode<synchronous>, transform_indices = @transform_22, window_bounds = array<i64: 1, 6>}, {transform_indices = @transform_23, window_bounds = array<i64: 1, 1, 10>}]} {
    %c0 = arith.constant 0 : index
    %c0_0 = arith.constant 0 : index
    %c0_1 = arith.constant 0 : index
    %0 = vector.load %arg1[%c0, %c0_0, %c0_1] : memref<1x8x1156xf32, #tpu.memory_space<vmem>>, vector<1x8x1156xf32>
    %1 = vector.shape_cast %0 : vector<1x8x1156xf32> to vector<8x1156xf32>
    %c0_2 = arith.constant 0 : index
    %c0_3 = arith.constant 0 : index
    %2 = memref.load %arg2[%c0_2, %c0_3] : memref<5x3xf32, #tpu.memory_space<smem>>
    %c0_4 = arith.constant 0 : index
    %c1 = arith.constant 1 : index
    %3 = memref.load %arg2[%c0_4, %c1] : memref<5x3xf32, #tpu.memory_space<smem>>
    %c0_5 = arith.constant 0 : index
    %c2 = arith.constant 2 : index
    %4 = memref.load %arg2[%c0_5, %c2] : memref<5x3xf32, #tpu.memory_space<smem>>
    %5 = vector.extract_strided_slice %1 {offsets = [0, 0], sizes = [8, 1086], strides = [1, 1]} : vector<8x1156xf32> to vector<8x1086xf32>
    %6 = vector.extract_strided_slice %1 {offsets = [0, 1], sizes = [8, 1086], strides = [1, 1]} : vector<8x1156xf32> to vector<8x1086xf32>
    %7 = vector.extract_strided_slice %1 {offsets = [0, 2], sizes = [8, 1086], strides = [1, 1]} : vector<8x1156xf32> to vector<8x1086xf32>
    %8 = vector.extract_strided_slice %1 {offsets = [0, 34], sizes = [8, 1086], strides = [1, 1]} : vector<8x1156xf32> to vector<8x1086xf32>
    %9 = vector.extract_strided_slice %1 {offsets = [0, 35], sizes = [8, 1086], strides = [1, 1]} : vector<8x1156xf32> to vector<8x1086xf32>
    %10 = vector.extract_strided_slice %1 {offsets = [0, 36], sizes = [8, 1086], strides = [1, 1]} : vector<8x1156xf32> to vector<8x1086xf32>
    %11 = vector.extract_strided_slice %1 {offsets = [0, 68], sizes = [8, 1086], strides = [1, 1]} : vector<8x1156xf32> to vector<8x1086xf32>
    %12 = vector.extract_strided_slice %1 {offsets = [0, 69], sizes = [8, 1086], strides = [1, 1]} : vector<8x1156xf32> to vector<8x1086xf32>
    %13 = vector.extract_strided_slice %1 {offsets = [0, 70], sizes = [8, 1086], strides = [1, 1]} : vector<8x1156xf32> to vector<8x1086xf32>
    %14 = tpu.concatenate %5, %6, %7, %8, %9, %10, %11, %12, %13 in 0 : vector<8x1086xf32>, vector<8x1086xf32>, vector<8x1086xf32>, vector<8x1086xf32>, vector<8x1086xf32>, vector<8x1086xf32>, vector<8x1086xf32>, vector<8x1086xf32>, vector<8x1086xf32> -> vector<72x1086xf32>
    %c0_6 = arith.constant 0 : index
    %c0_7 = arith.constant 0 : index
    %15 = vector.load %arg5[%c0_6, %c0_7] : memref<8x72xf32, #tpu.memory_space<vmem>>, vector<8x72xf32>
    %cst = arith.constant dense<0.000000e+00> : vector<8x1086xf32>
    %16 = tpu.matmul %15, %14, %cst {dimension_numbers = #tpu.dot_dimension_numbers<[1], [0], [0], [1], [0, 0, 1, 1], [], []>} : vector<8x72xf32>, vector<72x1086xf32>, vector<8x1086xf32> -> vector<8x1086xf32>
    %c0_8 = arith.constant 0 : index
    %c0_9 = arith.constant 0 : index
    %17 = vector.load %arg6[%c0_8, %c0_9] : memref<8x1xf32, #tpu.memory_space<vmem>>, vector<8x1xf32>
    %18 = vector.broadcast %17 : vector<8x1xf32> to vector<8x1086xf32>
    %19 = arith.addf %16, %18 : vector<8x1086xf32>
    %cst_10 = arith.constant 0.000000e+00 : f32
    %20 = vector.broadcast %cst_10 : f32 to vector<8x1086xf32>
    %21 = arith.maximumf %19, %20 : vector<8x1086xf32>
    %c0_11 = arith.constant 0 : index
    %c0_12 = arith.constant 0 : index
    %22 = vector.load %arg7[%c0_11, %c0_12] : memref<1x1086xf32, #tpu.memory_space<vmem>>, vector<1x1086xf32>
    %23 = vector.broadcast %22 : vector<1x1086xf32> to vector<8x1086xf32>
    %24 = arith.mulf %21, %23 : vector<8x1086xf32>
    %cst_13 = arith.constant dense<0.000000e+00> : vector<8xf32>
    %25 = vector.multi_reduction <add>, %24, %cst_13 [1] : vector<8x1086xf32> to vector<8xf32>
    %26 = vector.shape_cast %25 : vector<8xf32> to vector<8x1xf32>
    %cst_14 = arith.constant 9.765625E-4 : f32
    %27 = vector.broadcast %cst_14 : f32 to vector<8x1xf32>
    %28 = arith.mulf %26, %27 : vector<8x1xf32>
    %cst_15 = arith.constant 0.000000e+00 : f32
    %29 = vector.broadcast %cst_15 : f32 to vector<1x1xf32>
    %30 = vector.extract_strided_slice %28 {offsets = [0, 0], sizes = [7, 1], strides = [1, 1]} : vector<8x1xf32> to vector<7x1xf32>
    %31 = tpu.concatenate %29, %30 in 0 : vector<1x1xf32>, vector<7x1xf32> -> vector<8x1xf32>
    %32 = vector.extract_strided_slice %28 {offsets = [1, 0], sizes = [7, 1], strides = [1, 1]} : vector<8x1xf32> to vector<7x1xf32>
    %33 = tpu.concatenate %32, %29 in 0 : vector<7x1xf32>, vector<1x1xf32> -> vector<8x1xf32>
    %34 = vector.broadcast %2 : f32 to vector<8x1xf32>
    %35 = arith.mulf %34, %31 : vector<8x1xf32>
    %36 = vector.broadcast %3 : f32 to vector<8x1xf32>
    %37 = arith.mulf %36, %28 : vector<8x1xf32>
    %38 = arith.addf %35, %37 : vector<8x1xf32>
    %39 = vector.broadcast %4 : f32 to vector<8x1xf32>
    %40 = arith.mulf %39, %33 : vector<8x1xf32>
    %41 = arith.addf %38, %40 : vector<8x1xf32>
    %42 = arith.negf %41 : vector<8x1xf32>
    %43 = math.exp %42 : vector<8x1xf32>
    %cst_16 = arith.constant 1.000000e+00 : f32
    %44 = vector.broadcast %cst_16 : f32 to vector<8x1xf32>
    %45 = arith.addf %44, %43 : vector<8x1xf32>
    %46 = arith.divf %44, %45 : vector<8x1xf32>
    %47 = vector.broadcast %46 : vector<8x1xf32> to vector<8x1086xf32>
    %48 = arith.mulf %21, %47 : vector<8x1086xf32>
    %49 = vector.extract_strided_slice %48 {offsets = [0, 0], sizes = [8, 1085], strides = [1, 1]} : vector<8x1086xf32> to vector<8x1085xf32>
    %50 = vector.extract_strided_slice %48 {offsets = [0, 1], sizes = [8, 1085], strides = [1, 1]} : vector<8x1086xf32> to vector<8x1085xf32>
    %51 = arith.maximumf %49, %50 : vector<8x1085xf32>
    %52 = vector.extract_strided_slice %51 {offsets = [0, 0], sizes = [8, 1051], strides = [1, 1]} : vector<8x1085xf32> to vector<8x1051xf32>
    %53 = vector.extract_strided_slice %51 {offsets = [0, 34], sizes = [8, 1051], strides = [1, 1]} : vector<8x1085xf32> to vector<8x1051xf32>
    %54 = arith.maximumf %52, %53 : vector<8x1051xf32>
    %c0_17 = arith.constant 0 : index
    %c0_18 = arith.constant 0 : index
    %55 = vector.load %arg8[%c0_17, %c0_18] : memref<1051x324xf32, #tpu.memory_space<vmem>>, vector<1051x324xf32>
    %cst_19 = arith.constant dense<0.000000e+00> : vector<8x324xf32>
    %56 = tpu.matmul %54, %55, %cst_19 {dimension_numbers = #tpu.dot_dimension_numbers<[1], [0], [0], [1], [0, 0, 1, 1], [], []>} : vector<8x1051xf32>, vector<1051x324xf32>, vector<8x324xf32> -> vector<8x324xf32>
    %c1_20 = arith.constant 1 : index
    %c0_21 = arith.constant 0 : index
    %57 = memref.load %arg2[%c1_20, %c0_21] : memref<5x3xf32, #tpu.memory_space<smem>>
    %c1_22 = arith.constant 1 : index
    %c1_23 = arith.constant 1 : index
    %58 = memref.load %arg2[%c1_22, %c1_23] : memref<5x3xf32, #tpu.memory_space<smem>>
    %c1_24 = arith.constant 1 : index
    %c2_25 = arith.constant 2 : index
    %59 = memref.load %arg2[%c1_24, %c2_25] : memref<5x3xf32, #tpu.memory_space<smem>>
    %60 = vector.extract_strided_slice %56 {offsets = [0, 0], sizes = [8, 286], strides = [1, 1]} : vector<8x324xf32> to vector<8x286xf32>
    %61 = vector.extract_strided_slice %56 {offsets = [0, 1], sizes = [8, 286], strides = [1, 1]} : vector<8x324xf32> to vector<8x286xf32>
    %62 = vector.extract_strided_slice %56 {offsets = [0, 2], sizes = [8, 286], strides = [1, 1]} : vector<8x324xf32> to vector<8x286xf32>
    %63 = vector.extract_strided_slice %56 {offsets = [0, 18], sizes = [8, 286], strides = [1, 1]} : vector<8x324xf32> to vector<8x286xf32>
    %64 = vector.extract_strided_slice %56 {offsets = [0, 19], sizes = [8, 286], strides = [1, 1]} : vector<8x324xf32> to vector<8x286xf32>
    %65 = vector.extract_strided_slice %56 {offsets = [0, 20], sizes = [8, 286], strides = [1, 1]} : vector<8x324xf32> to vector<8x286xf32>
    %66 = vector.extract_strided_slice %56 {offsets = [0, 36], sizes = [8, 286], strides = [1, 1]} : vector<8x324xf32> to vector<8x286xf32>
    %67 = vector.extract_strided_slice %56 {offsets = [0, 37], sizes = [8, 286], strides = [1, 1]} : vector<8x324xf32> to vector<8x286xf32>
    %68 = vector.extract_strided_slice %56 {offsets = [0, 38], sizes = [8, 286], strides = [1, 1]} : vector<8x324xf32> to vector<8x286xf32>
    %69 = tpu.concatenate %60, %61, %62, %63, %64, %65, %66, %67, %68 in 0 : vector<8x286xf32>, vector<8x286xf32>, vector<8x286xf32>, vector<8x286xf32>, vector<8x286xf32>, vector<8x286xf32>, vector<8x286xf32>, vector<8x286xf32>, vector<8x286xf32> -> vector<72x286xf32>
    %c0_26 = arith.constant 0 : index
    %c0_27 = arith.constant 0 : index
    %70 = vector.load %arg9[%c0_26, %c0_27] : memref<16x72xf32, #tpu.memory_space<vmem>>, vector<16x72xf32>
    %cst_28 = arith.constant dense<0.000000e+00> : vector<16x286xf32>
    %71 = tpu.matmul %70, %69, %cst_28 {dimension_numbers = #tpu.dot_dimension_numbers<[1], [0], [0], [1], [0, 0, 1, 1], [], []>} : vector<16x72xf32>, vector<72x286xf32>, vector<16x286xf32> -> vector<16x286xf32>
    %c0_29 = arith.constant 0 : index
    %c0_30 = arith.constant 0 : index
    %72 = vector.load %arg10[%c0_29, %c0_30] : memref<16x1xf32, #tpu.memory_space<vmem>>, vector<16x1xf32>
    %73 = vector.broadcast %72 : vector<16x1xf32> to vector<16x286xf32>
    %74 = arith.addf %71, %73 : vector<16x286xf32>
    %cst_31 = arith.constant 0.000000e+00 : f32
    %75 = vector.broadcast %cst_31 : f32 to vector<16x286xf32>
    %76 = arith.maximumf %74, %75 : vector<16x286xf32>
    %c0_32 = arith.constant 0 : index
    %c0_33 = arith.constant 0 : index
    %77 = vector.load %arg11[%c0_32, %c0_33] : memref<1x286xf32, #tpu.memory_space<vmem>>, vector<1x286xf32>
    %78 = vector.broadcast %77 : vector<1x286xf32> to vector<16x286xf32>
    %79 = arith.mulf %76, %78 : vector<16x286xf32>
    %cst_34 = arith.constant dense<0.000000e+00> : vector<16xf32>
    %80 = vector.multi_reduction <add>, %79, %cst_34 [1] : vector<16x286xf32> to vector<16xf32>
    %81 = vector.shape_cast %80 : vector<16xf32> to vector<16x1xf32>
    %cst_35 = arith.constant 3.906250e-03 : f32
    %82 = vector.broadcast %cst_35 : f32 to vector<16x1xf32>
    %83 = arith.mulf %81, %82 : vector<16x1xf32>
    %cst_36 = arith.constant 0.000000e+00 : f32
    %84 = vector.broadcast %cst_36 : f32 to vector<1x1xf32>
    %85 = vector.extract_strided_slice %83 {offsets = [0, 0], sizes = [15, 1], strides = [1, 1]} : vector<16x1xf32> to vector<15x1xf32>
    %86 = tpu.concatenate %84, %85 in 0 : vector<1x1xf32>, vector<15x1xf32> -> vector<16x1xf32>
    %87 = vector.extract_strided_slice %83 {offsets = [1, 0], sizes = [15, 1], strides = [1, 1]} : vector<16x1xf32> to vector<15x1xf32>
    %88 = tpu.concatenate %87, %84 in 0 : vector<15x1xf32>, vector<1x1xf32> -> vector<16x1xf32>
    %89 = vector.broadcast %57 : f32 to vector<16x1xf32>
    %90 = arith.mulf %89, %86 : vector<16x1xf32>
    %91 = vector.broadcast %58 : f32 to vector<16x1xf32>
    %92 = arith.mulf %91, %83 : vector<16x1xf32>
    %93 = arith.addf %90, %92 : vector<16x1xf32>
    %94 = vector.broadcast %59 : f32 to vector<16x1xf32>
    %95 = arith.mulf %94, %88 : vector<16x1xf32>
    %96 = arith.addf %93, %95 : vector<16x1xf32>
    %97 = arith.negf %96 : vector<16x1xf32>
    %98 = math.exp %97 : vector<16x1xf32>
    %cst_37 = arith.constant 1.000000e+00 : f32
    %99 = vector.broadcast %cst_37 : f32 to vector<16x1xf32>
    %100 = arith.addf %99, %98 : vector<16x1xf32>
    %101 = arith.divf %99, %100 : vector<16x1xf32>
    %102 = vector.broadcast %101 : vector<16x1xf32> to vector<16x286xf32>
    %103 = arith.mulf %76, %102 : vector<16x286xf32>
    %104 = vector.extract_strided_slice %103 {offsets = [0, 0], sizes = [16, 285], strides = [1, 1]} : vector<16x286xf32> to vector<16x285xf32>
    %105 = vector.extract_strided_slice %103 {offsets = [0, 1], sizes = [16, 285], strides = [1, 1]} : vector<16x286xf32> to vector<16x285xf32>
    %106 = arith.maximumf %104, %105 : vector<16x285xf32>
    %107 = vector.extract_strided_slice %106 {offsets = [0, 0], sizes = [16, 267], strides = [1, 1]} : vector<16x285xf32> to vector<16x267xf32>
    %108 = vector.extract_strided_slice %106 {offsets = [0, 18], sizes = [16, 267], strides = [1, 1]} : vector<16x285xf32> to vector<16x267xf32>
    %109 = arith.maximumf %107, %108 : vector<16x267xf32>
    %c0_38 = arith.constant 0 : index
    %c0_39 = arith.constant 0 : index
    %110 = vector.load %arg12[%c0_38, %c0_39] : memref<267x100xf32, #tpu.memory_space<vmem>>, vector<267x100xf32>
    %cst_40 = arith.constant dense<0.000000e+00> : vector<16x100xf32>
    %111 = tpu.matmul %109, %110, %cst_40 {dimension_numbers = #tpu.dot_dimension_numbers<[1], [0], [0], [1], [0, 0, 1, 1], [], []>} : vector<16x267xf32>, vector<267x100xf32>, vector<16x100xf32> -> vector<16x100xf32>
    %c2_41 = arith.constant 2 : index
    %c0_42 = arith.constant 0 : index
    %112 = memref.load %arg2[%c2_41, %c0_42] : memref<5x3xf32, #tpu.memory_space<smem>>
    %c2_43 = arith.constant 2 : index
    %c1_44 = arith.constant 1 : index
    %113 = memref.load %arg2[%c2_43, %c1_44] : memref<5x3xf32, #tpu.memory_space<smem>>
    %c2_45 = arith.constant 2 : index
    %c2_46 = arith.constant 2 : index
    %114 = memref.load %arg2[%c2_45, %c2_46] : memref<5x3xf32, #tpu.memory_space<smem>>
    %115 = vector.extract_strided_slice %111 {offsets = [0, 0], sizes = [16, 78], strides = [1, 1]} : vector<16x100xf32> to vector<16x78xf32>
    %116 = vector.extract_strided_slice %111 {offsets = [0, 1], sizes = [16, 78], strides = [1, 1]} : vector<16x100xf32> to vector<16x78xf32>
    %117 = vector.extract_strided_slice %111 {offsets = [0, 2], sizes = [16, 78], strides = [1, 1]} : vector<16x100xf32> to vector<16x78xf32>
    %118 = vector.extract_strided_slice %111 {offsets = [0, 10], sizes = [16, 78], strides = [1, 1]} : vector<16x100xf32> to vector<16x78xf32>
    %119 = vector.extract_strided_slice %111 {offsets = [0, 11], sizes = [16, 78], strides = [1, 1]} : vector<16x100xf32> to vector<16x78xf32>
    %120 = vector.extract_strided_slice %111 {offsets = [0, 12], sizes = [16, 78], strides = [1, 1]} : vector<16x100xf32> to vector<16x78xf32>
    %121 = vector.extract_strided_slice %111 {offsets = [0, 20], sizes = [16, 78], strides = [1, 1]} : vector<16x100xf32> to vector<16x78xf32>
    %122 = vector.extract_strided_slice %111 {offsets = [0, 21], sizes = [16, 78], strides = [1, 1]} : vector<16x100xf32> to vector<16x78xf32>
    %123 = vector.extract_strided_slice %111 {offsets = [0, 22], sizes = [16, 78], strides = [1, 1]} : vector<16x100xf32> to vector<16x78xf32>
    %124 = tpu.concatenate %115, %116, %117, %118, %119, %120, %121, %122, %123 in 0 : vector<16x78xf32>, vector<16x78xf32>, vector<16x78xf32>, vector<16x78xf32>, vector<16x78xf32>, vector<16x78xf32>, vector<16x78xf32>, vector<16x78xf32>, vector<16x78xf32> -> vector<144x78xf32>
    %c0_47 = arith.constant 0 : index
    %c0_48 = arith.constant 0 : index
    %125 = vector.load %arg13[%c0_47, %c0_48] : memref<16x144xf32, #tpu.memory_space<vmem>>, vector<16x144xf32>
    %cst_49 = arith.constant dense<0.000000e+00> : vector<16x78xf32>
    %126 = tpu.matmul %125, %124, %cst_49 {dimension_numbers = #tpu.dot_dimension_numbers<[1], [0], [0], [1], [0, 0, 1, 1], [], []>} : vector<16x144xf32>, vector<144x78xf32>, vector<16x78xf32> -> vector<16x78xf32>
    %c0_50 = arith.constant 0 : index
    %c0_51 = arith.constant 0 : index
    %127 = vector.load %arg14[%c0_50, %c0_51] : memref<16x1xf32, #tpu.memory_space<vmem>>, vector<16x1xf32>
    %128 = vector.broadcast %127 : vector<16x1xf32> to vector<16x78xf32>
    %129 = arith.addf %126, %128 : vector<16x78xf32>
    %cst_52 = arith.constant 0.000000e+00 : f32
    %130 = vector.broadcast %cst_52 : f32 to vector<16x78xf32>
    %131 = arith.maximumf %129, %130 : vector<16x78xf32>
    %c0_53 = arith.constant 0 : index
    %c0_54 = arith.constant 0 : index
    %132 = vector.load %arg15[%c0_53, %c0_54] : memref<1x78xf32, #tpu.memory_space<vmem>>, vector<1x78xf32>
    %133 = vector.broadcast %132 : vector<1x78xf32> to vector<16x78xf32>
    %134 = arith.mulf %131, %133 : vector<16x78xf32>
    %cst_55 = arith.constant dense<0.000000e+00> : vector<16xf32>
    %135 = vector.multi_reduction <add>, %134, %cst_55 [1] : vector<16x78xf32> to vector<16xf32>
    %136 = vector.shape_cast %135 : vector<16xf32> to vector<16x1xf32>
    %cst_56 = arith.constant 1.562500e-02 : f32
    %137 = vector.broadcast %cst_56 : f32 to vector<16x1xf32>
    %138 = arith.mulf %136, %137 : vector<16x1xf32>
    %cst_57 = arith.constant 0.000000e+00 : f32
    %139 = vector.broadcast %cst_57 : f32 to vector<1x1xf32>
    %140 = vector.extract_strided_slice %138 {offsets = [0, 0], sizes = [15, 1], strides = [1, 1]} : vector<16x1xf32> to vector<15x1xf32>
    %141 = tpu.concatenate %139, %140 in 0 : vector<1x1xf32>, vector<15x1xf32> -> vector<16x1xf32>
    %142 = vector.extract_strided_slice %138 {offsets = [1, 0], sizes = [15, 1], strides = [1, 1]} : vector<16x1xf32> to vector<15x1xf32>
    %143 = tpu.concatenate %142, %139 in 0 : vector<15x1xf32>, vector<1x1xf32> -> vector<16x1xf32>
    %144 = vector.broadcast %112 : f32 to vector<16x1xf32>
    %145 = arith.mulf %144, %141 : vector<16x1xf32>
    %146 = vector.broadcast %113 : f32 to vector<16x1xf32>
    %147 = arith.mulf %146, %138 : vector<16x1xf32>
    %148 = arith.addf %145, %147 : vector<16x1xf32>
    %149 = vector.broadcast %114 : f32 to vector<16x1xf32>
    %150 = arith.mulf %149, %143 : vector<16x1xf32>
    %151 = arith.addf %148, %150 : vector<16x1xf32>
    %152 = arith.negf %151 : vector<16x1xf32>
    %153 = math.exp %152 : vector<16x1xf32>
    %cst_58 = arith.constant 1.000000e+00 : f32
    %154 = vector.broadcast %cst_58 : f32 to vector<16x1xf32>
    %155 = arith.addf %154, %153 : vector<16x1xf32>
    %156 = arith.divf %154, %155 : vector<16x1xf32>
    %157 = vector.broadcast %156 : vector<16x1xf32> to vector<16x78xf32>
    %158 = arith.mulf %131, %157 : vector<16x78xf32>
    %159 = vector.extract_strided_slice %158 {offsets = [0, 0], sizes = [16, 77], strides = [1, 1]} : vector<16x78xf32> to vector<16x77xf32>
    %160 = vector.extract_strided_slice %158 {offsets = [0, 1], sizes = [16, 77], strides = [1, 1]} : vector<16x78xf32> to vector<16x77xf32>
    %161 = arith.maximumf %159, %160 : vector<16x77xf32>
    %162 = vector.extract_strided_slice %161 {offsets = [0, 0], sizes = [16, 67], strides = [1, 1]} : vector<16x77xf32> to vector<16x67xf32>
    %163 = vector.extract_strided_slice %161 {offsets = [0, 10], sizes = [16, 67], strides = [1, 1]} : vector<16x77xf32> to vector<16x67xf32>
    %164 = arith.maximumf %162, %163 : vector<16x67xf32>
    %c0_59 = arith.constant 0 : index
    %c0_60 = arith.constant 0 : index
    %165 = vector.load %arg16[%c0_59, %c0_60] : memref<67x36xf32, #tpu.memory_space<vmem>>, vector<67x36xf32>
    %cst_61 = arith.constant dense<0.000000e+00> : vector<16x36xf32>
    %166 = tpu.matmul %164, %165, %cst_61 {dimension_numbers = #tpu.dot_dimension_numbers<[1], [0], [0], [1], [0, 0, 1, 1], [], []>} : vector<16x67xf32>, vector<67x36xf32>, vector<16x36xf32> -> vector<16x36xf32>
    %c3 = arith.constant 3 : index
    %c0_62 = arith.constant 0 : index
    %167 = memref.load %arg2[%c3, %c0_62] : memref<5x3xf32, #tpu.memory_space<smem>>
    %c3_63 = arith.constant 3 : index
    %c1_64 = arith.constant 1 : index
    %168 = memref.load %arg2[%c3_63, %c1_64] : memref<5x3xf32, #tpu.memory_space<smem>>
    %c3_65 = arith.constant 3 : index
    %c2_66 = arith.constant 2 : index
    %169 = memref.load %arg2[%c3_65, %c2_66] : memref<5x3xf32, #tpu.memory_space<smem>>
    %170 = vector.extract_strided_slice %166 {offsets = [0, 0], sizes = [16, 22], strides = [1, 1]} : vector<16x36xf32> to vector<16x22xf32>
    %171 = vector.extract_strided_slice %166 {offsets = [0, 1], sizes = [16, 22], strides = [1, 1]} : vector<16x36xf32> to vector<16x22xf32>
    %172 = vector.extract_strided_slice %166 {offsets = [0, 2], sizes = [16, 22], strides = [1, 1]} : vector<16x36xf32> to vector<16x22xf32>
    %173 = vector.extract_strided_slice %166 {offsets = [0, 6], sizes = [16, 22], strides = [1, 1]} : vector<16x36xf32> to vector<16x22xf32>
    %174 = vector.extract_strided_slice %166 {offsets = [0, 7], sizes = [16, 22], strides = [1, 1]} : vector<16x36xf32> to vector<16x22xf32>
    %175 = vector.extract_strided_slice %166 {offsets = [0, 8], sizes = [16, 22], strides = [1, 1]} : vector<16x36xf32> to vector<16x22xf32>
    %176 = vector.extract_strided_slice %166 {offsets = [0, 12], sizes = [16, 22], strides = [1, 1]} : vector<16x36xf32> to vector<16x22xf32>
    %177 = vector.extract_strided_slice %166 {offsets = [0, 13], sizes = [16, 22], strides = [1, 1]} : vector<16x36xf32> to vector<16x22xf32>
    %178 = vector.extract_strided_slice %166 {offsets = [0, 14], sizes = [16, 22], strides = [1, 1]} : vector<16x36xf32> to vector<16x22xf32>
    %179 = tpu.concatenate %170, %171, %172, %173, %174, %175, %176, %177, %178 in 0 : vector<16x22xf32>, vector<16x22xf32>, vector<16x22xf32>, vector<16x22xf32>, vector<16x22xf32>, vector<16x22xf32>, vector<16x22xf32>, vector<16x22xf32>, vector<16x22xf32> -> vector<144x22xf32>
    %c0_67 = arith.constant 0 : index
    %c0_68 = arith.constant 0 : index
    %180 = vector.load %arg17[%c0_67, %c0_68] : memref<32x144xf32, #tpu.memory_space<vmem>>, vector<32x144xf32>
    %cst_69 = arith.constant dense<0.000000e+00> : vector<32x22xf32>
    %181 = tpu.matmul %180, %179, %cst_69 {dimension_numbers = #tpu.dot_dimension_numbers<[1], [0], [0], [1], [0, 0, 1, 1], [], []>} : vector<32x144xf32>, vector<144x22xf32>, vector<32x22xf32> -> vector<32x22xf32>
    %c0_70 = arith.constant 0 : index
    %c0_71 = arith.constant 0 : index
    %182 = vector.load %arg18[%c0_70, %c0_71] : memref<32x1xf32, #tpu.memory_space<vmem>>, vector<32x1xf32>
    %183 = vector.broadcast %182 : vector<32x1xf32> to vector<32x22xf32>
    %184 = arith.addf %181, %183 : vector<32x22xf32>
    %cst_72 = arith.constant 0.000000e+00 : f32
    %185 = vector.broadcast %cst_72 : f32 to vector<32x22xf32>
    %186 = arith.maximumf %184, %185 : vector<32x22xf32>
    %c0_73 = arith.constant 0 : index
    %c0_74 = arith.constant 0 : index
    %187 = vector.load %arg19[%c0_73, %c0_74] : memref<1x22xf32, #tpu.memory_space<vmem>>, vector<1x22xf32>
    %188 = vector.broadcast %187 : vector<1x22xf32> to vector<32x22xf32>
    %189 = arith.mulf %186, %188 : vector<32x22xf32>
    %cst_75 = arith.constant dense<0.000000e+00> : vector<32xf32>
    %190 = vector.multi_reduction <add>, %189, %cst_75 [1] : vector<32x22xf32> to vector<32xf32>
    %191 = vector.shape_cast %190 : vector<32xf32> to vector<32x1xf32>
    %cst_76 = arith.constant 6.250000e-02 : f32
    %192 = vector.broadcast %cst_76 : f32 to vector<32x1xf32>
    %193 = arith.mulf %191, %192 : vector<32x1xf32>
    %cst_77 = arith.constant 0.000000e+00 : f32
    %194 = vector.broadcast %cst_77 : f32 to vector<1x1xf32>
    %195 = vector.extract_strided_slice %193 {offsets = [0, 0], sizes = [31, 1], strides = [1, 1]} : vector<32x1xf32> to vector<31x1xf32>
    %196 = tpu.concatenate %194, %195 in 0 : vector<1x1xf32>, vector<31x1xf32> -> vector<32x1xf32>
    %197 = vector.extract_strided_slice %193 {offsets = [1, 0], sizes = [31, 1], strides = [1, 1]} : vector<32x1xf32> to vector<31x1xf32>
    %198 = tpu.concatenate %197, %194 in 0 : vector<31x1xf32>, vector<1x1xf32> -> vector<32x1xf32>
    %199 = vector.broadcast %167 : f32 to vector<32x1xf32>
    %200 = arith.mulf %199, %196 : vector<32x1xf32>
    %201 = vector.broadcast %168 : f32 to vector<32x1xf32>
    %202 = arith.mulf %201, %193 : vector<32x1xf32>
    %203 = arith.addf %200, %202 : vector<32x1xf32>
    %204 = vector.broadcast %169 : f32 to vector<32x1xf32>
    %205 = arith.mulf %204, %198 : vector<32x1xf32>
    %206 = arith.addf %203, %205 : vector<32x1xf32>
    %207 = arith.negf %206 : vector<32x1xf32>
    %208 = math.exp %207 : vector<32x1xf32>
    %cst_78 = arith.constant 1.000000e+00 : f32
    %209 = vector.broadcast %cst_78 : f32 to vector<32x1xf32>
    %210 = arith.addf %209, %208 : vector<32x1xf32>
    %211 = arith.divf %209, %210 : vector<32x1xf32>
    %212 = vector.broadcast %211 : vector<32x1xf32> to vector<32x22xf32>
    %213 = arith.mulf %186, %212 : vector<32x22xf32>
    %214 = vector.extract_strided_slice %213 {offsets = [0, 0], sizes = [32, 21], strides = [1, 1]} : vector<32x22xf32> to vector<32x21xf32>
    %215 = vector.extract_strided_slice %213 {offsets = [0, 1], sizes = [32, 21], strides = [1, 1]} : vector<32x22xf32> to vector<32x21xf32>
    %216 = arith.maximumf %214, %215 : vector<32x21xf32>
    %217 = vector.extract_strided_slice %216 {offsets = [0, 0], sizes = [32, 15], strides = [1, 1]} : vector<32x21xf32> to vector<32x15xf32>
    %218 = vector.extract_strided_slice %216 {offsets = [0, 6], sizes = [32, 15], strides = [1, 1]} : vector<32x21xf32> to vector<32x15xf32>
    %219 = arith.maximumf %217, %218 : vector<32x15xf32>
    %c0_79 = arith.constant 0 : index
    %c0_80 = arith.constant 0 : index
    %220 = vector.load %arg20[%c0_79, %c0_80] : memref<15x16xf32, #tpu.memory_space<vmem>>, vector<15x16xf32>
    %cst_81 = arith.constant dense<0.000000e+00> : vector<32x16xf32>
    %221 = tpu.matmul %219, %220, %cst_81 {dimension_numbers = #tpu.dot_dimension_numbers<[1], [0], [0], [1], [0, 0, 1, 1], [], []>} : vector<32x15xf32>, vector<15x16xf32>, vector<32x16xf32> -> vector<32x16xf32>
    %c4 = arith.constant 4 : index
    %c0_82 = arith.constant 0 : index
    %222 = memref.load %arg2[%c4, %c0_82] : memref<5x3xf32, #tpu.memory_space<smem>>
    %c4_83 = arith.constant 4 : index
    %c1_84 = arith.constant 1 : index
    %223 = memref.load %arg2[%c4_83, %c1_84] : memref<5x3xf32, #tpu.memory_space<smem>>
    %c4_85 = arith.constant 4 : index
    %c2_86 = arith.constant 2 : index
    %224 = memref.load %arg2[%c4_85, %c2_86] : memref<5x3xf32, #tpu.memory_space<smem>>
    %225 = vector.extract_strided_slice %221 {offsets = [0, 0], sizes = [32, 6], strides = [1, 1]} : vector<32x16xf32> to vector<32x6xf32>
    %226 = vector.extract_strided_slice %221 {offsets = [0, 1], sizes = [32, 6], strides = [1, 1]} : vector<32x16xf32> to vector<32x6xf32>
    %227 = vector.extract_strided_slice %221 {offsets = [0, 2], sizes = [32, 6], strides = [1, 1]} : vector<32x16xf32> to vector<32x6xf32>
    %228 = vector.extract_strided_slice %221 {offsets = [0, 4], sizes = [32, 6], strides = [1, 1]} : vector<32x16xf32> to vector<32x6xf32>
    %229 = vector.extract_strided_slice %221 {offsets = [0, 5], sizes = [32, 6], strides = [1, 1]} : vector<32x16xf32> to vector<32x6xf32>
    %230 = vector.extract_strided_slice %221 {offsets = [0, 6], sizes = [32, 6], strides = [1, 1]} : vector<32x16xf32> to vector<32x6xf32>
    %231 = vector.extract_strided_slice %221 {offsets = [0, 8], sizes = [32, 6], strides = [1, 1]} : vector<32x16xf32> to vector<32x6xf32>
    %232 = vector.extract_strided_slice %221 {offsets = [0, 9], sizes = [32, 6], strides = [1, 1]} : vector<32x16xf32> to vector<32x6xf32>
    %233 = vector.extract_strided_slice %221 {offsets = [0, 10], sizes = [32, 6], strides = [1, 1]} : vector<32x16xf32> to vector<32x6xf32>
    %234 = tpu.concatenate %225, %226, %227, %228, %229, %230, %231, %232, %233 in 0 : vector<32x6xf32>, vector<32x6xf32>, vector<32x6xf32>, vector<32x6xf32>, vector<32x6xf32>, vector<32x6xf32>, vector<32x6xf32>, vector<32x6xf32>, vector<32x6xf32> -> vector<288x6xf32>
    %c0_87 = arith.constant 0 : index
    %c0_88 = arith.constant 0 : index
    %235 = vector.load %arg21[%c0_87, %c0_88] : memref<32x288xf32, #tpu.memory_space<vmem>>, vector<32x288xf32>
    %cst_89 = arith.constant dense<0.000000e+00> : vector<32x6xf32>
    %236 = tpu.matmul %235, %234, %cst_89 {dimension_numbers = #tpu.dot_dimension_numbers<[1], [0], [0], [1], [0, 0, 1, 1], [], []>} : vector<32x288xf32>, vector<288x6xf32>, vector<32x6xf32> -> vector<32x6xf32>
    %c0_90 = arith.constant 0 : index
    %c0_91 = arith.constant 0 : index
    %237 = vector.load %arg22[%c0_90, %c0_91] : memref<32x1xf32, #tpu.memory_space<vmem>>, vector<32x1xf32>
    %238 = vector.broadcast %237 : vector<32x1xf32> to vector<32x6xf32>
    %239 = arith.addf %236, %238 : vector<32x6xf32>
    %cst_92 = arith.constant 0.000000e+00 : f32
    %240 = vector.broadcast %cst_92 : f32 to vector<32x6xf32>
    %241 = arith.maximumf %239, %240 : vector<32x6xf32>
    %c0_93 = arith.constant 0 : index
    %c0_94 = arith.constant 0 : index
    %242 = vector.load %arg23[%c0_93, %c0_94] : memref<1x6xf32, #tpu.memory_space<vmem>>, vector<1x6xf32>
    %243 = vector.broadcast %242 : vector<1x6xf32> to vector<32x6xf32>
    %244 = arith.mulf %241, %243 : vector<32x6xf32>
    %cst_95 = arith.constant dense<0.000000e+00> : vector<32xf32>
    %245 = vector.multi_reduction <add>, %244, %cst_95 [1] : vector<32x6xf32> to vector<32xf32>
    %246 = vector.shape_cast %245 : vector<32xf32> to vector<32x1xf32>
    %cst_96 = arith.constant 2.500000e-01 : f32
    %247 = vector.broadcast %cst_96 : f32 to vector<32x1xf32>
    %248 = arith.mulf %246, %247 : vector<32x1xf32>
    %cst_97 = arith.constant 0.000000e+00 : f32
    %249 = vector.broadcast %cst_97 : f32 to vector<1x1xf32>
    %250 = vector.extract_strided_slice %248 {offsets = [0, 0], sizes = [31, 1], strides = [1, 1]} : vector<32x1xf32> to vector<31x1xf32>
    %251 = tpu.concatenate %249, %250 in 0 : vector<1x1xf32>, vector<31x1xf32> -> vector<32x1xf32>
    %252 = vector.extract_strided_slice %248 {offsets = [1, 0], sizes = [31, 1], strides = [1, 1]} : vector<32x1xf32> to vector<31x1xf32>
    %253 = tpu.concatenate %252, %249 in 0 : vector<31x1xf32>, vector<1x1xf32> -> vector<32x1xf32>
    %254 = vector.broadcast %222 : f32 to vector<32x1xf32>
    %255 = arith.mulf %254, %251 : vector<32x1xf32>
    %256 = vector.broadcast %223 : f32 to vector<32x1xf32>
    %257 = arith.mulf %256, %248 : vector<32x1xf32>
    %258 = arith.addf %255, %257 : vector<32x1xf32>
    %259 = vector.broadcast %224 : f32 to vector<32x1xf32>
    %260 = arith.mulf %259, %253 : vector<32x1xf32>
    %261 = arith.addf %258, %260 : vector<32x1xf32>
    %262 = arith.negf %261 : vector<32x1xf32>
    %263 = math.exp %262 : vector<32x1xf32>
    %cst_98 = arith.constant 1.000000e+00 : f32
    %264 = vector.broadcast %cst_98 : f32 to vector<32x1xf32>
    %265 = arith.addf %264, %263 : vector<32x1xf32>
    %266 = arith.divf %264, %265 : vector<32x1xf32>
    %267 = vector.broadcast %266 : vector<32x1xf32> to vector<32x6xf32>
    %268 = arith.mulf %241, %267 : vector<32x6xf32>
    %269 = vector.extract_strided_slice %268 {offsets = [0, 0], sizes = [32, 5], strides = [1, 1]} : vector<32x6xf32> to vector<32x5xf32>
    %270 = vector.extract_strided_slice %268 {offsets = [0, 1], sizes = [32, 5], strides = [1, 1]} : vector<32x6xf32> to vector<32x5xf32>
    %271 = arith.maximumf %269, %270 : vector<32x5xf32>
    %272 = vector.extract_strided_slice %271 {offsets = [0, 0], sizes = [32, 1], strides = [1, 1]} : vector<32x5xf32> to vector<32x1xf32>
    %273 = vector.extract_strided_slice %271 {offsets = [0, 4], sizes = [32, 1], strides = [1, 1]} : vector<32x5xf32> to vector<32x1xf32>
    %274 = arith.maximumf %272, %273 : vector<32x1xf32>
    %c0_99 = arith.constant 0 : index
    %c0_100 = arith.constant 0 : index
    %275 = vector.load %arg3[%c0_99, %c0_100] : memref<32x10xf32, #tpu.memory_space<vmem>>, vector<32x10xf32>
    %276 = vector.broadcast %274 : vector<32x1xf32> to vector<32x10xf32>
    %277 = arith.mulf %275, %276 : vector<32x10xf32>
    %cst_101 = arith.constant dense<0.000000e+00> : vector<10xf32>
    %278 = vector.multi_reduction <add>, %277, %cst_101 [0] : vector<32x10xf32> to vector<10xf32>
    %279 = vector.shape_cast %278 : vector<10xf32> to vector<1x10xf32>
    %c0_102 = arith.constant 0 : index
    %c0_103 = arith.constant 0 : index
    %280 = vector.load %arg4[%c0_102, %c0_103] : memref<1x10xf32, #tpu.memory_space<vmem>>, vector<1x10xf32>
    %281 = arith.addf %279, %280 : vector<1x10xf32>
    %282 = vector.shape_cast %281 : vector<1x10xf32> to vector<1x1x10xf32>
    %c0_104 = arith.constant 0 : index
    %c0_105 = arith.constant 0 : index
    %c0_106 = arith.constant 0 : index
    %283 = vector.load %arg24[%c0_104, %c0_105, %c0_106] : memref<1x1x10xf32, #tpu.memory_space<vmem>>, vector<1x1x10xf32>
    tpu.vector_store %arg24[%c0_104, %c0_105, %c0_106], %282 {strides = array<i32>} : memref<1x1x10xf32, #tpu.memory_space<vmem>>, vector<1x1x10xf32>,
    return
  }
  func.func @transform_0(%arg0: i32) -> (i32, i32, i32) {
    %c0_i32 = arith.constant 0 : i32
    %c0_i32_0 = arith.constant 0 : i32
    %c0_i32_1 = arith.constant 0 : i32
    return %arg0, %c0_i32, %c0_i32_0 : i32, i32, i32
  }
  func.func @transform_1(%arg0: i32) -> (i32, i32) {
    %c0_i32 = arith.constant 0 : i32
    %c0_i32_0 = arith.constant 0 : i32
    %c0_i32_1 = arith.constant 0 : i32
    return %c0_i32, %c0_i32_0 : i32, i32
  }
  func.func @transform_2(%arg0: i32) -> (i32, i32) {
    %c0_i32 = arith.constant 0 : i32
    %c0_i32_0 = arith.constant 0 : i32
    %c0_i32_1 = arith.constant 0 : i32
    return %c0_i32, %c0_i32_0 : i32, i32
  }
  func.func @transform_3(%arg0: i32) -> (i32, i32) {
    %c0_i32 = arith.constant 0 : i32
    %c0_i32_0 = arith.constant 0 : i32
    %c0_i32_1 = arith.constant 0 : i32
    return %c0_i32, %c0_i32_0 : i32, i32
  }
  func.func @transform_4(%arg0: i32) -> (i32, i32) {
    %c0_i32 = arith.constant 0 : i32
    %c0_i32_0 = arith.constant 0 : i32
    %c0_i32_1 = arith.constant 0 : i32
    return %c0_i32, %c0_i32_0 : i32, i32
  }
  func.func @transform_5(%arg0: i32) -> (i32, i32) {
    %c0_i32 = arith.constant 0 : i32
    %c0_i32_0 = arith.constant 0 : i32
    %c0_i32_1 = arith.constant 0 : i32
    return %c0_i32, %c0_i32_0 : i32, i32
  }
  func.func @transform_6(%arg0: i32) -> (i32, i32) {
    %c0_i32 = arith.constant 0 : i32
    %c0_i32_0 = arith.constant 0 : i32
    %c0_i32_1 = arith.constant 0 : i32
    return %c0_i32, %c0_i32_0 : i32, i32
  }
  func.func @transform_7(%arg0: i32) -> (i32, i32) {
    %c0_i32 = arith.constant 0 : i32
    %c0_i32_0 = arith.constant 0 : i32
    %c0_i32_1 = arith.constant 0 : i32
    return %c0_i32, %c0_i32_0 : i32, i32
  }
  func.func @transform_8(%arg0: i32) -> (i32, i32) {
    %c0_i32 = arith.constant 0 : i32
    %c0_i32_0 = arith.constant 0 : i32
    %c0_i32_1 = arith.constant 0 : i32
    return %c0_i32, %c0_i32_0 : i32, i32
  }
  func.func @transform_9(%arg0: i32) -> (i32, i32) {
    %c0_i32 = arith.constant 0 : i32
    %c0_i32_0 = arith.constant 0 : i32
    %c0_i32_1 = arith.constant 0 : i32
    return %c0_i32, %c0_i32_0 : i32, i32
  }
  func.func @transform_10(%arg0: i32) -> (i32, i32) {
    %c0_i32 = arith.constant 0 : i32
    %c0_i32_0 = arith.constant 0 : i32
    %c0_i32_1 = arith.constant 0 : i32
    return %c0_i32, %c0_i32_0 : i32, i32
  }
  func.func @transform_11(%arg0: i32) -> (i32, i32) {
    %c0_i32 = arith.constant 0 : i32
    %c0_i32_0 = arith.constant 0 : i32
    %c0_i32_1 = arith.constant 0 : i32
    return %c0_i32, %c0_i32_0 : i32, i32
  }
  func.func @transform_12(%arg0: i32) -> (i32, i32) {
    %c0_i32 = arith.constant 0 : i32
    %c0_i32_0 = arith.constant 0 : i32
    %c0_i32_1 = arith.constant 0 : i32
    return %c0_i32, %c0_i32_0 : i32, i32
  }
  func.func @transform_13(%arg0: i32) -> (i32, i32) {
    %c0_i32 = arith.constant 0 : i32
    %c0_i32_0 = arith.constant 0 : i32
    %c0_i32_1 = arith.constant 0 : i32
    return %c0_i32, %c0_i32_0 : i32, i32
  }
  func.func @transform_14(%arg0: i32) -> (i32, i32) {
    %c0_i32 = arith.constant 0 : i32
    %c0_i32_0 = arith.constant 0 : i32
    %c0_i32_1 = arith.constant 0 : i32
    return %c0_i32, %c0_i32_0 : i32, i32
  }
  func.func @transform_15(%arg0: i32) -> (i32, i32) {
    %c0_i32 = arith.constant 0 : i32
    %c0_i32_0 = arith.constant 0 : i32
    %c0_i32_1 = arith.constant 0 : i32
    return %c0_i32, %c0_i32_0 : i32, i32
  }
  func.func @transform_16(%arg0: i32) -> (i32, i32) {
    %c0_i32 = arith.constant 0 : i32
    %c0_i32_0 = arith.constant 0 : i32
    %c0_i32_1 = arith.constant 0 : i32
    return %c0_i32, %c0_i32_0 : i32, i32
  }
  func.func @transform_17(%arg0: i32) -> (i32, i32) {
    %c0_i32 = arith.constant 0 : i32
    %c0_i32_0 = arith.constant 0 : i32
    %c0_i32_1 = arith.constant 0 : i32
    return %c0_i32, %c0_i32_0 : i32, i32
  }
  func.func @transform_18(%arg0: i32) -> (i32, i32) {
    %c0_i32 = arith.constant 0 : i32
    %c0_i32_0 = arith.constant 0 : i32
    %c0_i32_1 = arith.constant 0 : i32
    return %c0_i32, %c0_i32_0 : i32, i32
  }
  func.func @transform_19(%arg0: i32) -> (i32, i32) {
    %c0_i32 = arith.constant 0 : i32
    %c0_i32_0 = arith.constant 0 : i32
    %c0_i32_1 = arith.constant 0 : i32
    return %c0_i32, %c0_i32_0 : i32, i32
  }
  func.func @transform_20(%arg0: i32) -> (i32, i32) {
    %c0_i32 = arith.constant 0 : i32
    %c0_i32_0 = arith.constant 0 : i32
    %c0_i32_1 = arith.constant 0 : i32
    return %c0_i32, %c0_i32_0 : i32, i32
  }
  func.func @transform_21(%arg0: i32) -> (i32, i32) {
    %c0_i32 = arith.constant 0 : i32
    %c0_i32_0 = arith.constant 0 : i32
    %c0_i32_1 = arith.constant 0 : i32
    return %c0_i32, %c0_i32_0 : i32, i32
  }
  func.func @transform_22(%arg0: i32) -> (i32, i32) {
    %c0_i32 = arith.constant 0 : i32
    %c0_i32_0 = arith.constant 0 : i32
    %c0_i32_1 = arith.constant 0 : i32
    return %c0_i32, %c0_i32_0 : i32, i32
  }
  func.func @transform_23(%arg0: i32) -> (i32, i32, i32) {
    %c0_i32 = arith.constant 0 : i32
    %c0_i32_0 = arith.constant 0 : i32
    %c0_i32_1 = arith.constant 0 : i32
    return %arg0, %c0_i32, %c0_i32_0 : i32, i32, i32
  }
}

</mosaic_0001>

<bundles_post_ra>
// kernel: forward.1
= control target key start
LH: loop header
LB: loop body
LE: loop exit
PB: predicated region body
PF: predicated region fallthrough
CT: control target
= control target key end

     0   :  { %s9164_s0 = inlined_call_operand.vmem [shape: f32[2,8,1156], index: 0, kind: input, shape index: {}]   ;;  %s9165_s1 = inlined_call_operand.vmem [shape: f32[5,3], index: 1, kind: input, shape index: {}]   ;;  %s9166_s2 = inlined_call_operand.vmem [shape: f32[32,10], index: 2, kind: input, shape index: {}]   ;;  %s9167_s3 = inlined_call_operand.vmem [shape: f32[1,10], index: 3, kind: input, shape index: {}]   ;;  %s9168_s4 = inlined_call_operand.vmem [shape: f32[8,72], index: 4, kind: input, shape index: {}]   ;;  %s9169_s5 = inlined_call_operand.vmem [shape: f32[8,1], index: 5, kind: input, shape index: {}]   ;;  %s9170_s6 = inlined_call_operand.vmem [shape: f32[1,1086], index: 6, kind: input, shape index: {}]   ;;  %s9171_s7 = inlined_call_operand.vmem [shape: f32[1051,324], index: 7, kind: input, shape index: {}]   ;;  %s9172_s8 = inlined_call_operand.vmem [shape: f32[16,72], index: 8, kind: input, shape index: {}]   ;;  %s9173_s9 = inlined_call_operand.vmem [shape: f32[16,1], index: 9, kind: input, shape index: {}]   ;;  %s9174_s10 = inlined_call_operand.vmem [shape: f32[1,286], index: 10, kind: input, shape index: {}]   ;;  %s9175_s11 = inlined_call_operand.vmem [shape: f32[267,100], index: 11, kind: input, shape index: {}]   ;;  %s9176_s12 = inlined_call_operand.vmem [shape: f32[16,144], index: 12, kind: input, shape index: {}]   ;;  %s9177_s13 = inlined_call_operand.vmem [shape: f32[16,1], index: 13, kind: input, shape index: {}]   ;;  %s9178_s14 = inlined_call_operand.vmem [shape: f32[1,78], index: 14, kind: input, shape index: {}]   ;;  %s9179_s15 = inlined_call_operand.vmem [shape: f32[67,36], index: 15, kind: input, shape index: {}]   ;;  %s9180_s16 = inlined_call_operand.vmem [shape: f32[32,144], index: 16, kind: input, shape index: {}]   ;;  %s9181_s17 = inlined_call_operand.vmem [shape: f32[32,1], index: 17, kind: input, shape index: {}]   ;;  %s9182_s18 = inlined_call_operand.vmem [shape: f32[1,22], index: 18, kind: input, shape index: {}]   ;;  %s9183_s19 = inlined_call_operand.vmem [shape: f32[15,16], index: 19, kind: input, shape index: {}]   ;;  %s9184_s20 = inlined_call_operand.vmem [shape: f32[32,288], index: 20, kind: input, shape index: {}]   ;;  %s9185_s21 = inlined_call_operand.vmem [shape: f32[32,1], index: 21, kind: input, shape index: {}]   ;;  %s9186_s22 = inlined_call_operand.vmem [shape: f32[1,6], index: 22, kind: input, shape index: {}]   ;;  %s9187_s23 = inlined_call_operand.hbm [shape: f32[2,1,10], index: 23, kind: output, shape index: {}]  }
   0x1   :  { %9214 = sst [smem:[#allocation16_spill]] %s9164_s0 }
   0x2   :  { %9215 = sst [smem:[#allocation17_spill]] %s9165_s1 }
   0x3   :  { %9216 = sst [smem:[#allocation18_spill]] %s9166_s2 }
   0x4   :  { %9217 = sst [smem:[#allocation19_spill]] %s9167_s3 }
   0x5   :  { %9218 = sst [smem:[#allocation20_spill]] %s9168_s4 }
   0x6   :  { %9219 = sst [smem:[#allocation21_spill]] %s9169_s5 }
   0x7   :  { %9220 = sst [smem:[#allocation22_spill]] %s9170_s6 }
   0x8   :  { %9221 = sst [smem:[#allocation23_spill]] %s9171_s7 }
   0x9   :  { %9222 = sst [smem:[#allocation24_spill]] %s9187_s23 }
   0xa   :  { %28 = vsyncpa [#allocation4], 0 }
   0xb   :  { %29 = vsyncpa [#allocation3], 0 }
   0xc   :  { %31 = vsyncpa [#allocation3 + $0x1], 0  ;;  %s6677_s4 = smov 0   ;;  %s6679_s30 = smov 0  }
   0xd   :  { %s6681_s24 = smov 0   ;;  %s6683_s25 = smov 0  }
   0xe LB: > { %9223 = sst [smem:[#allocation8_spill]] %s6510_s4  ;;  %s6698_s5 = sadd.s32 4294967295, %s6522_s25   ;;  %s6522_s25 = sphi %s6683_s25, %s9256_s25   ;;  %s6518_s24 = sphi %s6681_s24, %s9258_s24   ;;  %s6514_s30 = sphi %s6679_s30, %s9260_s30   ;;  %s6510_s4 = sphi %s6677_s4, %s9259_s4  }
   0xf   : > { %9224 = sst [smem:[#allocation9_spill]] %s6518_s24  ;;  %s4786_s1 = sadd.s32 4294967294, %s6522_s25  }
  0x10   : > { %9225 = sst [smem:[#allocation10_spill]] %s6522_s25  ;;  %s6702_s26 = sadd.s32 1, %s6522_s25  }
  0x11   : > { %9226 = sst [smem:[#allocation11_spill]] %s6698_s5  ;;  %s532_s2 = sadd.s32 1, %s6518_s24 }
  0x12   : > { %9227 = sst [smem:[#allocation12_spill]] %s6702_s26  ;;  %s529_s6 = ssub.s32 %s6522_s25, %s6702_s26 }
  0x13   : > { %p542_p0 = scmp.ne.s32.totalorder %s6518_s24, %s6514_s30  ;;  %p530_p1 = scmp.eq.s32.totalorder %s529_s6, 0 }
  0x14   : > { %p543_p2 = scmp.eq.s32.totalorder %s6698_s5, 1  ;;  %p548_p3 = scmp.ne.s32.totalorder %s6514_s30, %s6510_s4 }
  0x15   : > { %p549_p4 = scmp.eq.s32.totalorder %s4786_s1, 1  ;;  %p4787_p7 = scmp.ge.s32.totalorder %s6522_s25, 1 }
  0x16   : > { %s6713_s27 = scalar_select %p530_p1, %s6518_s24, %s532_s2  }
  0x17   : > { %p6715_p5 = por %p543_p2, %p542_p0  ;;  %p6719_p6 = por %p549_p4, %p548_p3 }
  0x18   : > { %9228 = sst [smem:[#allocation13_spill]] %s6713_s27  ;;  %p556_p8 = scmp.lt.s32.totalorder %s6522_s25, 3 }
  0x19   : > { %s9229_s7 = scalar_select %p6715_p5, 1, 0 }
  0x1a   : > { %s9231_s28 = scalar_select %p6719_p6, 1, 0 }
  0x1b   : > { %9230 = sst [smem:[#allocation14_spill]] %s9229_s7  ;;  %p5930_p9 = scmp.eq.s32.totalorder %s6698_s5, 0 }
  0x1c   : > { %9232 = sst [smem:[#allocation15_spill]] %s9231_s28  ;;  %p6726_p10 = pnand %p4787_p7, %p556_p8 }
  0x1d   : > { %s9234_s1 = sld [smem:[#allocation17_spill]] }
  0x1e   : > { %p5922_p11 = pneg %p6726_p10 }
  0x20   : > { %p5923_p12 = pnand %p5930_p9, %p5922_p11 }
  0x22   : > { %p6443_p0 = pneg %p5923_p12 }
  0x23   : > { %s569_s2 = sshll.u32 %s9234_s1, 4  ;;  %s570_s2 = int_to_ptr.vmem [resolvable:$true] %s569_s2 }
  0x24   : > { %s6441_s6 = scalar_lea.vmem %s570_s2, 128  ;;  %p6449_p3 = scmp.lt.s32.totalorder %s570_s2, %s570_s2 }
  0x25   : > { %p6442_p13 = scmp.ne.s32.totalorder %s570_s2, %s6441_s6  ;;  %p6450_p4 = scmp.lt.s32.totalorder %s6441_s6, %s6441_s6 }
  0x27   : > { %p6444_p1 = pnand %p6443_p0, %p6442_p13  ;;  %p6451_p7 = por %p6450_p4, %p6449_p3 }
  0x29   : > { %p6445_p2 = pneg %p6444_p1 }
  0x2b   : > { %p6452_p8 = pnand %p6451_p7, %p6445_p2 }
  0x2d   : > { %6455 = shalt.err (!%p6452_p8)
}
  0x2e   : > { %s6524_s27 = smov [#allocation2]   ;;  %653 = sbr.rel (%p6726_p10) target bundleno = 6130 (0x17f2), region = 112 }
  0x2f   : > { %5925 = dma.vmem_to_smem (!%p5923_p12), %s570_s2, 128, %s6524_s27, [#allocation4]  }
  0x35   : > { %6501 = dma.done.wait (%p5930_p9), [#allocation4], 128  }
  0x36   : > { %6503 = vsyncadd (%p5930_p9), [#allocation4], 4294967168 }
  0x37   : > { %659 = sfence }
  0x38   : > { %p717_p11 = scmp.lt.s32.totalorder %s6698_s5, 1  ;;  %s9235_s24 = sld [smem:[#allocation16_spill]]  ;;  %v6532_v12 = vmov 0.0   ;;  %v6534_v16 = vmov 0   ;;  %vm762_vm0 = vcmask 1039360   ;;  %vm798_vm1 = vcmask 1031168  }
  0x39   : > { %s9196_s27 = smov 126   ;;  %s9198_s29 = smov 94   ;;  %1117 = vmatprep.mubr.f32.mxu0 %v6532_v12  ;;  %1188 = vmatprep.mubr.f32.mxu1 %v6532_v12  ;;  %vm834_vm2 = vcmask 769024   ;;  %vm870_vm3 = vcmask 760832   ;;  %vm906_vm4 = vcmask 752640   ;;  %vm945_vm5 = vcmask 490496  }
  0x3a   : > { %s718_s3 = scalar_select %p717_p11, %s6698_s5, 1  ;;  %6137 = vset.pattern.permute.xlu1 %v6534_v16  ;;  %6208 = vset.pattern.permute.xlu0 %v6534_v16  ;;  %vm984_vm6 = vcmask 482304   ;;  %vm1023_vm7 = vcmask 474112   ;;  %vm1049_vm8 = vcmask 588800   ;;  %vm6536_vm9 = vmmov 0  }
  0x3b   : > { %s9194_s2 = smov 92   ;;  %s6531_s1 = smov 60   ;;  %vm1481_vm10 = vcmask 506880   ;;  %vm1490_vm11 = vcmask 1040384   ;;  %vm1494_vm12 = vcmask 1046528   ;;  %vm2030_vm13 = vcmask 1042432  }
  0x3c   : > { %s5915_s0 = smul.u32 80, %s718_s3  ;;  %s6529_s3 = smov 93   ;;  %vm6537_vm14 = vmmov 1  }
  0x3d   : > { %s6533_s6 = smov 58   ;;  %vm8426_vm15 = vmpackc.low %vm2030_vm13, %vm6537_vm14  ;;  %s9244_s5 = smov 126  }
  0x3e   : > { %s6748_s26 = scalar_lea.vmem %s9235_s24, %s5915_s0  ;;  %s9204_s24 = smov 127  }
  0x3f   : > { %v6751_v0 = vld [vmem:[%s6748_s26 + $0x8] sm:$0xff]  ;;  %v6754_v1 = vld [vmem:[%s6748_s26 + $0x10] sm:$0xff]  ;;  %v6757_v2 = vld [vmem:[%s6748_s26] sm:$0xff]  ;;  %s6530_s0 = smov 59   ;;  %s9245_s23 = smov 92  }
  0x40   : > { %v6007_v3 = vpack.i.bf16 %v6754_v1, %v6751_v0  ;;  %v6762_v4 = vld [vmem:[%s6748_s26 + $0x18] sm:$0xff]  ;;  %v6779_v6 = vld [vmem:[%s6748_s26 + $0x30] sm:$0xff]  ;;  %v6785_v8 = vld [vmem:[%s6748_s26 + $0x20] sm:$0xff]  ;;  %s6542_s28 = smov 90   ;;  %s4809_s7 = sld [smem:[#allocation2 + $0x82]] }
  0x41   : > { %v6002_v5 = vpack.i.bf16 %v6762_v4, %v6757_v2  ;;  %v6782_v7 = vld [vmem:[%s6748_s26 + $0x38] sm:$0xff]  ;;  %v6788_v9 = vld [vmem:[%s6748_s26 + $0x28] sm:$0xff]  ;;  %v6822_v13 = vld [vmem:[%s6748_s26 + $0x40] sm:$0xff]  ;;  %s4819_s4 = sld [smem:[#allocation2 + $0x100]]  ;;  %s4820_s25 = sld [smem:[#allocation2 + $0x101]] }
  0x42   : > { %6008 = vrot.lane.b32.xlu1 %v6007_v3, %s9196_s27  ;;  %5998 = vrot.lane.b32.xlu0 %v6007_v3, %s9204_s24  ;;  %v6072_v10 = vpack.i.bf16 %v6782_v7, %v6779_v6  ;;  %v6067_v11 = vpack.i.bf16 %v6788_v9, %v6785_v8  ;;  %v6112_v14 = vpack.i.bf16 %v6822_v13, %v6782_v7  ;;  %v731_v15 = vld [vmem:[%s6748_s26 + $0x48] sm:$0xff]  ;;  %s9239_s26 = sld [smem:[#allocation23_spill]] }
  0x46   : > { %6013 = vrot.lane.b32.xlu1 %v6007_v3, %s9198_s29  ;;  %6003 = vrot.lane.b32.xlu0 %v6002_v5, %s9204_s24 }
  0x4a   : > { %6023 = vrot.lane.b32.xlu1 %v6002_v5, %s9198_s29  ;;  %6018 = vrot.lane.b32.xlu0 %v6002_v5, %s9196_s27 }
  0x4e   : > { %6033 = vrot.lane.b32.xlu1 %v6007_v3, %s9194_s2  ;;  %6028 = vrot.lane.b32.xlu0 %v6007_v3, %s6529_s3 }
  0x52   : > { %6043 = vrot.lane.b32.xlu1 %v6002_v5, %s9194_s2  ;;  %6038 = vrot.lane.b32.xlu0 %v6002_v5, %s6529_s3 }
  0x56   : > { %6053 = vrot.lane.b32.xlu1 %v6007_v3, %s6530_s0  ;;  %6048 = vrot.lane.b32.xlu0 %v6007_v3, %s6531_s1 }
  0x5a   : > { %6063 = vrot.lane.b32.xlu1 %v6002_v5, %s6530_s0  ;;  %6058 = vrot.lane.b32.xlu0 %v6002_v5, %s6531_s1 }
  0x5e   : > { %6073 = vrot.lane.b32.xlu1 %v6072_v10, %s9204_s24  ;;  %6068 = vrot.lane.b32.xlu0 %v6067_v11, %s9204_s24 }
  0x62   : > { %1007 = vrot.lane.b32.xlu1 %v6754_v1, %s6533_s6  ;;  %1005 = vrot.lane.b32.xlu0 %v6751_v0, %s6533_s6 }
  0x66   : > { %6083 = vrot.lane.b32.xlu1 %v6067_v11, %s9198_s29  ;;  %6078 = vrot.lane.b32.xlu0 %v6067_v11, %s9196_s27 }
  0x6a   : > { %6088 = vrot.lane.b32.xlu1 %v6072_v10, %s9196_s27  ;;  %1003 = vrot.lane.b32.xlu0 %v6757_v2, %s6533_s6 }
  0x6e   : > { %6093 = vrot.lane.b32.xlu1 %v6067_v11, %s6529_s3  ;;  %828 = vrot.lane.b32.xlu0 %v6779_v6, %s9198_s29 }
  0x72   : > { %864 = vrot.lane.b32.xlu1 %v6779_v6, %s6529_s3  ;;  %6098 = vrot.lane.b32.xlu0 %v6067_v11, %s9194_s2 }
  0x76   : > { %6103 = vrot.lane.b32.xlu1 %v6067_v11, %s6531_s1  ;;  %900 = vrot.lane.b32.xlu0 %v6779_v6, %s9194_s2 }
  0x7a   : > { %937 = vrot.lane.b32.xlu1 %v6779_v6, %s6531_s1  ;;  %6108 = vrot.lane.b32.xlu0 %v6067_v11, %s6530_s0 }
  0x7e   : > { %760 = vrot.lane.b32.xlu1 %v6822_v13, %s9204_s24  ;;  %976 = vrot.lane.b32.xlu0 %v6779_v6, %s6530_s0 }
  0x82   : > { %1011 = vrot.lane.b32.xlu1 %v6785_v8, %s6533_s6  ;;  %1009 = vrot.lane.b32.xlu0 %v6762_v4, %s6533_s6 }
  0x86   : > { %1015 = vrot.lane.b32.xlu1 %v6779_v6, %s6533_s6  ;;  %1013 = vrot.lane.b32.xlu0 %v6788_v9, %s6533_s6 }
  0x8a   : > { %6113 = vrot.lane.b32.xlu1 %v6112_v14, %s9198_s29  ;;  %796 = vrot.lane.b32.xlu0 %v6822_v13, %s9196_s27  ;;  %s9236_s27 = sld [smem:[#allocation21_spill]]  ;;  %s9241_s29 = smov 127  }
  0x8e   : > { %6123 = vrot.lane.b32.xlu1 %v6112_v14, %s9194_s2  ;;  %6118 = vrot.lane.b32.xlu0 %v6112_v14, %s6529_s3  ;;  %s9237_s2 = sld [smem:[#allocation20_spill]]  ;;  %s6540_s3 = smov 109  }
  0x90   : > { %v1043_v17 = vld [vmem:[%s9236_s27] sm:$0xff]  ;;  %s732_s27 = sld [smem:[#allocation2]] }
  0x92   : > { %6133 = vrot.lane.b32.xlu1 %v6112_v14, %s6530_s0  ;;  %6128 = vrot.lane.b32.xlu0 %v6112_v14, %s6531_s1 }
  0x96   : > { %982 = vrot.lane.b32.xlu1 %v731_v15, %s6530_s0  ;;  %943 = vrot.lane.b32.xlu0 %v731_v15, %s6531_s1  ;;  %s4794_s0 = sld [smem:[#allocation2 + $0x2]]  ;;  %s9210_s1 = smov 108  }
  0x9a   : > { %1019 = vrot.lane.b32.xlu1 %v6822_v13, %s6533_s6  ;;  %1017 = vrot.lane.b32.xlu0 %v6782_v7, %s6533_s6 }
  0x9e   : > { %1021 = vrot.lane.b32.xlu0 %v731_v15, %s6533_s6  ;;  %1046 = vperm.xlu1 %6137, %v1043_v17   ;;  %s9238_s6 = sld [smem:[#allocation22_spill]] }
  0xb4   : > { %v6856_v18 = vpop.permute.xlu1 %6008  ;;  %v6858_v19 = vpop.permute.xlu0 %5998 }
  0xb5   : > { %v6001_v20 = vunpack.i.h.bf16 %v6858_v19  ;;  %v6000_v21 = vunpack.i.l.bf16 %v6858_v19  ;;  %v6011_v22 = vunpack.i.h.bf16 %v6856_v18  ;;  %v6010_v23 = vunpack.i.l.bf16 %v6856_v18 }
  0xb7   : > { %v764_v24 = vsel %vm762_vm0, %v6000_v21, %v6001_v20  ;;  %v800_v32 = vsel %vm798_vm1, %v6010_v23, %v6011_v22 }
  0xb8   : > { %v6867_v25 = vpop.permute.xlu1 %6013  ;;  %v6869_v26 = vpop.permute.xlu0 %6003  ;;  %v5244_v27 = vpack.c.bf16 %v764_v24, %v6751_v0 }
  0xb9   : > { %v6016_v28 = vunpack.i.h.bf16 %v6867_v25  ;;  %v6015_v29 = vunpack.i.l.bf16 %v6867_v25  ;;  %v6005_v30 = vunpack.i.l.bf16 %v6869_v26  ;;  %v6006_v16 = vunpack.i.h.bf16 %v6869_v26 }
  0xba   : > { %5245 = vmatprep.subr.bf16.mxu0 %v5244_v27 }
  0xbb   : > { %v763_v31 = vsel %vm762_vm0, %v6005_v30, %v6000_v21  ;;  %v836_v33 = vsel %vm834_vm2, %v6015_v29, %v6016_v28  ;;  %v765_v30 = vsel %vm762_vm0, %v6001_v20, %v6006_v16 }
  0xbc   : > { %v6882_v34 = vpop.permute.xlu1 %6023  ;;  %v6884_v35 = vpop.permute.xlu0 %6018  ;;  %v5246_v36 = vpack.c.bf16 %v763_v31, %v6757_v2  ;;  %v5248_v37 = vpack.c.bf16 %v836_v33, %v800_v32 }
  0xbd   : > { %v6025_v38 = vunpack.i.l.bf16 %v6882_v34  ;;  %v6020_v39 = vunpack.i.l.bf16 %v6884_v35 }
  0xbe   : > { %5247 = vmatpush1.bf16.msra.mxu0 %v5246_v36 }
  0xbf   : > { %5249 = vmatprep.subr.bf16.mxu0 %v5248_v37  ;;  %v799_v40 = vsel %vm798_vm1, %v6020_v39, %v6010_v23  ;;  %v835_v41 = vsel %vm834_vm2, %v6025_v38, %v6015_v29  ;;  %v5262_v37 = vpack.c.bf16 %v765_v30, %v6754_v1  ;;  %v6026_v38 = vunpack.i.h.bf16 %v6882_v34 }
  0xc0   : > { %v6891_v42 = vpop.permute.xlu1 %6033  ;;  %v6893_v43 = vpop.permute.xlu0 %6028  ;;  %v5250_v44 = vpack.c.bf16 %v835_v41, %v799_v40  ;;  %v6021_v39 = vunpack.i.h.bf16 %v6884_v35 }
  0xc1   : > { %v6036_v45 = vunpack.i.h.bf16 %v6891_v42  ;;  %v6035_v46 = vunpack.i.l.bf16 %v6891_v42  ;;  %v6031_v47 = vunpack.i.h.bf16 %v6893_v43  ;;  %v6030_v48 = vunpack.i.l.bf16 %v6893_v43 }
  0xc2   : > { %5251 = vmatpush1.bf16.msra.mxu0 %v5250_v44  ;;  %v837_v1 = vsel %vm834_vm2, %v6016_v28, %v6026_v38 }
  0xc3   : > { %v872_v49 = vsel %vm870_vm3, %v6030_v48, %v6031_v47  ;;  %v908_v50 = vsel %vm906_vm4, %v6035_v46, %v6036_v45 }
  0xc4   : > { %v6905_v51 = vpop.permute.xlu1 %6043  ;;  %v6907_v52 = vpop.permute.xlu0 %6038  ;;  %v5252_v53 = vpack.c.bf16 %v908_v50, %v872_v49 }
  0xc5   : > { %v6045_v54 = vunpack.i.l.bf16 %v6905_v51  ;;  %v6040_v55 = vunpack.i.l.bf16 %v6907_v52 }
  0xc6   : > { %5253 = vmatprep.subr.bf16.mxu0 %v5252_v53 }
  0xc7   : > { %v871_v56 = vsel %vm870_vm3, %v6040_v55, %v6030_v48  ;;  %v907_v57 = vsel %vm906_vm4, %v6045_v54, %v6035_v46 }
  0xc8   : > { %v6913_v58 = vpop.permute.xlu1 %6053  ;;  %v6915_v59 = vpop.permute.xlu0 %6048  ;;  %v5254_v60 = vpack.c.bf16 %v907_v57, %v871_v56  ;;  %v6971_v57 = vld [vmem:[%s9237_s2] sm:$0xff]  ;;  %s4793_s2 = sld [smem:[#allocation2 + $0x1]] }
  0xc9   : > { %v6056_v61 = vunpack.i.h.bf16 %v6913_v58  ;;  %v6055_v62 = vunpack.i.l.bf16 %v6913_v58  ;;  %v6051_v63 = vunpack.i.h.bf16 %v6915_v59  ;;  %v6050_v0 = vunpack.i.l.bf16 %v6915_v59 }
  0xca   : > { %5255 = vmatpush1.bf16.msra.mxu0 %v5254_v60 }
  0xcb   : > { %v947_v2 = vsel %vm945_vm5, %v6050_v0, %v6051_v63  ;;  %v986_v3 = vsel %vm984_vm6, %v6055_v62, %v6056_v61 }
  0xcc   : > { %v6927_v5 = vpop.permute.xlu1 %6063  ;;  %v6929_v10 = vpop.permute.xlu0 %6058  ;;  %v5256_v11 = vpack.c.bf16 %v986_v3, %v947_v2 }
  0xcd   : > { %v6065_v14 = vunpack.i.l.bf16 %v6927_v5  ;;  %v6060_v15 = vunpack.i.l.bf16 %v6929_v10  ;;  %v6066_v42 = vunpack.i.h.bf16 %v6927_v5 }
  0xce   : > { %5257 = vmatprep.subr.bf16.mxu0 %v5256_v11 }
  0xcf   : > { %v946_v17 = vsel %vm945_vm5, %v6060_v15, %v6050_v0  ;;  %v985_v21 = vsel %vm984_vm6, %v6065_v14, %v6055_v62  ;;  %v6041_v14 = vunpack.i.h.bf16 %v6907_v52 }
  0xd0   : > { %v6936_v23 = vpop.permute.xlu1 %6073  ;;  %v6069_v24 = vpop.permute.xlu0 %6068  ;;  %v5258_v27 = vpack.c.bf16 %v985_v21, %v946_v17 }
  0xd1   : > { %v6070_v29 = vunpack.i.l.bf16 %v6069_v24  ;;  %v6075_v19 = vunpack.i.l.bf16 %v6936_v23  ;;  %v6071_v40 = vunpack.i.h.bf16 %v6069_v24 }
  0xd2   : > { %5259 = vmatpush1.bf16.msra.mxu0 %v5258_v27 }
  0xd3   : > { %v766_v31 = vsel %vm762_vm0, %v6006_v16, %v6070_v29  ;;  %v768_v34 = vsel %vm762_vm0, %v6071_v40, %v6075_v19  ;;  %v767_v49 = vsel %vm762_vm0, %v6070_v29, %v6071_v40 }
  0xd4   : > { %v6942_v32 = vpop.permute.xlu1 %1007  ;;  %v1006_v26 = vpop.permute.xlu0 %1005  ;;  %v5260_v33 = vpack.c.bf16 %v766_v31, %v6762_v4  ;;  %v801_v4 = vsel %vm798_vm1, %v6011_v22, %v6021_v39  ;;  %v5276_v56 = vpack.c.bf16 %v768_v34, %v6788_v9  ;;  %v5278_v60 = vpack.c.bf16 %v767_v49, %v6785_v8 }
  0xd5   : > { %v1025_v36 = vsel %vm1023_vm7, %v1006_v26, %v6942_v32  ;;  %v5266_v55 = vpack.c.bf16 %v837_v1, %v801_v4  ;;  %v6046_v8 = vunpack.i.h.bf16 %v6905_v51  ;;  %v873_v31 = vsel %vm870_vm3, %v6031_v47, %v6041_v14 }
  0xd6   : > { %1069 = vmatprep.subr.mxu0 %v1025_v36  ;;  %5261 = vmatprep.subr.bf16.mxu1 %v5260_v33 }
  0xd7   : > { %5263 = vmatpush1.bf16.msra.mxu1 %v5262_v37  ;;  %v909_v51 = vsel %vm906_vm4, %v6036_v45, %v6046_v8  ;;  %v6061_v45 = vunpack.i.h.bf16 %v6929_v10  ;;  %v987_v10 = vsel %vm984_vm6, %v6056_v61, %v6066_v42 }
  0xd8   : > { %v6084_v20 = vpop.permute.xlu1 %6083  ;;  %v6079_v41 = vpop.permute.xlu0 %6078  ;;  %v5270_v47 = vpack.c.bf16 %v909_v51, %v873_v31 }
  0xd9   : > { %v6085_v44 = vunpack.i.l.bf16 %v6084_v20  ;;  %v6080_v46 = vunpack.i.l.bf16 %v6079_v41  ;;  %v6086_v50 = vunpack.i.h.bf16 %v6084_v20  ;;  %v6081_v53 = vunpack.i.h.bf16 %v6079_v41 }
  0xda   : > { %v948_v5 = vsel %vm945_vm5, %v6051_v63, %v6061_v45 }
  0xdb   : > { %v802_v35 = vsel %vm798_vm1, %v6021_v39, %v6080_v46  ;;  %v838_v48 = vsel %vm834_vm2, %v6026_v38, %v6085_v44  ;;  %v839_v62 = vsel %vm834_vm2, %v6085_v44, %v6086_v50  ;;  %v803_v0 = vsel %vm798_vm1, %v6080_v46, %v6081_v53 }
  0xdc   : > { %v6963_v18 = vpop.permute.xlu1 %6088  ;;  %v1004_v22 = vpop.permute.xlu0 %1003  ;;  %v5264_v54 = vpack.c.bf16 %v838_v48, %v802_v35  ;;  %v5282_v17 = vpack.c.bf16 %v839_v62, %v803_v0  ;;  %v5274_v63 = vpack.c.bf16 %v987_v10, %v948_v5 }
  0xdd   : > { %v6090_v25 = vunpack.i.l.bf16 %v6963_v18  ;;  %v1024_v28 = vsel %vm1023_vm7, %v1004_v22, %v1006_v26 }
  0xde   : > { %1070 = vmatpush1.msra.mxu0 %v1024_v28  ;;  %5265 = vmatprep.subr.bf16.mxu1 %v5264_v54 }
  0xdf   : > { %5267 = vmatpush1.bf16.msra.mxu1 %v5266_v55  ;;  %5277 = vmatprep.subr.bf16.mxu0 %v5276_v56  ;;  %v804_v11 = vsel %vm798_vm1, %v6081_v53, %v6090_v25 }
  0xe0   : > { %v6094_v2 = vpop.permute.xlu1 %6093  ;;  %v6976_v3 = vpop.permute.xlu0 %828  ;;  %4795 = vmatmul.mubr.msk.f32.vlgmr.msra.gmra.mrb[0].mxu0 %vm1049_vm8, %v6971_v57 }
  0xe1   : > { %v840_v9 = vsel %vm834_vm2, %v6086_v50, %v6976_v3  ;;  %5279 = vmatpush1.bf16.msra.mxu0 %v5278_v60  ;;  %1259 = vmatprep.mubr.f32.mxu0 %v6532_v12  ;;  %v6095_v16 = vunpack.i.l.bf16 %v6094_v2  ;;  %v6096_v30 = vunpack.i.h.bf16 %v6094_v2  ;;  %v6076_v50 = vunpack.i.h.bf16 %v6936_v23 }
  0xe2   : > { %v5280_v15 = vpack.c.bf16 %v840_v9, %v804_v11 }
  0xe3   : > { %v874_v52 = vsel %vm870_vm3, %v6041_v14, %v6095_v16  ;;  %v875_v40 = vsel %vm870_vm3, %v6095_v16, %v6096_v30  ;;  %v769_v62 = vsel %vm762_vm0, %v6075_v19, %v6076_v50 }
  0xe4   : > { %v6988_v21 = vpop.permute.xlu1 %864  ;;  %v6099_v24 = vpop.permute.xlu0 %6098  ;;  %5281 = vmatprep.subr.bf16.mxu0 %v5280_v15  ;;  %v5294_v14 = vpack.c.bf16 %v769_v62, %v6779_v6 }
  0xe5   : > { %v6101_v27 = vunpack.i.h.bf16 %v6099_v24  ;;  %v6100_v29 = vunpack.i.l.bf16 %v6099_v24  ;;  %5283 = vmatpush1.bf16.msra.mxu0 %v5282_v17  ;;  %v876_v39 = vsel %vm870_vm3, %v6096_v30, %v6988_v21  ;;  %v6535_v24 = vmov 0.0|0.0  }
  0xe7   : > { %v910_v26 = vsel %vm906_vm4, %v6046_v8, %v6100_v29  ;;  %v911_v33 = vsel %vm906_vm4, %v6100_v29, %v6101_v27 }
  0xe8   : > { %v6104_v36 = vpop.permute.xlu1 %6103  ;;  %v6999_v37 = vpop.permute.xlu0 %900  ;;  %v5268_v38 = vpack.c.bf16 %v910_v26, %v874_v52  ;;  %v5286_v44 = vpack.c.bf16 %v911_v33, %v875_v40 }
  0xe9   : > { %v912_v43 = vsel %vm906_vm4, %v6101_v27, %v6999_v37  ;;  %v6105_v41 = vunpack.i.l.bf16 %v6104_v36  ;;  %v6106_v35 = vunpack.i.h.bf16 %v6104_v36 }
  0xea   : > { %5269 = vmatprep.subr.bf16.mxu1 %v5268_v38  ;;  %v5284_v20 = vpack.c.bf16 %v912_v43, %v876_v39 }
  0xeb   : > { %5271 = vmatpush1.bf16.msra.mxu1 %v5270_v47  ;;  %v949_v48 = vsel %vm945_vm5, %v6061_v45, %v6105_v41  ;;  %v950_v61 = vsel %vm945_vm5, %v6105_v41, %v6106_v35 }
  0xec   : > { %v7008_v46 = vpop.permute.xlu1 %937  ;;  %v6109_v4 = vpop.permute.xlu0 %6108  ;;  %5285 = vmatprep.subr.bf16.mxu0 %v5284_v20 }
  0xed   : > { %v6111_v1 = vunpack.i.h.bf16 %v6109_v4  ;;  %v6110_v34 = vunpack.i.l.bf16 %v6109_v4  ;;  %5287 = vmatpush1.bf16.msra.mxu0 %v5286_v44  ;;  %v951_v59 = vsel %vm945_vm5, %v6106_v35, %v7008_v46 }
  0xef   : > { %v988_v49 = vsel %vm984_vm6, %v6066_v42, %v6110_v34  ;;  %v989_v53 = vsel %vm984_vm6, %v6110_v34, %v6111_v1 }
  0xf0   : > { %v761_v22 = vpop.permute.xlu1 %760  ;;  %v7020_v54 = vpop.permute.xlu0 %976  ;;  %v5272_v28 = vpack.c.bf16 %v988_v49, %v949_v48  ;;  %v5290_v60 = vpack.c.bf16 %v989_v53, %v950_v61 }
  0xf1   : > { %v990_v58 = vsel %vm984_vm6, %v6111_v1, %v7020_v54  ;;  %v770_v56 = vsel %vm762_vm0, %v6076_v50, %v761_v22  ;;  %v5309_v6 = vpack.c.bf16 %v761_v22, %v6822_v13 }
  0xf2   : > { %5273 = vmatprep.subr.bf16.mxu1 %v5272_v28  ;;  %v5288_v55 = vpack.c.bf16 %v990_v58, %v951_v59  ;;  %v5292_v8 = vpack.c.bf16 %v770_v56, %v6782_v7  ;;  %v6091_v7 = vunpack.i.h.bf16 %v6963_v18 }
  0xf3   : > { %5275 = vmatpush1.bf16.msra.mxu1 %v5274_v63 }
  0xf4   : > { %v1012_v0 = vpop.permute.xlu1 %1011  ;;  %v1010_v2 = vpop.permute.xlu0 %1009  ;;  %5289 = vmatprep.subr.bf16.mxu0 %v5288_v55  ;;  %v805_v13 = vsel %vm798_vm1, %v6090_v25, %v6091_v7 }
  0xf5   : > { %5291 = vmatpush1.bf16.msra.mxu0 %v5290_v60  ;;  %v1027_v9 = vsel %vm1023_vm7, %v1010_v2, %v1012_v0  ;;  %v1026_v11 = vsel %vm1023_vm7, %v6942_v32, %v1010_v2 }
  0xf6   : > { %1140 = vmatprep.subr.mxu1 %v1027_v9 }
  0xf7   : > { %1141 = vmatpush1.msra.mxu1 %v1026_v11 }
  0xf8   : > { %v7036_v15 = vpop.permute.xlu1 %1015  ;;  %v1014_v23 = vpop.permute.xlu0 %1013  ;;  %4796 = vmatmul.mubr.msk.f32.vlgmr.msra.gmra.mrb[0].mxu1 %vm1049_vm8, %v6971_v57  ;;  %5293 = vmatprep.subr.bf16.mxu1 %v5292_v8 }
  0xf9   : > { %5295 = vmatpush1.bf16.msra.mxu1 %v5294_v14  ;;  %v1029_v19 = vsel %vm1023_vm7, %v1014_v23, %v7036_v15  ;;  %v1028_v16 = vsel %vm1023_vm7, %v1012_v0, %v1014_v23  ;;  %1330 = vmatprep.mubr.f32.mxu1 %v6532_v12  ;;  %v1420_v0 = vlaneseq }
  0xfa   : > { %1211 = vmatprep.subr.mxu0 %v1029_v19 }
  0xfb   : > { %1212 = vmatpush1.msra.mxu0 %v1028_v16  ;;  %v7084_v9 = vshrl.u32 %v1420_v0, 7 }
  0xfc   : > { %v6114_v32 = vpop.permute.xlu1 %6113  ;;  %v797_v17 = vpop.permute.xlu0 %796  ;;  %4797 = vmatmul.mubr.msk.f32.vlgmr.msra.gmra.mrb[2].mxu0 %vm1049_vm8, %v6971_v57  ;;  %5308 = vmatprep.subr.bf16.mxu0 %v6535_v24 }
  0xfd   : > { %v6116_v27 = vunpack.i.h.bf16 %v6114_v32  ;;  %v6115_v29 = vunpack.i.l.bf16 %v6114_v32  ;;  %5310 = vmatpush3.bf16.msra.mxu0 %v5309_v6  ;;  %5157 = vmatprep.mubr.msk.f32.mxu0 %vm6536_vm9, %v6532_v12  ;;  %v806_v31 = vsel %vm798_vm1, %v6091_v7, %v797_v17  ;;  %v1422_v19 = vsub.s32 0, %v7084_v9 }
  0xfe   : > { %5311 = vmatprep.subr.bf16.mxu0 %v6535_v24  ;;  %v1426_v16 = vsub.s32 1, %v7084_v9  ;;  %v1430_v32 = vsub.s32 2, %v7084_v9 }
  0xff   : > { %v841_v30 = vsel %vm834_vm2, %v6976_v3, %v6115_v29  ;;  %v5312_v51 = vpack.c.bf16 %v6116_v27, %v797_v17  ;;  %v842_v52 = vsel %vm834_vm2, %v6115_v29, %v6116_v27 }
 0x100   : > { %v6124_v26 = vpop.permute.xlu1 %6123  ;;  %v6119_v33 = vpop.permute.xlu0 %6118  ;;  %v5296_v36 = vpack.c.bf16 %v842_v52, %v806_v31  ;;  %v5298_v38 = vpack.c.bf16 %v841_v30, %v805_v13  ;;  %v1434_v52 = vsub.s32 3, %v7084_v9 }
 0x101   : > { %v6126_v39 = vunpack.i.h.bf16 %v6124_v26  ;;  %v6125_v43 = vunpack.i.l.bf16 %v6124_v26  ;;  %v6121_v47 = vunpack.i.h.bf16 %v6119_v33  ;;  %v6120_v18 = vunpack.i.l.bf16 %v6119_v33  ;;  %5313 = vmatpush3.bf16.msra.mxu0 %v5312_v51 }
 0x102   : > { %5297 = vmatprep.subr.bf16.mxu1 %v5296_v36  ;;  %5314 = vmatprep.subr.bf16.mxu0 %v6535_v24  ;;  %v1438_v36 = vsub.s32 4, %v7084_v9 }
 0x103   : > { %v913_v25 = vsel %vm906_vm4, %v6999_v37, %v6125_v43  ;;  %v5315_v3 = vpack.c.bf16 %v6126_v39, %v6121_v47  ;;  %v877_v42 = vsel %vm870_vm3, %v6988_v21, %v6120_v18  ;;  %5299 = vmatpush1.bf16.msra.mxu1 %v5298_v38  ;;  %v878_v45 = vsel %vm870_vm3, %v6120_v18, %v6121_v47 }
 0x104   : > { %v6134_v40 = vpop.permute.xlu1 %6133  ;;  %v6129_v20 = vpop.permute.xlu0 %6128  ;;  %v914_v41 = vsel %vm906_vm4, %v6125_v43, %v6126_v39  ;;  %v5302_v44 = vpack.c.bf16 %v913_v25, %v877_v42  ;;  %vm2779_vm3 = vcmask 900096  }
 0x105   : > { %v6136_v4 = vunpack.i.h.bf16 %v6134_v40  ;;  %v6135_v1 = vunpack.i.l.bf16 %v6134_v40  ;;  %v6131_v34 = vunpack.i.h.bf16 %v6129_v20  ;;  %v6130_v35 = vunpack.i.l.bf16 %v6129_v20  ;;  %5316 = vmatpush3.bf16.msra.mxu0 %v5315_v3 }
 0x106   : > { %v5300_v5 = vpack.c.bf16 %v914_v41, %v878_v45  ;;  %5317 = vmatprep.subr.bf16.mxu0 %v6535_v24  ;;  %v1442_v3 = vsub.s32 5, %v7084_v9 }
 0x107   : > { %v991_v37 = vsel %vm984_vm6, %v7020_v54, %v6135_v1  ;;  %v952_v21 = vsel %vm945_vm5, %v7008_v46, %v6130_v35  ;;  %v953_v10 = vsel %vm945_vm5, %v6130_v35, %v6131_v34  ;;  %v992_v48 = vsel %vm984_vm6, %v6135_v1, %v6136_v4 }
 0x108   : > { %5301 = vmatprep.subr.bf16.mxu1 %v5300_v5  ;;  %v983_v49 = vpop.permute.xlu1 %982  ;;  %v944_v50 = vpop.permute.xlu0 %943  ;;  %v5304_v53 = vpack.c.bf16 %v992_v48, %v953_v10  ;;  %v5306_v59 = vpack.c.bf16 %v991_v37, %v952_v21  ;;  %v1450_v35 = vsub.s32 7, %v7084_v9 }
 0x109   : > { %5303 = vmatpush1.bf16.msra.mxu1 %v5302_v44  ;;  %v993_v22 = vsel %vm984_vm6, %v6136_v4, %v983_v49  ;;  %v954_v28 = vsel %vm945_vm5, %v6131_v34, %v944_v50  ;;  %v1446_v34 = vsub.s32 6, %v7084_v9  ;;  %vm2803_vm5 = vcmask 883712  }
 0x10a   : > { %v5318_v58 = vpack.c.bf16 %v993_v22, %v954_v28  ;;  %5305 = vmatprep.subr.bf16.mxu1 %v5304_v53  ;;  %vm2791_vm6 = vcmask 891904  }
 0x10c   : > { %v1020_v54 = vpop.permute.xlu1 %1019  ;;  %v1018_v63 = vpop.permute.xlu0 %1017  ;;  %5319 = vmatpush3.bf16.msra.mxu0 %v5318_v58 }
 0x10d   : > { %5307 = vmatpush1.bf16.msra.mxu1 %v5306_v59  ;;  %v1031_v46 = vsel %vm1023_vm7, %v1018_v63, %v1020_v54  ;;  %5155 = vmatprep.subr.mxu0 %v6532_v12  ;;  %v1030_v61 = vsel %vm1023_vm7, %v7036_v15, %v1018_v63 }
 0x10e   : > { %1282 = vmatprep.subr.mxu1 %v1031_v46 }
 0x110   : > { %v1022_v55 = vpop.permute.xlu0 %1021 }
 0x111   : > { %1283 = vmatpush1.msra.mxu1 %v1030_v61  ;;  %v1032_v56 = vsel %vm1023_vm7, %v1020_v54, %v1022_v55  ;;  %v4800_v54 = vld [vmem:[%s9238_s6 + $0x8] ss:$0 sm:$0xff]  ;;  %vm2826_vm7 = vcmask 744448  }
 0x112   : > { %4798 = vmatmul.mubr.msk.f32.vlgmr.msra.gmra.mrb[2].mxu1 %vm1049_vm8, %v6971_v57  ;;  %5156 = vmatpush3.msra.mxu0 %v1032_v56 }
 0x113   : > { %5158 = vmatmul.mubr.msk.f32.vlgmr.msra.gmra.mrb[4].mxu0 %vm1049_vm8, %v6971_v57  ;;  %v1416_v57 = vld [vmem:[%s9238_s6] sm:$0xff]  ;;  %s4808_s6 = sld [smem:[#allocation2 + $0x81]] }
 0x114   : > { %v1423_v29 = vrot.slane %v1416_v57, %v1422_v19  ;;  %v1427_v13 = vrot.slane %v1416_v57, %v1426_v16  ;;  %v1431_v31 = vrot.slane %v1416_v57, %v1430_v32  ;;  %v1435_v43 = vrot.slane %v1416_v57, %v1434_v52 }
 0x115   : > { %v1439_v25 = vrot.slane %v1416_v57, %v1438_v36  ;;  %v1443_v41 = vrot.slane %v1416_v57, %v1442_v3  ;;  %v1447_v48 = vrot.slane %v1416_v57, %v1446_v34  ;;  %v1451_v22 = vrot.slane %v1416_v57, %v1450_v35 }
 0x116   : > { %v1498_v57 = vstv %s4793_s2  ;;  %s6541_s2 = smov 91  }
 0x11d   : > { %v1047_v8 = vpop.permute.xlu1 %1046 }
 0x1b3   : > { %v1119_v60 = vpop.f32.mrb[0].mxu0 }
 0x1b4   : > { %v1121_v62 = vpop.f32.mrb[1].mxu0  ;;  %v7086_v15 = vadd.f32 %v1119_v60, %v1047_v8 }
 0x1b5   : > { %v7088_v23 = vadd.f32 %v1121_v62, %v1047_v8 }
 0x1b6   : > { %v1407_v17 = vmax.f32 %v7086_v15, 0.0  ;;  %v1634_v15 = vld [vmem:[%s9239_s26 + $0x20] sm:$0xff] }
 0x1b7   : > { %v1408_v27 = vmax.f32 %v7088_v23, 0.0 }
 0x1b8   : > { %v1465_v26 = vmul.f32 %v1423_v29, %v1407_v17 }
 0x1b9   : > { %v1466_v33 = vmul.f32 %v1427_v13, %v1408_v27 }
 0x1bb   : > { %v1474_v18 = vadd.f32 %v1466_v33, %v1465_v26 }
 0x1cb   : > { %v1190_v2 = vpop.f32.mrb[0].mxu1 }
 0x1cc   : > { %v1192_v11 = vpop.f32.mrb[1].mxu1  ;;  %v7095_v6 = vadd.f32 %v1190_v2, %v1047_v8 }
 0x1cd   : > { %v7107_v51 = vadd.f32 %v1192_v11, %v1047_v8 }
 0x1ce   : > { %v1409_v30 = vmax.f32 %v7095_v6, 0.0 }
 0x1cf   : > { %v1261_v14 = vpop.f32.mrb[2].mxu0  ;;  %v1410_v39 = vmax.f32 %v7107_v51, 0.0  ;;  %v1633_v51 = vld [vmem:[%s9239_s26 + $0x18] sm:$0xff] }
 0x1d0   : > { %v1263_v7 = vpop.f32.mrb[3].mxu0  ;;  %v1467_v38 = vmul.f32 %v1431_v31, %v1409_v30  ;;  %v7118_v47 = vadd.f32 %v1261_v14, %v1047_v8  ;;  %v1501_v31 = vstv %s4794_s0  ;;  %s6538_s0 = smov 110  }
 0x1d1   : > { %v1468_v45 = vmul.f32 %v1435_v43, %v1410_v39  ;;  %v7124_v20 = vadd.f32 %v1263_v7, %v1047_v8  ;;  %v1496_v7 = vstv %s732_s27  ;;  %s9240_s27 = smov 94  }
 0x1d2   : > { %v1475_v42 = vadd.f32 %v1474_v18, %v1467_v38  ;;  %v1411_v40 = vmax.f32 %v7118_v47, 0.0  ;;  %v1730_v47 = vld [vmem:[%s9239_s26 + $0x320] sm:$0xff] }
 0x1d3   : > { %v1412_v1 = vmax.f32 %v7124_v20, 0.0  ;;  %v1776_v20 = vld [vmem:[%s9239_s26 + $0x490] sm:$0xff] }
 0x1d4   : > { %v1476_v44 = vadd.f32 %v1475_v42, %v1468_v45  ;;  %v1469_v4 = vmul.f32 %v1439_v25, %v1411_v40 }
 0x1d5   : > { %v1470_v21 = vmul.f32 %v1443_v41, %v1412_v1 }
 0x1d6   : > { %v1477_v37 = vadd.f32 %v1476_v44, %v1469_v4 }
 0x1d8   : > { %v1478_v61 = vadd.f32 %v1477_v37, %v1470_v21 }
 0x1e5   : > { %v1332_v5 = vpop.f32.mrb[2].mxu1 }
 0x1e6   : > { %v7133_v10 = vadd.f32 %v1332_v5, %v1047_v8  ;;  %v1334_v49 = vpop.f32.mrb[3].mxu1  ;;  %v1403_v50 = vpop.f32.mrb[4].mxu0  ;;  %v1640_v5 = vld [vmem:[%s9239_s26 + $0x50] sm:$0xff] }
 0x1e7   : > { %v7135_v53 = vadd.f32 %v1334_v49, %v1047_v8  ;;  %v7137_v28 = vadd.f32 %v1403_v50, %v1047_v8  ;;  %v5159_v59 = vpop.f32.mrb[5].mxu0  ;;  %v1639_v49 = vld [vmem:[%s9239_s26 + $0x48] sm:$0xff] }
 0x1e8   : > { %v1413_v58 = vmax.f32 %v7133_v10, 0.0  ;;  %v1643_v50 = vld [vmem:[%s9239_s26 + $0x68] sm:$0xff] }
 0x1e9   : > { %v1414_v63 = vmax.f32 %v7135_v53, 0.0  ;;  %v1415_v46 = vmax.f32 %v7137_v28, 0.0  ;;  %v1766_v28 = vld [vmem:[%s9239_s26 + $0x440] sm:$0xff] }
 0x1ea   : > { %v1471_v55 = vmul.f32 %v1447_v48, %v1413_v58  ;;  %v1636_v48 = vld [vmem:[%s9239_s26 + $0x30] sm:$0xff] }
 0x1eb   : > { %v1472_v56 = vmul.f32 %v1451_v22, %v1414_v63  ;;  %v1473_v60 = vmul.f32 %v4800_v54, %v1415_v46  ;;  %v1646_v22 = vld [vmem:[%s9239_s26 + $0x80] sm:$0xff]  ;;  %v5326_v59 = vpack.c.bf16 %v1639_v49, %v1636_v48  ;;  %v1644_v48 = vld [vmem:[%s9239_s26 + $0x70] sm:$0xff]  ;;  %v1647_v49 = vld [vmem:[%s9239_s26 + $0x88] sm:$0xff] }
 0x1ec   : > { %v1479_v62 = vadd.f32 %v1478_v61, %v1471_v55  ;;  %v5328_v54 = vpack.c.bf16 %v1646_v22, %v1643_v50  ;;  %v1642_v61 = vld [vmem:[%s9239_s26 + $0x60] sm:$0xff]  ;;  %v1645_v55 = vld [vmem:[%s9239_s26 + $0x78] sm:$0xff] }
 0x1ed   : > { %v1482_v0 = vsel %vm1481_vm10, %v1473_v60, 0.0  ;;  %v1652_v60 = vld [vmem:[%s9239_s26 + $0xb0] sm:$0xff]  ;;  %v1698_v50 = vld [vmem:[%s9239_s26 + $0x220] sm:$0xff]  ;;  %v1701_v22 = vld [vmem:[%s9239_s26 + $0x238] sm:$0xff]  ;;  %vm3626_vm10 = vcmask 547840  }
 0x1ee   : > { %v1480_v2 = vadd.f32 %v1479_v62, %v1472_v56  ;;  %v1649_v56 = vld [vmem:[%s9239_s26 + $0x98] sm:$0xff]  ;;  %v5330_v62 = vpack.c.bf16 %v1645_v55, %v1642_v61  ;;  %v5596_v55 = vpack.c.bf16 %v1647_v49, %v1644_v48  ;;  %v1684_v48 = vld [vmem:[%s9239_s26 + $0x1b0] sm:$0xff]  ;;  %v1687_v49 = vld [vmem:[%s9239_s26 + $0x1c8] sm:$0xff] }
 0x1ef   : > { %v1669_v61 = vld [vmem:[%s9239_s26 + $0x138] sm:$0xff] }
 0x1f0   : > { %v1483_v11 = vadd.f32 %v1482_v0, %v1480_v2  ;;  %v5332_v0 = vpack.c.bf16 %v1652_v60, %v1649_v56  ;;  %v1648_v2 = vld [vmem:[%s9239_s26 + $0x90] sm:$0xff]  ;;  %v1673_v60 = vld [vmem:[%s9239_s26 + $0x158] sm:$0xff] }
 0x1f2   : > { %1484 = vadd.xlane.f32.xlu0 %v1483_v11  ;;  %v1651_v11 = vld [vmem:[%s9239_s26 + $0xa8] sm:$0xff] }
 0x27f   : > { %v1485_v8 = vpop.xlane.xlu0 %1484 }
 0x280   : > { %v1486_v14 = vmul.f32 0.0009765625, %v1485_v8  ;;  %v1655_v8 = vld [vmem:[%s9239_s26 + $0xc8] sm:$0xff] }
 0x282   : > { %v1488_v29 = vrot.slane %v1486_v14, 7  ;;  %v1492_v13 = vrot.slane %v1486_v14, 1  ;;  %v1499_v36 = vmul.f32 %v1498_v57, %v1486_v14  ;;  %v1658_v14 = vld [vmem:[%s9239_s26 + $0xe0] sm:$0xff]  ;;  %v1683_v57 = vld [vmem:[%s9239_s26 + $0x1a8] sm:$0xff] }
 0x284   : > { %v1491_v52 = vsel %vm1490_vm11, 0.0, %v1488_v29  ;;  %v1495_v26 = vsel %vm1494_vm12, %v1492_v13, 0.0  ;;  %v5334_v29 = vpack.c.bf16 %v1651_v11, %v1648_v2  ;;  %v1654_v13 = vld [vmem:[%s9239_s26 + $0xc0] sm:$0xff]  ;;  %v1653_v2 = vld [vmem:[%s9239_s26 + $0xb8] sm:$0xff]  ;;  %v1676_v11 = vld [vmem:[%s9239_s26 + $0x170] sm:$0xff] }
 0x285   : > { %v1497_v33 = vmul.f32 %v1496_v7, %v1491_v52  ;;  %v1502_v43 = vmul.f32 %v1501_v31, %v1495_v26  ;;  %v1680_v7 = vld [vmem:[%s9239_s26 + $0x190] sm:$0xff]  ;;  %v5336_v26 = vpack.c.bf16 %v1658_v14, %v1655_v8  ;;  %v1707_v14 = vld [vmem:[%s9239_s26 + $0x268] sm:$0xff] }
 0x286   : > { %v5586_v31 = vpack.c.bf16 %v1683_v57, %v1680_v7  ;;  %v1632_v52 = vld [vmem:[%s9239_s26 + $0x10] sm:$0xff] }
 0x287   : > { %v1500_v38 = vadd.f32 %v1499_v36, %v1497_v33  ;;  %v1657_v33 = vld [vmem:[%s9239_s26 + $0xd8] sm:$0xff]  ;;  %v1704_v8 = vld [vmem:[%s9239_s26 + $0x250] sm:$0xff] }
 0x288   : > { %v1661_v36 = vld [vmem:[%s9239_s26 + $0xf8] sm:$0xff]  ;;  %5587 = vmatprep.subr.bf16.mxu0 %v5586_v31  ;;  %v1672_v57 = vld [vmem:[%s9239_s26 + $0x150] sm:$0xff]  ;;  %v5348_v31 = vpack.c.bf16 %v1676_v11, %v1673_v60 }
 0x289   : > { %v1503_v18 = vadd.f32 %v1502_v43, %v1500_v38  ;;  %v1635_v38 = vld [vmem:[%s9239_s26 + $0x28] sm:$0xff]  ;;  %v1664_v43 = vld [vmem:[%s9239_s26 + $0x110] sm:$0xff]  ;;  %v1697_v60 = vld [vmem:[%s9239_s26 + $0x218] sm:$0xff] }
 0x28a   : > { %v1696_v11 = vld [vmem:[%s9239_s26 + $0x210] sm:$0xff] }
 0x28b   : > { %v4801_v25 = vmul.f32 -1.442695, %v1503_v18  ;;  %v5588_v18 = vpack.c.bf16 %v1635_v38, %v1632_v52  ;;  %v1679_v52 = vld [vmem:[%s9239_s26 + $0x188] sm:$0xff]  ;;  %v1682_v38 = vld [vmem:[%s9239_s26 + $0x1a0] sm:$0xff] }
 0x28d   : > { %6389 = vpow2.f32 %v4801_v25  ;;  %v1686_v25 = vld [vmem:[%s9239_s26 + $0x1c0] sm:$0xff]  ;;  %5589 = vmatpush3.bf16.msra.mxu0 %v5588_v18  ;;  %v1713_v18 = vld [vmem:[%s9239_s26 + $0x298] sm:$0xff] }
 0x297   : > { %v6390_v3 = vpop.eup %6389 }
 0x298   : > { %v1507_v42 = vadd.f32 1.0, %v6390_v3  ;;  %v1689_v3 = vld [vmem:[%s9239_s26 + $0x1d8] sm:$0xff] }
 0x29a   : > { %6391 = vrcp.f32 %v1507_v42  ;;  %v5590_v42 = vpack.c.bf16 %v1689_v3, %v1686_v25  ;;  %v1678_v3 = vld [vmem:[%s9239_s26 + $0x180] sm:$0xff] }
 0x29c   : > { %5591 = vmatprep.subr.bf16.mxu0 %v5590_v42  ;;  %v1681_v42 = vld [vmem:[%s9239_s26 + $0x198] sm:$0xff] }
 0x2a4   : > { %v6392_v45 = vpop.eup %6391 }
 0x2a5   : > { %1512 = vperm.xlu1 %6137, %v6392_v45   ;;  %v1638_v45 = vld [vmem:[%s9239_s26 + $0x40] sm:$0xff] }
 0x324   : > { %v7153_v41 = vpop.permute.xlu1 %1512 }
 0x325   : > { %v7158_v44 = vmul.f32 %v7153_v41, %v1408_v27  ;;  %v7163_v4 = vmul.f32 %v7153_v41, %v1409_v30  ;;  %v7170_v35 = vmul.f32 %v7153_v41, %v1407_v17  ;;  %v7175_v23 = vmul.f32 %v7153_v41, %v1410_v39  ;;  %v1631_v27 = vld [vmem:[%s9239_s26 + $0x8] sm:$0xff]  ;;  %v1630_v17 = vld [vmem:[%s9239_s26] sm:$0xff]  ;;  %v1637_v39 = vld [vmem:[%s9239_s26 + $0x38] sm:$0xff] }
 0x326   : > { %v5320_v30 = vpack.c.bf16 %v1634_v15, %v1631_v27  ;;  %v5322_v37 = vpack.c.bf16 %v1633_v51, %v1630_v17  ;;  %v5324_v21 = vpack.c.bf16 %v1640_v5, %v1637_v39  ;;  %v1660_v27 = vld [vmem:[%s9239_s26 + $0xf0] sm:$0xff]  ;;  %v1663_v51 = vld [vmem:[%s9239_s26 + $0x108] sm:$0xff] }
 0x327   : > { %v6138_v34 = vpack.i.bf16 %v7163_v4, %v7158_v44  ;;  %v6143_v6 = vpack.i.bf16 %v7170_v35, %v7175_v23  ;;  %v1692_v17 = vld [vmem:[%s9239_s26 + $0x1f0] sm:$0xff]  ;;  %v1667_v39 = vld [vmem:[%s9239_s26 + $0x128] sm:$0xff] }
 0x328   : > { %5321 = vmatprep.subr.bf16.mxu1 %v5320_v30  ;;  %v5340_v30 = vpack.c.bf16 %v1664_v43, %v1661_v36  ;;  %v1695_v5 = vld [vmem:[%s9239_s26 + $0x208] sm:$0xff]  ;;  %v1710_v43 = vld [vmem:[%s9239_s26 + $0x280] sm:$0xff] }
 0x329   : > { %6139 = vrot.lane.b32.xlu1 %v6138_v34, %s9204_s24  ;;  %5323 = vmatpush1.bf16.msra.mxu1 %v5322_v37  ;;  %v1641_v34 = vld [vmem:[%s9239_s26 + $0x58] sm:$0xff]  ;;  %v1670_v37 = vld [vmem:[%s9239_s26 + $0x140] sm:$0xff]  ;;  %v1659_v36 = vld [vmem:[%s9239_s26 + $0xe8] sm:$0xff] }
 0x32a   : > { %5325 = vmatprep.subr.bf16.mxu1 %v5324_v21  ;;  %v5592_v15 = vpack.c.bf16 %v1641_v34, %v1638_v45  ;;  %v5594_v21 = vpack.c.bf16 %v1695_v5, %v1692_v17  ;;  %v5344_v56 = vpack.c.bf16 %v1670_v37, %v1667_v39  ;;  %v5352_v34 = vpack.c.bf16 %v1682_v38, %v1679_v52  ;;  %v1665_v17 = vld [vmem:[%s9239_s26 + $0x118] sm:$0xff]  ;;  %v1719_v39 = vld [vmem:[%s9239_s26 + $0x2c8] sm:$0xff]  ;;  %v1708_v38 = vld [vmem:[%s9239_s26 + $0x270] sm:$0xff] }
 0x32b   : > { %v5354_v5 = vpack.c.bf16 %v1681_v42, %v1678_v3  ;;  %v1709_v52 = vld [vmem:[%s9239_s26 + $0x278] sm:$0xff] }
 0x32c   : > { %5593 = vmatpush3.bf16.msra.mxu0 %v5592_v15  ;;  %v1662_v15 = vld [vmem:[%s9239_s26 + $0x100] sm:$0xff] }
 0x32d   : > { %6144 = vrot.lane.b32.xlu1 %v6143_v6, %s9204_s24  ;;  %5327 = vmatpush1.bf16.msra.mxu1 %v5326_v59  ;;  %v5338_v6 = vpack.c.bf16 %v1657_v33, %v1654_v13  ;;  %v5342_v59 = vpack.c.bf16 %v1663_v51, %v1660_v27  ;;  %v1656_v33 = vld [vmem:[%s9239_s26 + $0xd0] sm:$0xff]  ;;  %v5606_v27 = vpack.c.bf16 %v1713_v18, %v1710_v43  ;;  %v1711_v43 = vld [vmem:[%s9239_s26 + $0x288] sm:$0xff]  ;;  %s9211_s24 = smov 118  }
 0x32e   : > { %5329 = vmatprep.subr.bf16.mxu1 %v5328_v54  ;;  %v1666_v54 = vld [vmem:[%s9239_s26 + $0x120] sm:$0xff]  ;;  %5595 = vmatprep.subr.bf16.mxu0 %v5594_v21  ;;  %v5604_v45 = vpack.c.bf16 %v1659_v36, %v1656_v33  ;;  %v1716_v51 = vld [vmem:[%s9239_s26 + $0x2b0] sm:$0xff]  ;;  %v5608_v37 = vpack.c.bf16 %v1665_v17, %v1662_v15  ;;  %v1715_v18 = vld [vmem:[%s9239_s26 + $0x2a8] sm:$0xff]  ;;  %v5374_v3 = vpack.c.bf16 %v1711_v43, %v1708_v38 }
 0x32f   : > { %v5346_v7 = vpack.c.bf16 %v1669_v61, %v1666_v54  ;;  %v5358_v54 = vpack.c.bf16 %v1687_v49, %v1684_v48  ;;  %v1671_v15 = vld [vmem:[%s9239_s26 + $0x148] sm:$0xff]  ;;  %v1729_v38 = vld [vmem:[%s9239_s26 + $0x318] sm:$0xff] }
 0x330   : > { %5597 = vmatpush3.bf16.msra.mxu0 %v5596_v55  ;;  %v1690_v55 = vld [vmem:[%s9239_s26 + $0x1e0] sm:$0xff]  ;;  %v1733_v43 = vld [vmem:[%s9239_s26 + $0x338] sm:$0xff] }
 0x331   : > { %5331 = vmatpush1.bf16.msra.mxu1 %v5330_v62  ;;  %v5598_v62 = vpack.c.bf16 %v1701_v22, %v1698_v50  ;;  %v5610_v50 = vpack.c.bf16 %v1719_v39, %v1716_v51  ;;  %v1691_v22 = vld [vmem:[%s9239_s26 + $0x1e8] sm:$0xff]  ;;  %v1724_v51 = vld [vmem:[%s9239_s26 + $0x2f0] sm:$0xff]  ;;  %v1722_v39 = vld [vmem:[%s9239_s26 + $0x2e0] sm:$0xff] }
 0x332   : > { %5333 = vmatprep.subr.bf16.mxu1 %v5332_v0  ;;  %v1650_v0 = vld [vmem:[%s9239_s26 + $0xa0] sm:$0xff] }
 0x333   : > { %v5600_v13 = vpack.c.bf16 %v1653_v2, %v1650_v0  ;;  %5599 = vmatprep.subr.bf16.mxu0 %v5598_v62  ;;  %v1700_v62 = vld [vmem:[%s9239_s26 + $0x230] sm:$0xff] }
 0x334   : > { %v5364_v2 = vpack.c.bf16 %v1700_v62, %v1697_v60 }
 0x335   : > { %5335 = vmatpush1.bf16.msra.mxu1 %v5334_v29  ;;  %v1675_v29 = vld [vmem:[%s9239_s26 + $0x168] sm:$0xff]  ;;  %5601 = vmatpush3.bf16.msra.mxu0 %v5600_v13  ;;  %v1702_v13 = vld [vmem:[%s9239_s26 + $0x240] sm:$0xff] }
 0x336   : > { %5337 = vmatprep.subr.bf16.mxu1 %v5336_v26  ;;  %v5602_v26 = vpack.c.bf16 %v1707_v14, %v1704_v8  ;;  %v5350_v25 = vpack.c.bf16 %v1675_v29, %v1672_v57  ;;  %v1699_v8 = vld [vmem:[%s9239_s26 + $0x228] sm:$0xff] }
 0x337   : > { %v1703_v14 = vld [vmem:[%s9239_s26 + $0x248] sm:$0xff]  ;;  %v5366_v57 = vpack.c.bf16 %v1699_v8, %v1696_v11 }
 0x338   : > { %5603 = vmatprep.subr.bf16.mxu0 %v5602_v26  ;;  %v1712_v26 = vld [vmem:[%s9239_s26 + $0x290] sm:$0xff] }
 0x339   : > { %5339 = vmatpush1.bf16.msra.mxu1 %v5338_v6  ;;  %v1685_v6 = vld [vmem:[%s9239_s26 + $0x1b8] sm:$0xff]  ;;  %5605 = vmatpush3.bf16.msra.mxu0 %v5604_v45  ;;  %v5372_v36 = vpack.c.bf16 %v1712_v26, %v1709_v52  ;;  %v1714_v45 = vld [vmem:[%s9239_s26 + $0x2a0] sm:$0xff] }
 0x33a   : > { %5341 = vmatprep.subr.bf16.mxu1 %v5340_v30  ;;  %v1688_v30 = vld [vmem:[%s9239_s26 + $0x1d0] sm:$0xff]  ;;  %5607 = vmatprep.subr.bf16.mxu0 %v5606_v27 }
 0x33b   : > { %v5356_v21 = vpack.c.bf16 %v1688_v30, %v1685_v6  ;;  %v1668_v6 = vld [vmem:[%s9239_s26 + $0x130] sm:$0xff]  ;;  %v1721_v30 = vld [vmem:[%s9239_s26 + $0x2d8] sm:$0xff] }
 0x33c   : > { %v5612_v17 = vpack.c.bf16 %v1671_v15, %v1668_v6 }
 0x33d   : > { %5343 = vmatpush1.bf16.msra.mxu1 %v5342_v59  ;;  %v1694_v59 = vld [vmem:[%s9239_s26 + $0x200] sm:$0xff]  ;;  %5609 = vmatpush3.bf16.msra.mxu0 %v5608_v37  ;;  %v5380_v37 = vpack.c.bf16 %v1724_v51, %v1721_v30  ;;  %v1732_v30 = vld [vmem:[%s9239_s26 + $0x330] sm:$0xff]  ;;  %v1735_v51 = vld [vmem:[%s9239_s26 + $0x348] sm:$0xff] }
 0x33e   : > { %5345 = vmatprep.subr.bf16.mxu1 %v5344_v56  ;;  %v5360_v61 = vpack.c.bf16 %v1694_v59, %v1691_v22  ;;  %v1693_v56 = vld [vmem:[%s9239_s26 + $0x1f8] sm:$0xff]  ;;  %5611 = vmatprep.subr.bf16.mxu0 %v5610_v50  ;;  %v1720_v22 = vld [vmem:[%s9239_s26 + $0x2d0] sm:$0xff]  ;;  %v1723_v59 = vld [vmem:[%s9239_s26 + $0x2e8] sm:$0xff] }
 0x33f   : > { %v5362_v0 = vpack.c.bf16 %v1693_v56, %v1690_v55  ;;  %v1677_v55 = vld [vmem:[%s9239_s26 + $0x178] sm:$0xff] }
 0x341   : > { %5347 = vmatpush1.bf16.msra.mxu1 %v5346_v7  ;;  %v1706_v7 = vld [vmem:[%s9239_s26 + $0x260] sm:$0xff]  ;;  %5613 = vmatpush3.bf16.msra.mxu0 %v5612_v17 }
 0x342   : > { %5349 = vmatprep.subr.bf16.mxu1 %v5348_v31  ;;  %v5368_v29 = vpack.c.bf16 %v1706_v7, %v1703_v14  ;;  %v1705_v31 = vld [vmem:[%s9239_s26 + $0x258] sm:$0xff] }
 0x343   : > { %v5370_v33 = vpack.c.bf16 %v1705_v31, %v1702_v13  ;;  %v7488_v13 = vmul.f32 %v7153_v41, %v1411_v40 }
 0x345   : > { %5351 = vmatpush1.bf16.msra.mxu1 %v5350_v25  ;;  %v1718_v25 = vld [vmem:[%s9239_s26 + $0x2c0] sm:$0xff] }
 0x346   : > { %5353 = vmatprep.subr.bf16.mxu1 %v5352_v34  ;;  %v5376_v42 = vpack.c.bf16 %v1718_v25, %v1715_v18  ;;  %v1717_v34 = vld [vmem:[%s9239_s26 + $0x2b8] sm:$0xff]  ;;  %v1728_v18 = vld [vmem:[%s9239_s26 + $0x310] sm:$0xff]  ;;  %v1731_v25 = vld [vmem:[%s9239_s26 + $0x328] sm:$0xff] }
 0x347   : > { %v5378_v27 = vpack.c.bf16 %v1717_v34, %v1714_v45  ;;  %v1782_v45 = vld [vmem:[%s9239_s26 + $0x4c0] sm:$0xff]  ;;  %v1785_v34 = vld [vmem:[%s9239_s26 + $0x4d8] sm:$0xff] }
 0x349   : > { %5355 = vmatpush1.bf16.msra.mxu1 %v5354_v5 }
 0x34a   : > { %5357 = vmatprep.subr.bf16.mxu1 %v5356_v21  ;;  %v1725_v21 = vld [vmem:[%s9239_s26 + $0x2f8] sm:$0xff] }
 0x34b   : > { %v5614_v50 = vpack.c.bf16 %v1725_v21, %v1722_v39  ;;  %v5620_v39 = vpack.c.bf16 %v1731_v25, %v1728_v18  ;;  %v1739_v21 = vld [vmem:[%s9239_s26 + $0x368] sm:$0xff]  ;;  %v1746_v18 = vld [vmem:[%s9239_s26 + $0x3a0] sm:$0xff]  ;;  %v1749_v25 = vld [vmem:[%s9239_s26 + $0x3b8] sm:$0xff] }
 0x34d   : > { %5359 = vmatpush1.bf16.msra.mxu1 %v5358_v54  ;;  %v1674_v54 = vld [vmem:[%s9239_s26 + $0x160] sm:$0xff]  ;;  %5615 = vmatprep.subr.bf16.mxu0 %v5614_v50  ;;  %v1737_v50 = vld [vmem:[%s9239_s26 + $0x358] sm:$0xff] }
 0x34e   : > { %5361 = vmatprep.subr.bf16.mxu1 %v5360_v61  ;;  %v5382_v61 = vpack.c.bf16 %v1723_v59, %v1720_v22  ;;  %v5616_v56 = vpack.c.bf16 %v1677_v55, %v1674_v54  ;;  %v1742_v22 = vld [vmem:[%s9239_s26 + $0x380] sm:$0xff]  ;;  %v1788_v59 = vld [vmem:[%s9239_s26 + $0x4f0] sm:$0xff]  ;;  %v1791_v54 = vld [vmem:[%s9239_s26 + $0x508] sm:$0xff] }
 0x350   : > { %5617 = vmatpush3.bf16.msra.mxu0 %v5616_v56 }
 0x351   : > { %5363 = vmatpush1.bf16.msra.mxu1 %v5362_v0 }
 0x352   : > { %5365 = vmatprep.subr.bf16.mxu1 %v5364_v2 }
 0x355   : > { %5367 = vmatpush1.bf16.msra.mxu1 %v5366_v57 }
 0x356   : > { %5369 = vmatprep.subr.bf16.mxu1 %v5368_v29 }
 0x359   : > { %5371 = vmatpush1.bf16.msra.mxu1 %v5370_v33 }
 0x35a   : > { %5373 = vmatprep.subr.bf16.mxu1 %v5372_v36  ;;  %v1726_v36 = vld [vmem:[%s9239_s26 + $0x300] sm:$0xff] }
 0x35b   : > { %v5386_v17 = vpack.c.bf16 %v1729_v38, %v1726_v36  ;;  %v7615_v36 = vmul.f32 %v7153_v41, %v1414_v63  ;;  %v1751_v63 = vld [vmem:[%s9239_s26 + $0x3c8] sm:$0xff] }
 0x35d   : > { %5375 = vmatpush1.bf16.msra.mxu1 %v5374_v3 }
 0x35e   : > { %5377 = vmatprep.subr.bf16.mxu1 %v5376_v42  ;;  %v1736_v42 = vld [vmem:[%s9239_s26 + $0x350] sm:$0xff] }
 0x361   : > { %5379 = vmatpush1.bf16.msra.mxu1 %v5378_v27 }
 0x362   : > { %5381 = vmatprep.subr.bf16.mxu1 %v5380_v37  ;;  %v5388_v37 = vpack.c.bf16 %v1736_v42, %v1733_v43  ;;  %v1800_v42 = vld [vmem:[%s9239_s26 + $0x550] sm:$0xff] }
 0x365   : > { %5383 = vmatpush1.bf16.msra.mxu1 %v5382_v61 }
 0x39b   : > { %v6140_v5 = vpop.permute.xlu1 %6139 }
 0x39c   : > { %v6142_v48 = vunpack.i.h.bf16 %v6140_v5  ;;  %v6141_v49 = vunpack.i.l.bf16 %v6140_v5 }
 0x39e   : > { %v1552_v0 = vsel %vm762_vm0, %v6141_v49, %v6142_v48 }
 0x39f   : > { %v7469_v60 = vpop.permute.xlu1 %6144  ;;  %v1569_v8 = vmax.f32 %v7158_v44, %v1552_v0  ;;  %v7493_v44 = vmul.f32 %v7153_v41, %v1412_v1  ;;  %v1779_v1 = vld [vmem:[%s9239_s26 + $0x4a8] sm:$0xff]  ;;  %v5390_v0 = vpack.c.bf16 %v1735_v51, %v1732_v30  ;;  %v1757_v51 = vld [vmem:[%s9239_s26 + $0x3f8] sm:$0xff] }
 0x3a0   : > { %v6146_v62 = vunpack.i.l.bf16 %v7469_v60  ;;  %v6147_v2 = vunpack.i.h.bf16 %v7469_v60  ;;  %v5618_v31 = vpack.c.bf16 %v1779_v1, %v1776_v20  ;;  %v1748_v20 = vld [vmem:[%s9239_s26 + $0x3b0] sm:$0xff]  ;;  %v1794_v1 = vld [vmem:[%s9239_s26 + $0x520] sm:$0xff] }
 0x3a2   : > { %v1553_v11 = vsel %vm762_vm0, %v6142_v48, %v6146_v62  ;;  %v1551_v57 = vsel %vm762_vm0, %v6147_v2, %v6141_v49  ;;  %5619 = vmatprep.subr.bf16.mxu0 %v5618_v31  ;;  %v5622_v48 = vpack.c.bf16 %v1785_v34, %v1782_v45  ;;  %v1734_v49 = vld [vmem:[%s9239_s26 + $0x340] sm:$0xff]  ;;  %v1797_v31 = vld [vmem:[%s9239_s26 + $0x538] sm:$0xff]  ;;  %v1803_v45 = vld [vmem:[%s9239_s26 + $0x568] sm:$0xff] }
 0x3a3   : > { %v7479_v14 = vmax.f32 %v7163_v4, %v1553_v11  ;;  %v1568_v29 = vmax.f32 %v7170_v35, %v1551_v57  ;;  %v6153_v4 = vpack.i.bf16 %v7493_v44, %v7488_v13  ;;  %v1727_v35 = vld [vmem:[%s9239_s26 + $0x308] sm:$0xff]  ;;  %v1738_v2 = vld [vmem:[%s9239_s26 + $0x360] sm:$0xff]  ;;  %v1741_v11 = vld [vmem:[%s9239_s26 + $0x378] sm:$0xff]  ;;  %v5630_v43 = vpack.c.bf16 %v1797_v31, %v1794_v1 }
 0x3a4   : > { %v5384_v40 = vpack.c.bf16 %v1730_v47, %v1727_v35  ;;  %v1745_v57 = vld [vmem:[%s9239_s26 + $0x398] sm:$0xff]  ;;  %v1743_v35 = vld [vmem:[%s9239_s26 + $0x388] sm:$0xff]  ;;  %v5394_v38 = vpack.c.bf16 %v1741_v11, %v1738_v2  ;;  %v1764_v1 = vld [vmem:[%s9239_s26 + $0x430] sm:$0xff] }
 0x3a5   : > { %v6148_v7 = vpack.i.bf16 %v7479_v14, %v1569_v8  ;;  %v5396_v53 = vpack.c.bf16 %v1748_v20, %v1745_v57  ;;  %v1763_v2 = vld [vmem:[%s9239_s26 + $0x428] sm:$0xff] }
 0x3a6   : > { %5385 = vmatprep.subr.bf16.mxu1 %v5384_v40  ;;  %v1767_v31 = vld [vmem:[%s9239_s26 + $0x448] sm:$0xff] }
 0x3a7   : > { %6149 = vrot.lane.b32.xlu1 %v6148_v7, %s9240_s27  ;;  %v5392_v7 = vpack.c.bf16 %v1742_v22, %v1739_v21  ;;  %v1760_v21 = vld [vmem:[%s9239_s26 + $0x410] sm:$0xff] }
 0x3a8   : > { %v1756_v22 = vld [vmem:[%s9239_s26 + $0x3f0] sm:$0xff] }
 0x3ab   : > { %1586 = vrot.lane.b32.xlu1 %v1568_v29, %s9240_s27 }
 0x3af   : > { %6154 = vrot.lane.b32.xlu1 %v6153_v4, %s9241_s29  ;;  %v1740_v4 = vld [vmem:[%s9239_s26 + $0x370] sm:$0xff] }
 0x3b0   : > { %v5628_v10 = vpack.c.bf16 %v1743_v35, %v1740_v4  ;;  %v1765_v4 = vld [vmem:[%s9239_s26 + $0x438] sm:$0xff] }
 0x419   : > { %v7511_v52 = vpop.permute.xlu1 %6149 }
 0x41a   : > { %v6152_v26 = vunpack.i.h.bf16 %v7511_v52  ;;  %v6151_v33 = vunpack.i.l.bf16 %v7511_v52  ;;  %v1828_v52 = vld [vmem:[%s9239_s26 + $0x630] sm:$0xff] }
 0x41c   : > { %v1605_v3 = vsel %vm834_vm2, %v6151_v33, %v6152_v26 }
 0x41d   : > { %v1587_v6 = vpop.permute.xlu1 %1586  ;;  %v1622_v27 = vmax.f32 %v1569_v8, %v1605_v3  ;;  %v5624_v8 = vpack.c.bf16 %v1737_v50, %v1734_v49  ;;  %v1754_v3 = vld [vmem:[%s9239_s26 + $0x3e0] sm:$0xff]  ;;  %v1809_v49 = vld [vmem:[%s9239_s26 + $0x598] sm:$0xff] }
 0x41e   : > { %v1604_v15 = vsel %vm834_vm2, %v1587_v6, %v6151_v33  ;;  %v7610_v33 = vmul.f32 %v7153_v41, %v1413_v58  ;;  %v1750_v6 = vld [vmem:[%s9239_s26 + $0x3c0] sm:$0xff]  ;;  %v5400_v30 = vpack.c.bf16 %v1754_v3, %v1751_v63  ;;  %v1773_v3 = vld [vmem:[%s9239_s26 + $0x478] sm:$0xff] }
 0x41f   : > { %v1621_v5 = vmax.f32 %v1568_v29, %v1604_v15  ;;  %2104 = vmatprep.mubr.f32.mxu1 %v1622_v27  ;;  %2459 = vmatprep.mubr.f32.mxu0 %v1622_v27  ;;  %v5626_v29 = vpack.c.bf16 %v1791_v54, %v1788_v59  ;;  %v1753_v27 = vld [vmem:[%s9239_s26 + $0x3d8] sm:$0xff]  ;;  %v5632_v15 = vpack.c.bf16 %v1749_v25, %v1746_v18  ;;  %v1759_v59 = vld [vmem:[%s9239_s26 + $0x408] sm:$0xff]  ;;  %v1770_v25 = vld [vmem:[%s9239_s26 + $0x460] sm:$0xff] }
 0x420   : > { %v5402_v50 = vpack.c.bf16 %v1753_v27, %v1750_v6  ;;  %v5406_v57 = vpack.c.bf16 %v1759_v59, %v1756_v22  ;;  %v5648_v6 = vpack.c.bf16 %v1773_v3, %v1770_v25  ;;  %v1786_v59 = vld [vmem:[%s9239_s26 + $0x4e0] sm:$0xff] }
 0x421   : > { %v7567_v61 = vpop.permute.xlu1 %6154  ;;  %2105 = vmatmul.mubr.f32.vlgmr.msra.gmra.mrb[4].mxu1 %v1621_v5  ;;  %2460 = vmatmul.mubr.f32.vlgmr.msra.gmra.mrb[6].mxu0 %v1621_v5  ;;  %v1752_v5 = vld [vmem:[%s9239_s26 + $0x3d0] sm:$0xff] }
 0x422   : > { %v6157_v55 = vunpack.i.h.bf16 %v7567_v61  ;;  %v6156_v56 = vunpack.i.l.bf16 %v7567_v61  ;;  %5387 = vmatpush1.bf16.msra.mxu1 %v5386_v17  ;;  %5621 = vmatpush3.bf16.msra.mxu0 %v5620_v39  ;;  %v6163_v17 = vpack.i.bf16 %v7615_v36, %v7610_v33  ;;  %v5634_v39 = vpack.c.bf16 %v1803_v45, %v1800_v42  ;;  %v1775_v42 = vld [vmem:[%s9239_s26 + $0x488] sm:$0xff]  ;;  %v1778_v45 = vld [vmem:[%s9239_s26 + $0x4a0] sm:$0xff] }
 0x423   : > { %5389 = vmatprep.subr.bf16.mxu1 %v5388_v37  ;;  %5623 = vmatprep.subr.bf16.mxu0 %v5622_v48  ;;  %v1755_v37 = vld [vmem:[%s9239_s26 + $0x3e8] sm:$0xff]  ;;  %v1806_v48 = vld [vmem:[%s9239_s26 + $0x580] sm:$0xff]  ;;  %v5416_v27 = vpack.c.bf16 %v1778_v45, %v1775_v42  ;;  %v1816_v42 = vld [vmem:[%s9239_s26 + $0x5d0] sm:$0xff] }
 0x424   : > { %v1554_v47 = vsel %vm762_vm0, %v6146_v62, %v6156_v56  ;;  %v1555_v40 = vsel %vm762_vm0, %v6156_v56, %v6157_v55  ;;  %v5636_v54 = vpack.c.bf16 %v1755_v37, %v1752_v5  ;;  %v7680_v56 = vmul.f32 %v7153_v41, %v1415_v46  ;;  %v1812_v46 = vld [vmem:[%s9239_s26 + $0x5b0] sm:$0xff]  ;;  %v1815_v41 = vld [vmem:[%s9239_s26 + $0x5c8] sm:$0xff] }
 0x425   : > { %v7602_v60 = vmax.f32 %v7175_v23, %v1554_v47  ;;  %v7605_v62 = vmax.f32 %v7488_v13, %v1555_v40  ;;  %v1744_v23 = vld [vmem:[%s9239_s26 + $0x390] sm:$0xff]  ;;  %v1747_v13 = vld [vmem:[%s9239_s26 + $0x3a8] sm:$0xff]  ;;  %v5638_v11 = vpack.c.bf16 %v1809_v49, %v1806_v48  ;;  %v5408_v47 = vpack.c.bf16 %v1766_v28, %v1763_v2  ;;  %v1769_v40 = vld [vmem:[%s9239_s26 + $0x458] sm:$0xff] }
 0x426   : > { %5391 = vmatpush1.bf16.msra.mxu1 %v5390_v0  ;;  %5625 = vmatpush3.bf16.msra.mxu0 %v5624_v8  ;;  %v5398_v34 = vpack.c.bf16 %v1747_v13, %v1744_v23  ;;  %v5404_v0 = vpack.c.bf16 %v1760_v21, %v1757_v51  ;;  %v1758_v8 = vld [vmem:[%s9239_s26 + $0x400] sm:$0xff]  ;;  %v5642_v20 = vpack.c.bf16 %v1815_v41, %v1812_v46  ;;  %v1821_v13 = vld [vmem:[%s9239_s26 + $0x5f8] sm:$0xff]  ;;  %v1784_v51 = vld [vmem:[%s9239_s26 + $0x4d0] sm:$0xff] }
 0x427   : > { %v6158_v58 = vpack.i.bf16 %v7605_v62, %v7602_v60  ;;  %5393 = vmatprep.subr.bf16.mxu1 %v5392_v7  ;;  %5627 = vmatprep.subr.bf16.mxu0 %v5626_v29  ;;  %v1761_v7 = vld [vmem:[%s9239_s26 + $0x418] sm:$0xff]  ;;  %v1762_v29 = vld [vmem:[%s9239_s26 + $0x420] sm:$0xff]  ;;  %v1780_v37 = vld [vmem:[%s9239_s26 + $0x4b0] sm:$0xff] }
 0x428   : > { %v5640_v35 = vpack.c.bf16 %v1761_v7, %v1758_v8  ;;  %v1818_v23 = vld [vmem:[%s9239_s26 + $0x5e0] sm:$0xff]  ;;  %v1783_v21 = vld [vmem:[%s9239_s26 + $0x4c8] sm:$0xff]  ;;  %v1796_v2 = vld [vmem:[%s9239_s26 + $0x530] sm:$0xff] }
 0x429   : > { %6159 = vrot.lane.b32.xlu1 %v6158_v58, %s9240_s27  ;;  %v1768_v58 = vld [vmem:[%s9239_s26 + $0x450] sm:$0xff]  ;;  %v5646_v18 = vpack.c.bf16 %v1821_v13, %v1818_v23  ;;  %v1787_v48 = vld [vmem:[%s9239_s26 + $0x4e8] sm:$0xff]  ;;  %v1790_v49 = vld [vmem:[%s9239_s26 + $0x500] sm:$0xff] }
 0x42a   : > { %5395 = vmatpush1.bf16.msra.mxu1 %v5394_v38  ;;  %5629 = vmatpush3.bf16.msra.mxu0 %v5628_v10  ;;  %v1772_v38 = vld [vmem:[%s9239_s26 + $0x470] sm:$0xff]  ;;  %v5410_v10 = vpack.c.bf16 %v1765_v4, %v1762_v29  ;;  %v5424_v22 = vpack.c.bf16 %v1790_v49, %v1787_v48  ;;  %v1795_v28 = vld [vmem:[%s9239_s26 + $0x528] sm:$0xff]  ;;  %v1802_v41 = vld [vmem:[%s9239_s26 + $0x560] sm:$0xff] }
 0x42b   : > { %5397 = vmatprep.subr.bf16.mxu1 %v5396_v53  ;;  %5631 = vmatprep.subr.bf16.mxu0 %v5630_v43  ;;  %v5644_v53 = vpack.c.bf16 %v1767_v31, %v1764_v1  ;;  %v5412_v63 = vpack.c.bf16 %v1772_v38, %v1769_v40  ;;  %v1771_v43 = vld [vmem:[%s9239_s26 + $0x468] sm:$0xff]  ;;  %v1792_v7 = vld [vmem:[%s9239_s26 + $0x510] sm:$0xff]  ;;  %v1798_v4 = vld [vmem:[%s9239_s26 + $0x540] sm:$0xff] }
 0x42c   : > { %v1799_v46 = vld [vmem:[%s9239_s26 + $0x548] sm:$0xff]  ;;  %v1808_v40 = vld [vmem:[%s9239_s26 + $0x590] sm:$0xff]  ;;  %v1814_v13 = vld [vmem:[%s9239_s26 + $0x5c0] sm:$0xff] }
 0x42d   : > { %6164 = vrot.lane.b32.xlu1 %v6163_v17, %s9241_s29  ;;  %v1777_v17 = vld [vmem:[%s9239_s26 + $0x498] sm:$0xff]  ;;  %v5432_v29 = vpack.c.bf16 %v1802_v41, %v1799_v46  ;;  %v1804_v31 = vld [vmem:[%s9239_s26 + $0x570] sm:$0xff]  ;;  %v1807_v38 = vld [vmem:[%s9239_s26 + $0x588] sm:$0xff] }
 0x42e   : > { %5399 = vmatpush1.bf16.msra.mxu1 %v5398_v34  ;;  %5633 = vmatpush3.bf16.msra.mxu0 %v5632_v15  ;;  %v5414_v34 = vpack.c.bf16 %v1771_v43, %v1768_v58  ;;  %v1774_v15 = vld [vmem:[%s9239_s26 + $0x480] sm:$0xff]  ;;  %v1811_v23 = vld [vmem:[%s9239_s26 + $0x5a8] sm:$0xff]  ;;  %v1817_v43 = vld [vmem:[%s9239_s26 + $0x5d8] sm:$0xff] }
 0x42f   : > { %5401 = vmatprep.subr.bf16.mxu1 %v5400_v30  ;;  %5635 = vmatprep.subr.bf16.mxu0 %v5634_v39  ;;  %v1781_v30 = vld [vmem:[%s9239_s26 + $0x4b8] sm:$0xff]  ;;  %v5418_v39 = vpack.c.bf16 %v1777_v17, %v1774_v15  ;;  %v5440_v58 = vpack.c.bf16 %v1814_v13, %v1811_v23  ;;  %v1819_v45 = vld [vmem:[%s9239_s26 + $0x5e8] sm:$0xff]  ;;  %v1872_v17 = vld [vmem:[%s9239_s26 + $0x790] sm:$0xff] }
 0x430   : > { %v5420_v5 = vpack.c.bf16 %v1784_v51, %v1781_v30  ;;  %v1875_v30 = vld [vmem:[%s9239_s26 + $0x7a8] sm:$0xff]  ;;  %v1829_v49 = vld [vmem:[%s9239_s26 + $0x638] sm:$0xff] }
 0x431   : > { %1549 = vrot.lane.b32.xlu1 %v7680_v56, %s9241_s29  ;;  %v5650_v51 = vpack.c.bf16 %v1875_v30, %v1872_v17 }
 0x432   : > { %5403 = vmatpush1.bf16.msra.mxu1 %v5402_v50  ;;  %5637 = vmatpush3.bf16.msra.mxu0 %v5636_v54  ;;  %v5422_v50 = vpack.c.bf16 %v1783_v21, %v1780_v37  ;;  %v1789_v54 = vld [vmem:[%s9239_s26 + $0x4f8] sm:$0xff] }
 0x433   : > { %5405 = vmatprep.subr.bf16.mxu1 %v5404_v0  ;;  %5639 = vmatprep.subr.bf16.mxu0 %v5638_v11  ;;  %v1793_v0 = vld [vmem:[%s9239_s26 + $0x518] sm:$0xff]  ;;  %v5426_v11 = vpack.c.bf16 %v1789_v54, %v1786_v59  ;;  %v1832_v59 = vld [vmem:[%s9239_s26 + $0x650] sm:$0xff]  ;;  %v1878_v54 = vld [vmem:[%s9239_s26 + $0x7c0] sm:$0xff] }
 0x434   : > { %v5428_v8 = vpack.c.bf16 %v1796_v2, %v1793_v0  ;;  %v1825_v37 = vld [vmem:[%s9239_s26 + $0x618] sm:$0xff] }
 0x435   : > { %v1881_v0 = vld [vmem:[%s9239_s26 + $0x7d8] sm:$0xff] }
 0x436   : > { %5407 = vmatpush1.bf16.msra.mxu1 %v5406_v57  ;;  %5641 = vmatpush3.bf16.msra.mxu0 %v5640_v35  ;;  %v5430_v57 = vpack.c.bf16 %v1795_v28, %v1792_v7  ;;  %v1801_v35 = vld [vmem:[%s9239_s26 + $0x558] sm:$0xff] }
 0x437   : > { %5409 = vmatprep.subr.bf16.mxu1 %v5408_v47  ;;  %5643 = vmatprep.subr.bf16.mxu0 %v5642_v20  ;;  %v1805_v47 = vld [vmem:[%s9239_s26 + $0x578] sm:$0xff]  ;;  %v5434_v20 = vpack.c.bf16 %v1801_v35, %v1798_v4  ;;  %v5452_v4 = vpack.c.bf16 %v1832_v59, %v1829_v49  ;;  %v5654_v35 = vpack.c.bf16 %v1881_v0, %v1878_v54  ;;  %v1846_v54 = vld [vmem:[%s9239_s26 + $0x6c0] sm:$0xff] }
 0x438   : > { %v5436_v1 = vpack.c.bf16 %v1808_v40, %v1805_v47  ;;  %v1833_v47 = vld [vmem:[%s9239_s26 + $0x658] sm:$0xff] }
 0x439   : > { %v1845_v49 = vld [vmem:[%s9239_s26 + $0x6b8] sm:$0xff] }
 0x43a   : > { %5411 = vmatpush1.bf16.msra.mxu1 %v5410_v10  ;;  %5645 = vmatpush3.bf16.msra.mxu0 %v5644_v53  ;;  %v5438_v10 = vpack.c.bf16 %v1807_v38, %v1804_v31  ;;  %v1810_v53 = vld [vmem:[%s9239_s26 + $0x5a0] sm:$0xff]  ;;  %v1884_v31 = vld [vmem:[%s9239_s26 + $0x7f0] sm:$0xff]  ;;  %v1887_v38 = vld [vmem:[%s9239_s26 + $0x808] sm:$0xff] }
 0x43b   : > { %5413 = vmatprep.subr.bf16.mxu1 %v5412_v63  ;;  %5647 = vmatprep.subr.bf16.mxu0 %v5646_v18  ;;  %v1813_v63 = vld [vmem:[%s9239_s26 + $0x5b8] sm:$0xff]  ;;  %v1820_v18 = vld [vmem:[%s9239_s26 + $0x5f0] sm:$0xff] }
 0x43c   : > { %v5442_v25 = vpack.c.bf16 %v1813_v63, %v1810_v53  ;;  %v5444_v3 = vpack.c.bf16 %v1820_v18, %v1817_v43  ;;  %v1837_v53 = vld [vmem:[%s9239_s26 + $0x678] sm:$0xff] }
 0x43d   : > { %v1841_v18 = vld [vmem:[%s9239_s26 + $0x698] sm:$0xff] }
 0x43e   : > { %5415 = vmatpush1.bf16.msra.mxu1 %v5414_v34  ;;  %5649 = vmatpush3.bf16.msra.mxu0 %v5648_v6  ;;  %v1823_v34 = vld [vmem:[%s9239_s26 + $0x608] sm:$0xff]  ;;  %v1826_v6 = vld [vmem:[%s9239_s26 + $0x620] sm:$0xff]  ;;  %v1849_v0 = vld [vmem:[%s9239_s26 + $0x6d8] sm:$0xff] }
 0x43f   : > { %5417 = vmatprep.subr.bf16.mxu1 %v5416_v27  ;;  %v5446_v27 = vpack.c.bf16 %v1819_v45, %v1816_v42  ;;  %v5448_v15 = vpack.c.bf16 %v1826_v6, %v1823_v34  ;;  %5651 = vmatprep.subr.bf16.mxu0 %v5650_v51  ;;  %v1839_v42 = vld [vmem:[%s9239_s26 + $0x688] sm:$0xff]  ;;  %v1890_v45 = vld [vmem:[%s9239_s26 + $0x820] sm:$0xff]  ;;  %v1893_v34 = vld [vmem:[%s9239_s26 + $0x838] sm:$0xff] }
 0x442   : > { %5419 = vmatpush1.bf16.msra.mxu1 %v5418_v39 }
 0x443   : > { %5421 = vmatprep.subr.bf16.mxu1 %v5420_v5  ;;  %v1822_v5 = vld [vmem:[%s9239_s26 + $0x600] sm:$0xff] }
 0x444   : > { %v5450_v46 = vpack.c.bf16 %v1825_v37, %v1822_v5  ;;  %v1847_v5 = vld [vmem:[%s9239_s26 + $0x6c8] sm:$0xff]  ;;  %v5662_v37 = vpack.c.bf16 %v1893_v34, %v1890_v45  ;;  %v1864_v45 = vld [vmem:[%s9239_s26 + $0x750] sm:$0xff] }
 0x445   : > { %v1867_v34 = vld [vmem:[%s9239_s26 + $0x768] sm:$0xff] }
 0x446   : > { %5423 = vmatpush1.bf16.msra.mxu1 %v5422_v50  ;;  %v1824_v50 = vld [vmem:[%s9239_s26 + $0x610] sm:$0xff] }
 0x447   : > { %5425 = vmatprep.subr.bf16.mxu1 %v5424_v22  ;;  %v1827_v22 = vld [vmem:[%s9239_s26 + $0x628] sm:$0xff] }
 0x448   : > { %v5652_v41 = vpack.c.bf16 %v1827_v22, %v1824_v50  ;;  %v1896_v50 = vld [vmem:[%s9239_s26 + $0x850] sm:$0xff]  ;;  %v1899_v22 = vld [vmem:[%s9239_s26 + $0x868] sm:$0xff] }
 0x44a   : > { %5427 = vmatpush1.bf16.msra.mxu1 %v5426_v11 }
 0x44b   : > { %5429 = vmatprep.subr.bf16.mxu1 %v5428_v8 }
 0x44e   : > { %5431 = vmatpush1.bf16.msra.mxu1 %v5430_v57 }
 0x44f   : > { %5433 = vmatprep.subr.bf16.mxu1 %v5432_v29 }
 0x452   : > { %5435 = vmatpush1.bf16.msra.mxu1 %v5434_v20 }
 0x453   : > { %5437 = vmatprep.subr.bf16.mxu1 %v5436_v1  ;;  %v1838_v1 = vld [vmem:[%s9239_s26 + $0x680] sm:$0xff] }
 0x456   : > { %5439 = vmatpush1.bf16.msra.mxu1 %v5438_v10 }
 0x457   : > { %5441 = vmatprep.subr.bf16.mxu1 %v5440_v58  ;;  %v1834_v58 = vld [vmem:[%s9239_s26 + $0x660] sm:$0xff] }
 0x458   : > { %v5458_v6 = vpack.c.bf16 %v1837_v53, %v1834_v58 }
 0x45a   : > { %5443 = vmatpush1.bf16.msra.mxu1 %v5442_v25  ;;  %v5658_v25 = vpack.c.bf16 %v1887_v38, %v1884_v31  ;;  %v1908_v31 = vld [vmem:[%s9239_s26 + $0x8b0] sm:$0xff]  ;;  %v1911_v38 = vld [vmem:[%s9239_s26 + $0x8c8] sm:$0xff] }
 0x45b   : > { %5445 = vmatprep.subr.bf16.mxu1 %v5444_v3  ;;  %v1836_v3 = vld [vmem:[%s9239_s26 + $0x670] sm:$0xff] }
 0x45c   : > { %v5660_v17 = vpack.c.bf16 %v1839_v42, %v1836_v3  ;;  %v1914_v3 = vld [vmem:[%s9239_s26 + $0x8e0] sm:$0xff]  ;;  %v1917_v42 = vld [vmem:[%s9239_s26 + $0x8f8] sm:$0xff] }
 0x45e   : > { %5447 = vmatpush1.bf16.msra.mxu1 %v5446_v27  ;;  %v1840_v27 = vld [vmem:[%s9239_s26 + $0x690] sm:$0xff] }
 0x45f   : > { %5449 = vmatprep.subr.bf16.mxu1 %v5448_v15  ;;  %v1843_v15 = vld [vmem:[%s9239_s26 + $0x6a8] sm:$0xff] }
 0x460   : > { %v5462_v59 = vpack.c.bf16 %v1843_v15, %v1840_v27  ;;  %v1871_v15 = vld [vmem:[%s9239_s26 + $0x788] sm:$0xff] }
 0x49b   : > { %v7846_v39 = vpop.permute.xlu1 %6159 }
 0x49c   : > { %v6162_v21 = vunpack.i.h.bf16 %v7846_v39  ;;  %v6161_v48 = vunpack.i.l.bf16 %v7846_v39 }
 0x49e   : > { %v1606_v2 = vsel %vm834_vm2, %v6152_v26, %v6161_v48  ;;  %v1607_v11 = vsel %vm834_vm2, %v6161_v48, %v6162_v21  ;;  %v1831_v26 = vld [vmem:[%s9239_s26 + $0x648] sm:$0xff]  ;;  %v1842_v48 = vld [vmem:[%s9239_s26 + $0x6a0] sm:$0xff] }
 0x49f   : > { %v6165_v8 = vpop.permute.xlu1 %6164  ;;  %v1624_v7 = vmax.f32 %v7602_v60, %v1607_v11  ;;  %v1623_v28 = vmax.f32 %v7479_v14, %v1606_v2  ;;  %v1835_v14 = vld [vmem:[%s9239_s26 + $0x668] sm:$0xff]  ;;  %v1830_v60 = vld [vmem:[%s9239_s26 + $0x640] sm:$0xff]  ;;  %v5454_v10 = vpack.c.bf16 %v1831_v26, %v1828_v52  ;;  %v5664_v2 = vpack.c.bf16 %v1845_v49, %v1842_v48  ;;  %v1852_v52 = vld [vmem:[%s9239_s26 + $0x6f0] sm:$0xff] }
 0x4a0   : > { %v6167_v57 = vunpack.i.h.bf16 %v6165_v8  ;;  %v6166_v29 = vunpack.i.l.bf16 %v6165_v8  ;;  %v5456_v43 = vpack.c.bf16 %v1838_v1, %v1835_v14  ;;  %v1853_v8 = vld [vmem:[%s9239_s26 + $0x6f8] sm:$0xff]  ;;  %v1855_v26 = vld [vmem:[%s9239_s26 + $0x708] sm:$0xff]  ;;  %v1862_v1 = vld [vmem:[%s9239_s26 + $0x740] sm:$0xff] }
 0x4a1   : > { %2175 = vmatprep.mubr.f32.mxu1 %v1624_v7  ;;  %2529 = vmatprep.mubr.f32.mxu0 %v1624_v7  ;;  %v5666_v7 = vpack.c.bf16 %v1899_v22, %v1896_v50  ;;  %v1968_v48 = vld [vmem:[%s9239_s26 + $0xa90] sm:$0xff]  ;;  %v1971_v49 = vld [vmem:[%s9239_s26 + $0xaa8] sm:$0xff] }
 0x4a2   : > { %2176 = vmatmul.mubr.f32.vlgmr.msra.gmra.mrb[4].mxu1 %v1623_v28  ;;  %2530 = vmatmul.mubr.f32.vlgmr.msra.gmra.mrb[8].mxu0 %v1623_v28  ;;  %v1556_v40 = vsel %vm762_vm0, %v6157_v55, %v6166_v29  ;;  %v1557_v20 = vsel %vm762_vm0, %v6166_v29, %v6167_v57  ;;  %v1848_v28 = vld [vmem:[%s9239_s26 + $0x6d0] sm:$0xff]  ;;  %v1905_v29 = vld [vmem:[%s9239_s26 + $0x898] sm:$0xff] }
 0x4a3   : > { %v1550_v23 = vpop.permute.xlu1 %1549  ;;  %v7911_v13 = vmax.f32 %v7493_v44, %v1556_v40  ;;  %v7914_v61 = vmax.f32 %v7610_v33, %v1557_v20  ;;  %5451 = vmatpush1.bf16.msra.mxu1 %v5450_v46  ;;  %5653 = vmatpush3.bf16.msra.mxu0 %v5652_v41  ;;  %v5656_v44 = vpack.c.bf16 %v1833_v47, %v1830_v60  ;;  %v1851_v46 = vld [vmem:[%s9239_s26 + $0x6e8] sm:$0xff]  ;;  %v1856_v41 = vld [vmem:[%s9239_s26 + $0x710] sm:$0xff]  ;;  %v1854_v40 = vld [vmem:[%s9239_s26 + $0x700] sm:$0xff] }
 0x4a4   : > { %v1558_v55 = vsel %vm762_vm0, %v6167_v57, %v1550_v23  ;;  %5453 = vmatprep.subr.bf16.mxu1 %v5452_v4  ;;  %5655 = vmatprep.subr.bf16.mxu0 %v5654_v35  ;;  %v7956_v30 = vmax.f32 %v7680_v56, %v1550_v23  ;;  %v1850_v56 = vld [vmem:[%s9239_s26 + $0x6e0] sm:$0xff]  ;;  %v5466_v4 = vpack.c.bf16 %v1849_v0, %v1846_v54  ;;  %v1859_v60 = vld [vmem:[%s9239_s26 + $0x728] sm:$0xff]  ;;  %v1857_v20 = vld [vmem:[%s9239_s26 + $0x718] sm:$0xff] }
 0x4a5   : > { %v7924_v63 = vmax.f32 %v7615_v36, %v1558_v55  ;;  %v6168_v33 = vpack.i.bf16 %v7914_v61, %v7911_v13  ;;  %v1844_v36 = vld [vmem:[%s9239_s26 + $0x6b0] sm:$0xff]  ;;  %v5464_v11 = vpack.c.bf16 %v1850_v56, %v1847_v5  ;;  %v1902_v57 = vld [vmem:[%s9239_s26 + $0x880] sm:$0xff]  ;;  %v5668_v35 = vpack.c.bf16 %v1851_v46, %v1848_v28  ;;  %v1869_v5 = vld [vmem:[%s9239_s26 + $0x778] sm:$0xff] }
 0x4a6   : > { %v5460_v51 = vpack.c.bf16 %v1844_v36, %v1841_v18  ;;  %v5468_v14 = vpack.c.bf16 %v1856_v41, %v1853_v8  ;;  %v5670_v47 = vpack.c.bf16 %v1905_v29, %v1902_v57  ;;  %v5470_v23 = vpack.c.bf16 %v1855_v26, %v1852_v52  ;;  %v1858_v55 = vld [vmem:[%s9239_s26 + $0x720] sm:$0xff]  ;;  %v1863_v18 = vld [vmem:[%s9239_s26 + $0x748] sm:$0xff]  ;;  %v1873_v54 = vld [vmem:[%s9239_s26 + $0x798] sm:$0xff] }
 0x4a7   : > { %1600 = vrot.lane.b32.xlu1 %v7924_v63, %s9240_s27  ;;  %6169 = vrot.lane.b32.xlu0 %v6168_v33, %s9240_s27  ;;  %v5672_v58 = vpack.c.bf16 %v1857_v20, %v1854_v40  ;;  %v5472_v53 = vpack.c.bf16 %v1862_v1, %v1859_v60  ;;  %v5674_v33 = vpack.c.bf16 %v1911_v38, %v1908_v31  ;;  %v1876_v28 = vld [vmem:[%s9239_s26 + $0x7b0] sm:$0xff]  ;;  %v1879_v46 = vld [vmem:[%s9239_s26 + $0x7c8] sm:$0xff] }
 0x4a8   : > { %5455 = vmatpush1.bf16.msra.mxu1 %v5454_v10  ;;  %5657 = vmatpush3.bf16.msra.mxu0 %v5656_v44  ;;  %v1861_v10 = vld [vmem:[%s9239_s26 + $0x738] sm:$0xff]  ;;  %v5478_v56 = vpack.c.bf16 %v1867_v34, %v1864_v45  ;;  %v5682_v0 = vpack.c.bf16 %v1971_v49, %v1968_v48  ;;  %v1883_v41 = vld [vmem:[%s9239_s26 + $0x7e8] sm:$0xff]  ;;  %v1886_v57 = vld [vmem:[%s9239_s26 + $0x800] sm:$0xff]  ;;  %v5486_v29 = vpack.c.bf16 %v1879_v46, %v1876_v28 }
 0x4a9   : > { %5457 = vmatprep.subr.bf16.mxu1 %v5456_v43  ;;  %5659 = vmatprep.subr.bf16.mxu0 %v5658_v25  ;;  %v1865_v44 = vld [vmem:[%s9239_s26 + $0x758] sm:$0xff]  ;;  %v1860_v43 = vld [vmem:[%s9239_s26 + $0x730] sm:$0xff]  ;;  %v5474_v36 = vpack.c.bf16 %v1861_v10, %v1858_v55  ;;  %v1882_v52 = vld [vmem:[%s9239_s26 + $0x7e0] sm:$0xff] }
 0x4aa   : > { %v1868_v25 = vld [vmem:[%s9239_s26 + $0x770] sm:$0xff]  ;;  %v1885_v26 = vld [vmem:[%s9239_s26 + $0x7f8] sm:$0xff]  ;;  %v1891_v20 = vld [vmem:[%s9239_s26 + $0x828] sm:$0xff] }
 0x4ab   : > { %1602 = vrot.lane.b32.xlu1 %v7956_v30, %s9240_s27  ;;  %v5476_v27 = vpack.c.bf16 %v1868_v25, %v1865_v44  ;;  %v5490_v60 = vpack.c.bf16 %v1885_v26, %v1882_v52  ;;  %v1888_v40 = vld [vmem:[%s9239_s26 + $0x810] sm:$0xff]  ;;  %v1895_v1 = vld [vmem:[%s9239_s26 + $0x848] sm:$0xff]  ;;  %v1898_v31 = vld [vmem:[%s9239_s26 + $0x860] sm:$0xff]  ;;  %s4807_s27 = sld [smem:[#allocation2 + $0x80]] }
 0x4ac   : > { %5459 = vmatpush1.bf16.msra.mxu1 %v5458_v6  ;;  %5661 = vmatpush3.bf16.msra.mxu0 %v5660_v17  ;;  %v5676_v6 = vpack.c.bf16 %v1863_v18, %v1860_v43  ;;  %v5678_v17 = vpack.c.bf16 %v1917_v42, %v1914_v3  ;;  %v5494_v38 = vpack.c.bf16 %v1891_v20, %v1888_v40  ;;  %v1894_v55 = vld [vmem:[%s9239_s26 + $0x840] sm:$0xff]  ;;  %v1897_v10 = vld [vmem:[%s9239_s26 + $0x858] sm:$0xff]  ;;  %v1900_v43 = vld [vmem:[%s9239_s26 + $0x870] sm:$0xff] }
 0x4ad   : > { %5461 = vmatprep.subr.bf16.mxu1 %v5460_v51  ;;  %5663 = vmatprep.subr.bf16.mxu0 %v5662_v37  ;;  %v1866_v51 = vld [vmem:[%s9239_s26 + $0x760] sm:$0xff]  ;;  %v5498_v44 = vpack.c.bf16 %v1897_v10, %v1894_v55  ;;  %v1903_v18 = vld [vmem:[%s9239_s26 + $0x888] sm:$0xff]  ;;  %v1909_v34 = vld [vmem:[%s9239_s26 + $0x8b8] sm:$0xff] }
 0x4ae   : > { %v1874_v37 = vld [vmem:[%s9239_s26 + $0x7a0] sm:$0xff]  ;;  %v5680_v50 = vpack.c.bf16 %v1869_v5, %v1866_v51  ;;  %v1907_v25 = vld [vmem:[%s9239_s26 + $0x8a8] sm:$0xff]  ;;  %v5502_v42 = vpack.c.bf16 %v1903_v18, %v1900_v43  ;;  %v1912_v51 = vld [vmem:[%s9239_s26 + $0x8d0] sm:$0xff] }
 0x4af   : > { %v5480_v22 = vpack.c.bf16 %v1874_v37, %v1871_v15  ;;  %v1910_v3 = vld [vmem:[%s9239_s26 + $0x8c0] sm:$0xff]  ;;  %v1915_v5 = vld [vmem:[%s9239_s26 + $0x8e8] sm:$0xff]  ;;  %v1920_v28 = vld [vmem:[%s9239_s26 + $0x910] sm:$0xff] }
 0x4b0   : > { %5463 = vmatpush1.bf16.msra.mxu1 %v5462_v59  ;;  %5665 = vmatpush3.bf16.msra.mxu0 %v5664_v2  ;;  %v1870_v59 = vld [vmem:[%s9239_s26 + $0x780] sm:$0xff]  ;;  %v1877_v2 = vld [vmem:[%s9239_s26 + $0x7b8] sm:$0xff]  ;;  %v1919_v37 = vld [vmem:[%s9239_s26 + $0x908] sm:$0xff]  ;;  %v5510_v49 = vpack.c.bf16 %v1915_v5, %v1912_v51 }
 0x4b1   : > { %5465 = vmatprep.subr.bf16.mxu1 %v5464_v11  ;;  %5667 = vmatprep.subr.bf16.mxu0 %v5666_v7  ;;  %v1880_v11 = vld [vmem:[%s9239_s26 + $0x7d0] sm:$0xff]  ;;  %v5482_v8 = vpack.c.bf16 %v1873_v54, %v1870_v59  ;;  %v1906_v45 = vld [vmem:[%s9239_s26 + $0x8a0] sm:$0xff]  ;;  %v1923_v46 = vld [vmem:[%s9239_s26 + $0x928] sm:$0xff] }
 0x4b2   : > { %v5484_v7 = vpack.c.bf16 %v1880_v11, %v1877_v2  ;;  %v5506_v15 = vpack.c.bf16 %v1909_v34, %v1906_v45  ;;  %v1922_v48 = vld [vmem:[%s9239_s26 + $0x920] sm:$0xff]  ;;  %v1977_v26 = vld [vmem:[%s9239_s26 + $0xad8] sm:$0xff]  ;;  %v1927_v40 = vld [vmem:[%s9239_s26 + $0x948] sm:$0xff] }
 0x4b3   : > { %v1918_v2 = vld [vmem:[%s9239_s26 + $0x900] sm:$0xff]  ;;  %v1980_v10 = vld [vmem:[%s9239_s26 + $0xaf0] sm:$0xff]  ;;  %v1989_v34 = vld [vmem:[%s9239_s26 + $0xb38] sm:$0xff] }
 0x4b4   : > { %5467 = vmatpush1.bf16.msra.mxu1 %v5466_v4  ;;  %5669 = vmatpush3.bf16.msra.mxu0 %v5668_v35  ;;  %v5488_v4 = vpack.c.bf16 %v1886_v57, %v1883_v41  ;;  %v1889_v35 = vld [vmem:[%s9239_s26 + $0x818] sm:$0xff]  ;;  %v1974_v52 = vld [vmem:[%s9239_s26 + $0xac0] sm:$0xff] }
 0x4b5   : > { %5469 = vmatprep.subr.bf16.mxu1 %v5468_v14  ;;  %5671 = vmatprep.subr.bf16.mxu0 %v5670_v47  ;;  %v1892_v14 = vld [vmem:[%s9239_s26 + $0x830] sm:$0xff]  ;;  %v1925_v41 = vld [vmem:[%s9239_s26 + $0x938] sm:$0xff]  ;;  %v1934_v55 = vld [vmem:[%s9239_s26 + $0x980] sm:$0xff] }
 0x4b6   : > { %v5492_v47 = vpack.c.bf16 %v1892_v14, %v1889_v35  ;;  %v1986_v45 = vld [vmem:[%s9239_s26 + $0xb20] sm:$0xff] }
 0x4b7   : > { %v5694_v5 = vpack.c.bf16 %v1989_v34, %v1986_v45  ;;  %v1960_v34 = vld [vmem:[%s9239_s26 + $0xa50] sm:$0xff] }
 0x4b8   : > { %5471 = vmatpush1.bf16.msra.mxu1 %v5470_v23  ;;  %5673 = vmatpush3.bf16.msra.mxu0 %v5672_v58  ;;  %v5496_v23 = vpack.c.bf16 %v1898_v31, %v1895_v1  ;;  %v1901_v58 = vld [vmem:[%s9239_s26 + $0x878] sm:$0xff]  ;;  %v1931_v1 = vld [vmem:[%s9239_s26 + $0x968] sm:$0xff] }
 0x4b9   : > { %5473 = vmatprep.subr.bf16.mxu1 %v5472_v53  ;;  %5675 = vmatprep.subr.bf16.mxu0 %v5674_v33  ;;  %v1904_v53 = vld [vmem:[%s9239_s26 + $0x890] sm:$0xff]  ;;  %v5520_v43 = vpack.c.bf16 %v1934_v55, %v1931_v1  ;;  %v1955_v1 = vld [vmem:[%s9239_s26 + $0xa28] sm:$0xff] }
 0x4ba   : > { %v5500_v33 = vpack.c.bf16 %v1904_v53, %v1901_v58  ;;  %v1983_v58 = vld [vmem:[%s9239_s26 + $0xb08] sm:$0xff] }
 0x4bb   : > { %v5690_v18 = vpack.c.bf16 %v1983_v58, %v1980_v10  ;;  %v1954_v58 = vld [vmem:[%s9239_s26 + $0xa20] sm:$0xff] }
 0x4bc   : > { %5475 = vmatpush1.bf16.msra.mxu1 %v5474_v36  ;;  %5677 = vmatpush3.bf16.msra.mxu0 %v5676_v6  ;;  %v5504_v36 = vpack.c.bf16 %v1910_v3, %v1907_v25  ;;  %v1913_v6 = vld [vmem:[%s9239_s26 + $0x8d8] sm:$0xff]  ;;  %v1932_v25 = vld [vmem:[%s9239_s26 + $0x970] sm:$0xff]  ;;  %v1935_v3 = vld [vmem:[%s9239_s26 + $0x988] sm:$0xff] }
 0x4bd   : > { %5477 = vmatprep.subr.bf16.mxu1 %v5476_v27  ;;  %5679 = vmatprep.subr.bf16.mxu0 %v5678_v17  ;;  %v1916_v27 = vld [vmem:[%s9239_s26 + $0x8f0] sm:$0xff] }
 0x4be   : > { %v5508_v17 = vpack.c.bf16 %v1916_v27, %v1913_v6  ;;  %v5692_v27 = vpack.c.bf16 %v1935_v3, %v1932_v25  ;;  %v1964_v25 = vld [vmem:[%s9239_s26 + $0xa70] sm:$0xff]  ;;  %v2010_v3 = vld [vmem:[%s9239_s26 + $0xbe0] sm:$0xff] }
 0x4c0   : > { %5479 = vmatpush1.bf16.msra.mxu1 %v5478_v56  ;;  %5681 = vmatpush3.bf16.msra.mxu0 %v5680_v50  ;;  %v5512_v56 = vpack.c.bf16 %v1922_v48, %v1919_v37  ;;  %v1938_v37 = vld [vmem:[%s9239_s26 + $0x9a0] sm:$0xff]  ;;  %v1941_v48 = vld [vmem:[%s9239_s26 + $0x9b8] sm:$0xff] }
 0x4c1   : > { %5481 = vmatprep.subr.bf16.mxu1 %v5480_v22  ;;  %5683 = vmatprep.subr.bf16.mxu0 %v5682_v0 }
 0x4c4   : > { %5483 = vmatpush1.bf16.msra.mxu1 %v5482_v8 }
 0x4c5   : > { %5485 = vmatprep.subr.bf16.mxu1 %v5484_v7  ;;  %v1921_v7 = vld [vmem:[%s9239_s26 + $0x918] sm:$0xff] }
 0x4c6   : > { %v5514_v14 = vpack.c.bf16 %v1921_v7, %v1918_v2  ;;  %v1942_v7 = vld [vmem:[%s9239_s26 + $0x9c0] sm:$0xff] }
 0x4c8   : > { %5487 = vmatpush1.bf16.msra.mxu1 %v5486_v29 }
 0x4c9   : > { %5489 = vmatprep.subr.bf16.mxu1 %v5488_v4  ;;  %v1928_v4 = vld [vmem:[%s9239_s26 + $0x950] sm:$0xff] }
 0x4cc   : > { %5491 = vmatpush1.bf16.msra.mxu1 %v5490_v60  ;;  %v5684_v60 = vpack.c.bf16 %v1923_v46, %v1920_v28  ;;  %v1945_v28 = vld [vmem:[%s9239_s26 + $0x9d8] sm:$0xff] }
 0x4cd   : > { %5493 = vmatprep.subr.bf16.mxu1 %v5492_v47  ;;  %v1924_v47 = vld [vmem:[%s9239_s26 + $0x930] sm:$0xff] }
 0x4ce   : > { %v5518_v53 = vpack.c.bf16 %v1927_v40, %v1924_v47  ;;  %v1951_v47 = vld [vmem:[%s9239_s26 + $0xa08] sm:$0xff] }
 0x4d0   : > { %5495 = vmatpush1.bf16.msra.mxu1 %v5494_v38  ;;  %v5516_v38 = vpack.c.bf16 %v1928_v4, %v1925_v41  ;;  %v1949_v4 = vld [vmem:[%s9239_s26 + $0x9f8] sm:$0xff] }
 0x4d1   : > { %5497 = vmatprep.subr.bf16.mxu1 %v5496_v23  ;;  %v5686_v23 = vpack.c.bf16 %v1977_v26, %v1974_v52  ;;  %v1952_v52 = vld [vmem:[%s9239_s26 + $0xa10] sm:$0xff]  ;;  %v1998_v26 = vld [vmem:[%s9239_s26 + $0xb80] sm:$0xff] }
 0x4d2   : > { %v5532_v40 = vpack.c.bf16 %v1952_v52, %v1949_v4  ;;  %v2022_v4 = vld [vmem:[%s9239_s26 + $0xc40] sm:$0xff]  ;;  %v2025_v52 = vld [vmem:[%s9239_s26 + $0xc58] sm:$0x7] }
 0x4d4   : > { %5499 = vmatpush1.bf16.msra.mxu1 %v5498_v44  ;;  %v1930_v44 = vld [vmem:[%s9239_s26 + $0x960] sm:$0xff] }
 0x4d5   : > { %5501 = vmatprep.subr.bf16.mxu1 %v5500_v33  ;;  %v1933_v33 = vld [vmem:[%s9239_s26 + $0x978] sm:$0xff] }
 0x4d6   : > { %v5522_v6 = vpack.c.bf16 %v1933_v33, %v1930_v44  ;;  %v1956_v33 = vld [vmem:[%s9239_s26 + $0xa30] sm:$0xff] }
 0x4d8   : > { %5503 = vmatpush1.bf16.msra.mxu1 %v5502_v42  ;;  %v1937_v42 = vld [vmem:[%s9239_s26 + $0x998] sm:$0xff] }
 0x4d9   : > { %5505 = vmatprep.subr.bf16.mxu1 %v5504_v36  ;;  %v1940_v36 = vld [vmem:[%s9239_s26 + $0x9b0] sm:$0xff] }
 0x4da   : > { %v5524_v51 = vpack.c.bf16 %v1940_v36, %v1937_v42  ;;  %v2013_v42 = vld [vmem:[%s9239_s26 + $0xbf8] sm:$0xff] }
 0x4dc   : > { %5507 = vmatpush1.bf16.msra.mxu1 %v5506_v15  ;;  %v1936_v15 = vld [vmem:[%s9239_s26 + $0x990] sm:$0xff] }
 0x4dd   : > { %5509 = vmatprep.subr.bf16.mxu1 %v5508_v17  ;;  %v1939_v17 = vld [vmem:[%s9239_s26 + $0x9a8] sm:$0xff] }
 0x4de   : > { %v5526_v2 = vpack.c.bf16 %v1939_v17, %v1936_v15  ;;  %v1963_v15 = vld [vmem:[%s9239_s26 + $0xa68] sm:$0xff]  ;;  %v1962_v17 = vld [vmem:[%s9239_s26 + $0xa60] sm:$0xff] }
 0x4e0   : > { %5511 = vmatpush1.bf16.msra.mxu1 %v5510_v49  ;;  %v1943_v49 = vld [vmem:[%s9239_s26 + $0x9c8] sm:$0xff] }
 0x4e1   : > { %5513 = vmatprep.subr.bf16.mxu1 %v5512_v56  ;;  %v1946_v56 = vld [vmem:[%s9239_s26 + $0x9e0] sm:$0xff] }
 0x4e2   : > { %v5528_v46 = vpack.c.bf16 %v1946_v56, %v1943_v49  ;;  %v1966_v56 = vld [vmem:[%s9239_s26 + $0xa80] sm:$0xff] }
 0x4f4   : > { %v4904_v50 = vpop.f32.mrb[6].mxu0 }
 0x4f5   : > { %v4905_v22 = vpop.f32.mrb[7].mxu0 }
 0x4f6   : > { %v8170_v59 = vadd.f32 %v4905_v22, %v4904_v50  ;;  %v1992_v50 = vld [vmem:[%s9239_s26 + $0xb50] sm:$0xff]  ;;  %v1995_v22 = vld [vmem:[%s9239_s26 + $0xb68] sm:$0xff] }
 0x4f7   : > { %v5698_v41 = vpack.c.bf16 %v1995_v22, %v1992_v50  ;;  %v1969_v22 = vld [vmem:[%s9239_s26 + $0xa98] sm:$0xff] }
 0x519   : > { %v8172_v54 = vpop.permute.xlu1 %1600  ;;  %v8174_v0 = vpop.permute.xlu0 %6169 }
 0x51a   : > { %v6172_v11 = vunpack.i.h.bf16 %v8174_v0  ;;  %v6171_v8 = vunpack.i.l.bf16 %v8174_v0 }
 0x51c   : > { %v1608_v57 = vsel %vm834_vm2, %v6162_v21, %v6171_v8  ;;  %v1609_v29 = vsel %vm834_vm2, %v6171_v8, %v6172_v11  ;;  %v5696_v8 = vpack.c.bf16 %v1941_v48, %v1938_v37  ;;  %v1970_v37 = vld [vmem:[%s9239_s26 + $0xaa0] sm:$0xff]  ;;  %v5542_v48 = vpack.c.bf16 %v1963_v15, %v1960_v34  ;;  %v2012_v15 = vld [vmem:[%s9239_s26 + $0xbf0] sm:$0xff] }
 0x51d   : > { %v8208_v35 = vpop.permute.xlu1 %1602  ;;  %v1626_v39 = vmax.f32 %v7911_v13, %v1609_v29  ;;  %v1625_v21 = vmax.f32 %v7605_v62, %v1608_v57  ;;  %v1926_v13 = vld [vmem:[%s9239_s26 + $0x940] sm:$0xff]  ;;  %v1929_v62 = vld [vmem:[%s9239_s26 + $0x958] sm:$0xff]  ;;  %v1944_v57 = vld [vmem:[%s9239_s26 + $0x9d0] sm:$0xff] }
 0x51e   : > { %v1611_v20 = vsel %vm834_vm2, %v8172_v54, %v8208_v35  ;;  %v1947_v29 = vld [vmem:[%s9239_s26 + $0x9e8] sm:$0xff]  ;;  %v2002_v34 = vld [vmem:[%s9239_s26 + $0xba0] sm:$0xff] }
 0x51f   : > { %2246 = vmatprep.mubr.f32.mxu1 %v1626_v39  ;;  %2599 = vmatprep.mubr.f32.mxu0 %v1626_v39  ;;  %v1628_v31 = vmax.f32 %v7924_v63, %v1611_v20  ;;  %v5688_v63 = vpack.c.bf16 %v1929_v62, %v1926_v13  ;;  %v2001_v39 = vld [vmem:[%s9239_s26 + $0xb98] sm:$0xff]  ;;  %v1950_v13 = vld [vmem:[%s9239_s26 + $0xa00] sm:$0xff] }
 0x520   : > { %2247 = vmatmul.mubr.f32.vlgmr.msra.gmra.mrb[4].mxu1 %v1625_v21  ;;  %2600 = vmatmul.mubr.f32.vlgmr.msra.gmra.mrb[10].mxu0 %v1625_v21  ;;  %v5530_v21 = vpack.c.bf16 %v1945_v28, %v1942_v7  ;;  %v5702_v20 = vpack.c.bf16 %v2001_v39, %v1998_v26  ;;  %v1953_v62 = vld [vmem:[%s9239_s26 + $0xa18] sm:$0xff]  ;;  %v1610_v7 = vsel %vm834_vm2, %v6172_v11, %v8172_v54  ;;  %v1975_v11 = vld [vmem:[%s9239_s26 + $0xac8] sm:$0xff]  ;;  %v1982_v26 = vld [vmem:[%s9239_s26 + $0xb00] sm:$0xff]  ;;  %vm2026_vm2 = vcmask 220160  }
 0x521   : > { %5515 = vmatpush1.bf16.msra.mxu1 %v5514_v14  ;;  %5685 = vmatpush3.bf16.msra.mxu0 %v5684_v60  ;;  %v5700_v14 = vpack.c.bf16 %v1947_v29, %v1944_v57  ;;  %v1948_v60 = vld [vmem:[%s9239_s26 + $0x9f0] sm:$0xff]  ;;  %v5704_v10 = vpack.c.bf16 %v1953_v62, %v1950_v13  ;;  %v1973_v28 = vld [vmem:[%s9239_s26 + $0xab8] sm:$0xff]  ;;  %v8404_v0 = vmax.f32 %v7914_v61, %v1610_v7  ;;  %v1979_v61 = vld [vmem:[%s9239_s26 + $0xae8] sm:$0xff] }
 0x522   : > { %2317 = vmatprep.mubr.f32.mxu1 %v1628_v31  ;;  %2669 = vmatprep.mubr.f32.mxu0 %v1628_v31  ;;  %v1958_v31 = vld [vmem:[%s9239_s26 + $0xa40] sm:$0xff]  ;;  %v5534_v55 = vpack.c.bf16 %v1951_v47, %v1948_v60  ;;  %v1972_v29 = vld [vmem:[%s9239_s26 + $0xab0] sm:$0xff]  ;;  %v5552_v60 = vpack.c.bf16 %v1982_v26, %v1979_v61 }
 0x523   : > { %5517 = vmatprep.subr.bf16.mxu1 %v5516_v38  ;;  %5687 = vmatprep.subr.bf16.mxu0 %v5686_v23  ;;  %v2004_v38 = vld [vmem:[%s9239_s26 + $0xbb0] sm:$0xff]  ;;  %v2007_v23 = vld [vmem:[%s9239_s26 + $0xbc8] sm:$0xff]  ;;  %v5550_v39 = vpack.c.bf16 %v1975_v11, %v1972_v29  ;;  %v1978_v47 = vld [vmem:[%s9239_s26 + $0xae0] sm:$0xff] }
 0x524   : > { %v5706_v44 = vpack.c.bf16 %v2007_v23, %v2004_v38  ;;  %v1988_v13 = vld [vmem:[%s9239_s26 + $0xb30] sm:$0xff]  ;;  %v1987_v23 = vld [vmem:[%s9239_s26 + $0xb28] sm:$0xff] }
 0x525   : > { %5519 = vmatpush1.bf16.msra.mxu1 %v5518_v53  ;;  %5689 = vmatpush3.bf16.msra.mxu0 %v5688_v63  ;;  %v1957_v53 = vld [vmem:[%s9239_s26 + $0xa38] sm:$0xff]  ;;  %v5536_v63 = vpack.c.bf16 %v1958_v31, %v1955_v1  ;;  %v1629_v1 = vmax.f32 %v7956_v30, %v8208_v35  ;;  %v1984_v38 = vld [vmem:[%s9239_s26 + $0xb10] sm:$0xff] }
 0x526   : > { %5521 = vmatprep.subr.bf16.mxu1 %v5520_v43  ;;  %5691 = vmatprep.subr.bf16.mxu0 %v5690_v18  ;;  %v1959_v43 = vld [vmem:[%s9239_s26 + $0xa48] sm:$0xff]  ;;  %v1961_v18 = vld [vmem:[%s9239_s26 + $0xa58] sm:$0xff]  ;;  %v5538_v36 = vpack.c.bf16 %v1957_v53, %v1954_v58  ;;  %v5558_v30 = vpack.c.bf16 %v1987_v23, %v1984_v38  ;;  %v1990_v58 = vld [vmem:[%s9239_s26 + $0xb40] sm:$0xff] }
 0x527   : > { %v5708_v45 = vpack.c.bf16 %v1959_v43, %v1956_v33  ;;  %v1993_v53 = vld [vmem:[%s9239_s26 + $0xb58] sm:$0xff]  ;;  %v2024_v7 = vld [vmem:[%s9239_s26 + $0xc50] sm:$0x7]  ;;  %v2847_v38 = vld [vmem:[%s9173_s9 + $0x8] sm:$0xff] }
 0x528   : > { %v5562_v33 = vpack.c.bf16 %v1993_v53, %v1990_v58  ;;  %v2846_v23 = vld [vmem:[%s9173_s9] sm:$0xff] }
 0x529   : > { %5523 = vmatpush1.bf16.msra.mxu1 %v5522_v6  ;;  %5693 = vmatpush3.bf16.msra.mxu0 %v5692_v27  ;;  %v5540_v6 = vpack.c.bf16 %v1964_v25, %v1961_v18  ;;  %v5710_v27 = vpack.c.bf16 %v2013_v42, %v2010_v3  ;;  %v1996_v18 = vld [vmem:[%s9239_s26 + $0xb70] sm:$0xff]  ;;  %v1999_v25 = vld [vmem:[%s9239_s26 + $0xb88] sm:$0xff]  ;;  %v2006_v42 = vld [vmem:[%s9239_s26 + $0xbc0] sm:$0xff] }
 0x52a   : > { %5525 = vmatprep.subr.bf16.mxu1 %v5524_v51  ;;  %5695 = vmatprep.subr.bf16.mxu0 %v5694_v5  ;;  %v1965_v51 = vld [vmem:[%s9239_s26 + $0xa78] sm:$0xff]  ;;  %v1967_v5 = vld [vmem:[%s9239_s26 + $0xa88] sm:$0xff] }
 0x52b   : > { %v5712_v49 = vpack.c.bf16 %v1965_v51, %v1962_v17  ;;  %v5544_v50 = vpack.c.bf16 %v1970_v37, %v1967_v5  ;;  %v2003_v3 = vld [vmem:[%s9239_s26 + $0xba8] sm:$0xff]  ;;  %v2008_v5 = vld [vmem:[%s9239_s26 + $0xbd0] sm:$0xff] }
 0x52c   : > { %v2011_v37 = vld [vmem:[%s9239_s26 + $0xbe8] sm:$0xff] }
 0x52d   : > { %5527 = vmatpush1.bf16.msra.mxu1 %v5526_v2  ;;  %5697 = vmatpush3.bf16.msra.mxu0 %v5696_v8  ;;  %v2016_v2 = vld [vmem:[%s9239_s26 + $0xc10] sm:$0xff]  ;;  %v2019_v8 = vld [vmem:[%s9239_s26 + $0xc28] sm:$0xff] }
 0x52e   : > { %5529 = vmatprep.subr.bf16.mxu1 %v5528_v46  ;;  %5699 = vmatprep.subr.bf16.mxu0 %v5698_v41  ;;  %v1976_v46 = vld [vmem:[%s9239_s26 + $0xad0] sm:$0xff]  ;;  %v5546_v41 = vpack.c.bf16 %v1969_v22, %v1966_v56  ;;  %v5715_v57 = vpack.c.bf16 %v2019_v8, %v2016_v2  ;;  %v5574_v56 = vpack.c.bf16 %v2011_v37, %v2008_v5  ;;  %v2014_v22 = vld [vmem:[%s9239_s26 + $0xc00] sm:$0xff]  ;;  %v2017_v2 = vld [vmem:[%s9239_s26 + $0xc18] sm:$0xff] }
 0x52f   : > { %v5548_v54 = vpack.c.bf16 %v1976_v46, %v1973_v28  ;;  %v2021_v8 = vld [vmem:[%s9239_s26 + $0xc38] sm:$0xff]  ;;  %v5578_v28 = vpack.c.bf16 %v2017_v2, %v2014_v22 }
 0x530   : > { %v5580_v46 = vpack.c.bf16 %v2024_v7, %v2021_v8 }
 0x531   : > { %5531 = vmatpush1.bf16.msra.mxu1 %v5530_v21  ;;  %5701 = vmatpush3.bf16.msra.mxu0 %v5700_v14  ;;  %v5718_v21 = vpack.c.bf16 %v2025_v52, %v2022_v4 }
 0x532   : > { %5533 = vmatprep.subr.bf16.mxu1 %v5532_v40  ;;  %5703 = vmatprep.subr.bf16.mxu0 %v5702_v20  ;;  %v1981_v40 = vld [vmem:[%s9239_s26 + $0xaf8] sm:$0xff] }
 0x533   : > { %v1985_v20 = vld [vmem:[%s9239_s26 + $0xb18] sm:$0xff]  ;;  %v5554_v62 = vpack.c.bf16 %v1981_v40, %v1978_v47 }
 0x534   : > { %v5556_v31 = vpack.c.bf16 %v1988_v13, %v1985_v20 }
 0x535   : > { %5535 = vmatpush1.bf16.msra.mxu1 %v5534_v55  ;;  %5705 = vmatpush3.bf16.msra.mxu0 %v5704_v10  ;;  %v1991_v55 = vld [vmem:[%s9239_s26 + $0xb48] sm:$0xff]  ;;  %v1994_v10 = vld [vmem:[%s9239_s26 + $0xb60] sm:$0xff] }
 0x536   : > { %5537 = vmatprep.subr.bf16.mxu1 %v5536_v63  ;;  %5707 = vmatprep.subr.bf16.mxu0 %v5706_v44  ;;  %v5560_v35 = vpack.c.bf16 %v1994_v10, %v1991_v55  ;;  %v1997_v63 = vld [vmem:[%s9239_s26 + $0xb78] sm:$0xff]  ;;  %v2000_v44 = vld [vmem:[%s9239_s26 + $0xb90] sm:$0xff] }
 0x537   : > { %v5564_v43 = vpack.c.bf16 %v2000_v44, %v1997_v63 }
 0x539   : > { %5539 = vmatpush1.bf16.msra.mxu1 %v5538_v36  ;;  %5709 = vmatpush3.bf16.msra.mxu0 %v5708_v45  ;;  %v5566_v36 = vpack.c.bf16 %v1999_v25, %v1996_v18  ;;  %v5568_v45 = vpack.c.bf16 %v2006_v42, %v2003_v3 }
 0x53a   : > { %5541 = vmatprep.subr.bf16.mxu1 %v5540_v6  ;;  %5711 = vmatprep.subr.bf16.mxu0 %v5710_v27  ;;  %v2005_v6 = vld [vmem:[%s9239_s26 + $0xbb8] sm:$0xff] }
 0x53b   : > { %v2009_v27 = vld [vmem:[%s9239_s26 + $0xbd8] sm:$0xff]  ;;  %v5570_v17 = vpack.c.bf16 %v2005_v6, %v2002_v34 }
 0x53c   : > { %v5572_v51 = vpack.c.bf16 %v2012_v15, %v2009_v27 }
 0x53d   : > { %5543 = vmatpush1.bf16.msra.mxu1 %v5542_v48  ;;  %5713 = vmatpush3.bf16.msra.mxu0 %v5712_v49  ;;  %v2015_v48 = vld [vmem:[%s9239_s26 + $0xc08] sm:$0xff]  ;;  %v2018_v49 = vld [vmem:[%s9239_s26 + $0xc20] sm:$0xff] }
 0x53e   : > { %5545 = vmatprep.subr.bf16.mxu1 %v5544_v50  ;;  %5714 = vmatprep.subr.bf16.mxu0 %v6535_v24  ;;  %v5576_v50 = vpack.c.bf16 %v2018_v49, %v2015_v48 }
 0x540   : > { %2670 = vmatmul.mubr.f32.vlgmr.msra.gmra.mrb[12].mxu0 %v8404_v0 }
 0x541   : > { %5547 = vmatpush1.bf16.msra.mxu1 %v5546_v41  ;;  %5716 = vmatpush3.bf16.msra.mxu0 %v5715_v57  ;;  %v2020_v41 = vld [vmem:[%s9239_s26 + $0xc30] sm:$0xff]  ;;  %v2023_v57 = vld [vmem:[%s9239_s26 + $0xc48] sm:$0x7] }
 0x542   : > { %5549 = vmatprep.subr.bf16.mxu1 %v5548_v54  ;;  %5717 = vmatprep.subr.bf16.mxu0 %v6535_v24  ;;  %v5583_v29 = vpack.c.bf16 %v2023_v57, %v2020_v41 }
 0x543   : > { %5168 = vmatprep.mubr.msk.f32.mxu0 %vm6536_vm9, %v6532_v12  ;;  %vm3537_vm9 = vcmask 637952  }
 0x545   : > { %5551 = vmatpush1.bf16.msra.mxu1 %v5550_v39  ;;  %5720 = vmatpush3.bf16.msk.msra.mxu0 %vm8426_vm15, %v5718_v21 }
 0x546   : > { %5553 = vmatprep.subr.bf16.mxu1 %v5552_v60 }
 0x548   : > { %5169 = vmatmul.mubr.msk.f32.vlgmr.msra.gmra.mrb[14].mxu0 %vm2026_vm2, %v1629_v1 }
 0x549   : > { %5555 = vmatpush1.bf16.msra.mxu1 %v5554_v62  ;;  %2928 = vmatprep.mubr.f32.mxu0 %v6532_v12 }
 0x54a   : > { %5557 = vmatprep.subr.bf16.mxu1 %v5556_v31 }
 0x54d   : > { %5559 = vmatpush1.bf16.msra.mxu1 %v5558_v30 }
 0x54e   : > { %5561 = vmatprep.subr.bf16.mxu1 %v5560_v35 }
 0x551   : > { %5563 = vmatpush1.bf16.msra.mxu1 %v5562_v33 }
 0x552   : > { %5565 = vmatprep.subr.bf16.mxu1 %v5564_v43 }
 0x555   : > { %5567 = vmatpush1.bf16.msra.mxu1 %v5566_v36 }
 0x556   : > { %5569 = vmatprep.subr.bf16.mxu1 %v5568_v45 }
 0x559   : > { %5571 = vmatpush1.bf16.msra.mxu1 %v5570_v17 }
 0x55a   : > { %5573 = vmatprep.subr.bf16.mxu1 %v5572_v51 }
 0x55d   : > { %5575 = vmatpush1.bf16.msra.mxu1 %v5574_v56 }
 0x55e   : > { %5577 = vmatprep.subr.bf16.mxu1 %v5576_v50 }
 0x560   : > { %2318 = vmatmul.mubr.f32.vlgmr.msra.gmra.mrb[4].mxu1 %v8404_v0 }
 0x561   : > { %5579 = vmatpush1.bf16.msra.mxu1 %v5578_v28  ;;  %2388 = vmatprep.mubr.f32.mxu1 %v6532_v12 }
 0x562   : > { %5582 = vmatprep.subr.msk.bf16.mxu1 %vm8426_vm15, %v5580_v46 }
 0x565   : > { %5585 = vmatpush1.bf16.msk.msra.mxu1 %vm8426_vm15, %v5583_v29 }
 0x568   : > { %4804 = vmatmul.mubr.msk.f32.vlgmr.msra.gmra.mrb[4].mxu1 %vm2026_vm2, %v1629_v1  ;;  %vm4306_vm2 = vcmask 261120  }
 0x575   : > { %v4939_v54 = vpop.f32.mrb[8].mxu0 }
 0x576   : > { %v4940_v11 = vpop.f32.mrb[9].mxu0 }
 0x577   : > { %v4941_v4 = vadd.f32 %v4940_v11, %v4939_v54 }
 0x579   : > { %v2532_v52 = vadd.f32 %v4941_v4, %v8170_v59 }
 0x5f3   : > { %v4974_v61 = vpop.f32.mrb[10].mxu0 }
 0x5f4   : > { %v4975_v26 = vpop.f32.mrb[11].mxu0 }
 0x5f5   : > { %v4976_v0 = vadd.f32 %v4975_v26, %v4974_v61 }
 0x5f7   : > { %v2602_v39 = vadd.f32 %v4976_v0, %v2532_v52 }
 0x613   : > { %v5009_v21 = vpop.f32.mrb[12].mxu0 }
 0x614   : > { %v5010_v60 = vpop.f32.mrb[13].mxu0 }
 0x615   : > { %v5011_v47 = vadd.f32 %v5010_v60, %v5009_v21 }
 0x617   : > { %v2672_v40 = vadd.f32 %v5011_v47, %v2602_v39 }
 0x61b   : > { %v2741_v20 = vpop.f32.mrb[14].mxu0 }
 0x61c   : > { %v8536_v13 = vadd.f32 %v2741_v20, %v2672_v40  ;;  %v5170_v62 = vpop.f32.mrb[15].mxu0 }
 0x63b   : > { %v2390_v31 = vpop.f32.mrb[4].mxu1 }
 0x63c   : > { %2773 = vrot.lane.b32.xlu0 %v2390_v31, %s6538_s0  ;;  %2751 = vrot.lane.b32.xlu1 %v2390_v31, %s9241_s29  ;;  %v2392_v1 = vpop.f32.mrb[5].mxu1 }
 0x63d   : > { %v6183_v59 = vpack.i.bf16 %v8536_v13, %v2392_v1 }
 0x640   : > { %2797 = vrot.lane.b32.xlu0 %v2390_v31, %s9210_s1  ;;  %2762 = vrot.lane.b32.xlu1 %v2390_v31, %s9244_s5 }
 0x644   : > { %2785 = vrot.lane.b32.xlu1 %v2390_v31, %s6540_s3  ;;  %6184 = vrot.lane.b32.xlu0 %v6183_v59, %s6538_s0 }
 0x648   : > { %2809 = vrot.lane.b32.xlu1 %v2390_v31, %s9245_s23  ;;  %6194 = vrot.lane.b32.xlu0 %v6183_v59, %s9210_s1 }
 0x64c   : > { %6204 = vrot.lane.b32.xlu0 %v6183_v59, %s6541_s2  ;;  %6174 = vrot.lane.b32.xlu1 %v6183_v59, %s9241_s29 }
 0x650   : > { %2820 = vrot.lane.b32.xlu0 %v2390_v31, %s6541_s2  ;;  %6179 = vrot.lane.b32.xlu1 %v6183_v59, %s9244_s5  ;;  %s6546_s2 = smov 106  }
 0x654   : > { %2836 = vrot.lane.b32.xlu0 %v8536_v13, %s6542_s28  ;;  %6189 = vrot.lane.b32.xlu1 %v6183_v59, %s6540_s3  ;;  %s9246_s3 = smov 108  }
 0x658   : > { %6199 = vrot.lane.b32.xlu1 %v6183_v59, %s9245_s23  ;;  %2850 = vperm.xlu0 %6208, %v2846_v23   ;;  %v2844_v23 = vld [vmem:[%s9172_s8] sm:$0xff]  ;;  %s6545_s23 = smov 116  }
 0x65c   : > { %2834 = vrot.lane.b32.xlu1 %v2392_v1, %s6542_s28 }
 0x660   : > { %2832 = vrot.lane.b32.xlu1 %v2390_v31, %s6542_s28  ;;  %s6547_s28 = smov 107  }
 0x664   : > { %2855 = vperm.xlu1 %6137, %v2847_v38  }
 0x6ae   : > { %v2774_v55 = vpop.permute.xlu0 %2773  ;;  %v2752_v10 = vpop.permute.xlu1 %2751 }
 0x6b2   : > { %v2798_v30 = vpop.permute.xlu0 %2797  ;;  %v2763_v35 = vpop.permute.xlu1 %2762 }
 0x6b6   : > { %v2786_v58 = vpop.permute.xlu1 %2785  ;;  %v8556_v53 = vpop.permute.xlu0 %6184 }
 0x6b7   : > { %v6187_v25 = vunpack.i.h.bf16 %v8556_v53  ;;  %v6186_v3 = vunpack.i.l.bf16 %v8556_v53 }
 0x6b9   : > { %v2780_v37 = vsel %vm2779_vm3, %v2774_v55, %v6186_v3  ;;  %v2781_v56 = vsel %vm2779_vm3, %v6186_v3, %v6187_v25 }
 0x6ba   : > { %v2810_v63 = vpop.permute.xlu1 %2809  ;;  %v8558_v44 = vpop.permute.xlu0 %6194 }
 0x6bb   : > { %v6197_v17 = vunpack.i.h.bf16 %v8558_v44  ;;  %v6196_v51 = vunpack.i.l.bf16 %v8558_v44 }
 0x6bd   : > { %v2805_v28 = vsel %vm2803_vm5, %v6196_v51, %v6197_v17  ;;  %v2804_v46 = vsel %vm2803_vm5, %v2798_v30, %v6196_v51  ;;  %v2845_v30 = vld [vmem:[%s9172_s8 + $0x8] sm:$0xff] }
 0x6be   : > { %v8560_v33 = vpop.permute.xlu1 %6174  ;;  %v6205_v5 = vpop.permute.xlu0 %6204 }
 0x6bf   : > { %v6177_v43 = vunpack.i.h.bf16 %v8560_v33  ;;  %v6176_v18 = vunpack.i.l.bf16 %v8560_v33  ;;  %v6207_v41 = vunpack.i.h.bf16 %v6205_v5  ;;  %v6206_v57 = vunpack.i.l.bf16 %v6205_v5 }
 0x6c1   : > { %v2757_v42 = vsel %vm762_vm0, %v2752_v10, %v6176_v18  ;;  %v2758_v36 = vsel %vm762_vm0, %v6176_v18, %v6177_v43  ;;  %v2828_v47 = vsel %vm2826_vm7, %v6206_v57, %v6207_v41  ;;  %v5737_v55 = vpack.c.bf16 %v6177_v43, %v8536_v13 }
 0x6c2   : > { %v6180_v45 = vpop.permute.xlu1 %6179  ;;  %v5721_v34 = vpack.c.bf16 %v2758_v36, %v2392_v1  ;;  %v5723_v6 = vpack.c.bf16 %v2757_v42, %v2390_v31  ;;  %v2821_v11 = vpop.permute.xlu0 %2820  ;;  %v3022_v42 = vld [vmem:[%s9174_s10] sm:$0x7] }
 0x6c3   : > { %v6182_v27 = vunpack.i.h.bf16 %v6180_v45  ;;  %v6181_v15 = vunpack.i.l.bf16 %v6180_v45  ;;  %v2827_v39 = vsel %vm2826_vm7, %v2821_v11, %v6206_v57  ;;  %v3035_v5 = vrot.slane %v3022_v42, %v1430_v32 }
 0x6c4   : > { %5722 = vmatprep.subr.bf16.mxu0 %v5721_v34 }
 0x6c5   : > { %v2768_v48 = vsel %vm798_vm1, %v2763_v35, %v6181_v15  ;;  %5724 = vmatpush1.bf16.msra.mxu0 %v5723_v6  ;;  %v2769_v49 = vsel %vm798_vm1, %v6181_v15, %v6182_v27  ;;  %vm2838_vm1 = vcmask 736256   ;;  %v5741_v10 = vpack.c.bf16 %v6187_v25, %v6182_v27 }
 0x6c6   : > { %v6190_v50 = vpop.permute.xlu1 %6189  ;;  %v5725_v22 = vpack.c.bf16 %v2781_v56, %v2769_v49  ;;  %v5727_v2 = vpack.c.bf16 %v2780_v37, %v2768_v48  ;;  %v2837_v31 = vpop.permute.xlu0 %2836  ;;  %v3031_v27 = vrot.slane %v3022_v42, %v1426_v16  ;;  %v3027_v15 = vrot.slane %v3022_v42, %v1422_v19 }
 0x6c7   : > { %v6192_v8 = vunpack.i.h.bf16 %v6190_v50  ;;  %v6191_v7 = vunpack.i.l.bf16 %v6190_v50 }
 0x6c8   : > { %5726 = vmatprep.subr.bf16.mxu0 %v5725_v22 }
 0x6c9   : > { %5728 = vmatpush1.bf16.msra.mxu0 %v5727_v2  ;;  %v2793_v29 = vsel %vm2791_vm6, %v6191_v7, %v6192_v8  ;;  %v2792_v54 = vsel %vm2791_vm6, %v2786_v58, %v6191_v7  ;;  %v5745_v35 = vpack.c.bf16 %v6197_v17, %v6192_v8 }
 0x6ca   : > { %v6200_v4 = vpop.permute.xlu1 %6199  ;;  %v5729_v52 = vpack.c.bf16 %v2805_v28, %v2793_v29  ;;  %v5731_v61 = vpack.c.bf16 %v2804_v46, %v2792_v54 }
 0x6cb   : > { %v6202_v26 = vunpack.i.h.bf16 %v6200_v4  ;;  %v6201_v0 = vunpack.i.l.bf16 %v6200_v4 }
 0x6cc   : > { %5730 = vmatprep.subr.bf16.mxu0 %v5729_v52 }
 0x6cd   : > { %v2815_v21 = vsel %vm906_vm4, %v2810_v63, %v6201_v0  ;;  %5732 = vmatpush1.bf16.msra.mxu0 %v5731_v61  ;;  %v2816_v60 = vsel %vm906_vm4, %v6201_v0, %v6202_v26  ;;  %v5749_v13 = vpack.c.bf16 %v6207_v41, %v6202_v26  ;;  %vm3046_vm4 = vcmask 244736  }
 0x6ce   : > { %v2835_v40 = vpop.permute.xlu1 %2834  ;;  %v5733_v20 = vpack.c.bf16 %v2828_v47, %v2816_v60  ;;  %v5735_v62 = vpack.c.bf16 %v2827_v39, %v2815_v21  ;;  %v3075_v61 = vstv %s4808_s6  ;;  %v3072_v26 = vstv %s4807_s27  ;;  %s6553_s27 = smov 123   ;;  %s9249_s6 = sld [smem:[#allocation11_spill]] }
 0x6cf   : > { %v2840_v1 = vsel %vm2838_vm1, %v2835_v40, %v2837_v31  ;;  %v3080_v21 = vstv %s4809_s7  ;;  %s6554_s7 = smov 119  }
 0x6d0   : > { %5734 = vmatprep.subr.bf16.mxu0 %v5733_v20 }
 0x6d1   : > { %5736 = vmatpush1.bf16.msra.mxu0 %v5735_v62 }
 0x6d2   : > { %v2833_v59 = vpop.permute.xlu1 %2832  ;;  %2880 = vmatprep.subr.mxu0 %v2840_v1 }
 0x6d3   : > { %v2839_v38 = vsel %vm2838_vm1, %v2833_v59, %v2835_v40 }
 0x6d5   : > { %2881 = vmatpush1.msra.mxu0 %v2839_v38 }
 0x6d6   : > { %4810 = vmatmul.mubr.msk.f32.vlgmr.msra.gmra.mrb[16].mxu0 %vm1049_vm8, %v2844_v23  ;;  %5738 = vmatprep.subr.bf16.mxu0 %v5737_v55 }
 0x6d7   : > { %5740 = vmatpush3.bf16.msra.mxu0 %v5737_v55  ;;  %2934 = vmatprep.mubr.f32.mxu0 %v6532_v12  ;;  %v2851_v44 = vpop.permute.xlu0 %2850 }
 0x6d8   : > { %5742 = vmatprep.subr.bf16.mxu0 %v5741_v10 }
 0x6da   : > { %4811 = vmatmul.mubr.msk.f32.gmra.mrb[18].mxu0 %vm1049_vm8, %v2845_v30 }
 0x6db   : > { %5744 = vmatpush3.bf16.msra.mxu0 %v5741_v10  ;;  %5189 = vmatprep.mubr.msk.f32.mxu0 %vm1049_vm8, %v2844_v23 }
 0x6dc   : > { %5746 = vmatprep.subr.bf16.mxu0 %v5745_v35 }
 0x6df   : > { %5748 = vmatpush3.bf16.msra.mxu0 %v5745_v35 }
 0x6e0   : > { %5750 = vmatprep.subr.bf16.mxu0 %v5749_v13 }
 0x6e3   : > { %5752 = vmatpush3.bf16.msra.mxu0 %v5749_v13  ;;  %v2856_v33 = vpop.permute.xlu1 %2855 }
 0x6e4   : > { %5187 = vmatprep.subr.mxu0 %v2837_v31 }
 0x6e7   : > { %5188 = vmatpush3.msra.mxu0 %v2837_v31 }
 0x6e8   : > { %5190 = vmatmul.mubr.msk.f32.vlgmr.msra.gmra.mrb[20].mxu0 %vm1049_vm8, %v2845_v30  ;;  %vm3444_vm8 = vcmask 130048  }
 0x7a9   : > { %v2930_v12 = vpop.f32.mrb[16].mxu0 }
 0x7aa   : > { %v2932_v58 = vpop.f32.mrb[17].mxu0  ;;  %v8596_v25 = vadd.f32 %v2930_v12, %v2851_v44 }
 0x7ab   : > { %v8598_v3 = vadd.f32 %v2932_v58, %v2851_v44 }
 0x7ac   : > { %v3016_v34 = vmax.f32 %v8596_v25, 0.0 }
 0x7ad   : > { %v2936_v53 = vpop.f32.mrb[18].mxu0  ;;  %v3017_v6 = vmax.f32 %v8598_v3, 0.0  ;;  %v3197_v3 = vld [vmem:[%s9175_s11 + $0x80] sm:$0xff] }
 0x7ae   : > { %v2938_v63 = vpop.f32.mrb[19].mxu0  ;;  %v8592_v43 = vadd.f32 %v2936_v53, %v2856_v33  ;;  %v3039_v19 = vmul.f32 %v3027_v15, %v3016_v34 }
 0x7af   : > { %v8594_v18 = vadd.f32 %v2938_v63, %v2856_v33  ;;  %v3040_v16 = vmul.f32 %v3031_v27, %v3017_v6 }
 0x7b0   : > { %v3019_v36 = vmax.f32 %v8592_v43, 0.0  ;;  %v3198_v43 = vld [vmem:[%s9175_s11 + $0x88] sm:$0xff] }
 0x7b1   : > { %v3020_v45 = vmax.f32 %v8594_v18, 0.0  ;;  %v3045_v7 = vadd.f32 %v3040_v16, %v3039_v19  ;;  %v3181_v18 = vld [vmem:[%s9175_s11] sm:$0xff] }
 0x7b2   : > { %v3042_v48 = vmul.f32 %v3027_v15, %v3019_v36 }
 0x7b3   : > { %v3043_v49 = vmul.f32 %v3031_v27, %v3020_v45 }
 0x7b5   : > { %v3051_v2 = vadd.f32 %v3043_v49, %v3042_v48 }
 0x7bb   : > { %v5191_v17 = vpop.f32.mrb[20].mxu0 }
 0x7bc   : > { %v8611_v51 = vadd.f32 %v5191_v17, %v2856_v33  ;;  %v3007_v37 = vpop.f32.mrb[21].mxu0 }
 0x7bd   : > { %v3008_v56 = vadd.f32 %v3007_v37, %v2851_v44 }
 0x7be   : > { %v3021_v50 = vmax.f32 %v8611_v51, 0.0  ;;  %v3202_v51 = vld [vmem:[%s9175_s11 + $0xa8] sm:$0xff] }
 0x7bf   : > { %v3018_v22 = vmax.f32 %v3008_v56, 0.0 }
 0x7c0   : > { %v3044_v9 = vmul.f32 %v3035_v5, %v3021_v50 }
 0x7c1   : > { %v3041_v32 = vmul.f32 %v3035_v5, %v3018_v22 }
 0x7c2   : > { %v3052_v8 = vsel %vm3046_vm4, %v3044_v9, 0.0  ;;  %v3184_v9 = vld [vmem:[%s9175_s11 + $0x18] sm:$0xff] }
 0x7c3   : > { %v3053_v28 = vadd.f32 %v3052_v8, %v3051_v2  ;;  %v3047_v46 = vsel %vm3046_vm4, %v3041_v32, 0.0  ;;  %v3201_v32 = vld [vmem:[%s9175_s11 + $0xa0] sm:$0xff] }
 0x7c4   : > { %v3048_v41 = vadd.f32 %v3047_v46, %v3045_v7  ;;  %v5761_v8 = vpack.c.bf16 %v3202_v51, %v3201_v32  ;;  %v3185_v7 = vld [vmem:[%s9175_s11 + $0x20] sm:$0xff]  ;;  %v3203_v46 = vld [vmem:[%s9175_s11 + $0xb0] sm:$0xff] }
 0x7c5   : > { %3054 = vadd.xlane.f32.xlu0 %v3053_v28  ;;  %v3186_v28 = vld [vmem:[%s9175_s11 + $0x28] sm:$0xff] }
 0x7c6   : > { %3049 = vadd.xlane.f32.xlu1 %v3048_v41  ;;  %v3204_v41 = vld [vmem:[%s9175_s11 + $0xb8] sm:$0xff] }
 0x852   : > { %v3055_v57 = vpop.xlane.xlu0 %3054 }
 0x853   : > { %v3057_v29 = vmul.f32 0.00390625, %v3055_v57  ;;  %v3050_v54 = vpop.xlane.xlu1 %3049  ;;  %v5763_v57 = vpack.c.bf16 %v3186_v28, %v3185_v7 }
 0x854   : > { %v3056_v11 = vmul.f32 0.00390625, %v3050_v54  ;;  %v3187_v54 = vld [vmem:[%s9175_s11 + $0x30] sm:$0xff] }
 0x855   : > { %v3061_v4 = vrot.slane %v3057_v29, 7  ;;  %v3067_v52 = vrot.slane %v3057_v29, 1  ;;  %v3077_v62 = vmul.f32 %v3075_v61, %v3057_v29  ;;  %v5765_v29 = vpack.c.bf16 %v3204_v41, %v3203_v46 }
 0x856   : > { %v3060_v0 = vrot.slane %v3056_v11, 7  ;;  %v3066_v39 = vrot.slane %v3056_v11, 1  ;;  %v3076_v59 = vmul.f32 %v3075_v61, %v3056_v11  ;;  %v3188_v11 = vld [vmem:[%s9175_s11 + $0x38] sm:$0xff] }
 0x857   : > { %v3071_v60 = vsel %vm1494_vm12, %v3067_v52, 0.0  ;;  %v5767_v61 = vpack.c.bf16 %v3188_v11, %v3187_v54 }
 0x858   : > { %v3062_v47 = vsel %vm1490_vm11, %v3060_v0, %v3061_v4  ;;  %v3065_v40 = vsel %vm1490_vm11, 0.0, %v3060_v0  ;;  %v3068_v20 = vsel %vm1494_vm12, %v3066_v39, %v3067_v52  ;;  %v3082_v38 = vmul.f32 %v3080_v21, %v3071_v60  ;;  %v3205_v4 = vld [vmem:[%s9175_s11 + $0xc0] sm:$0xff]  ;;  %v3206_v52 = vld [vmem:[%s9175_s11 + $0xc8] sm:$0xff]  ;;  %v3207_v60 = vld [vmem:[%s9175_s11 + $0xd0] sm:$0xff] }
 0x859   : > { %v3073_v31 = vmul.f32 %v3072_v26, %v3065_v40  ;;  %v3074_v1 = vmul.f32 %v3072_v26, %v3062_v47  ;;  %v3081_v10 = vmul.f32 %v3080_v21, %v3068_v20  ;;  %v5769_v26 = vpack.c.bf16 %v3206_v52, %v3205_v4  ;;  %v3189_v0 = vld [vmem:[%s9175_s11 + $0x40] sm:$0xff]  ;;  %v3190_v39 = vld [vmem:[%s9175_s11 + $0x48] sm:$0xff]  ;;  %v3208_v47 = vld [vmem:[%s9175_s11 + $0xd8] sm:$0xff] }
 0x85a   : > { %v5771_v21 = vpack.c.bf16 %v3190_v39, %v3189_v0  ;;  %v5773_v40 = vpack.c.bf16 %v3208_v47, %v3207_v60  ;;  %v3191_v20 = vld [vmem:[%s9175_s11 + $0x50] sm:$0xff] }
 0x85b   : > { %v3078_v23 = vadd.f32 %v3076_v59, %v3073_v31  ;;  %v3079_v55 = vadd.f32 %v3077_v62, %v3074_v1  ;;  %v3192_v62 = vld [vmem:[%s9175_s11 + $0x58] sm:$0xff]  ;;  %v3209_v1 = vld [vmem:[%s9175_s11 + $0xe0] sm:$0xff]  ;;  %v3210_v59 = vld [vmem:[%s9175_s11 + $0xe8] sm:$0xff] }
 0x85c   : > { %v5775_v31 = vpack.c.bf16 %v3192_v62, %v3191_v20 }
 0x85d   : > { %v3083_v30 = vadd.f32 %v3081_v10, %v3078_v23  ;;  %v3084_v35 = vadd.f32 %v3082_v38, %v3079_v55  ;;  %v5777_v38 = vpack.c.bf16 %v3210_v59, %v3209_v1  ;;  %v3193_v23 = vld [vmem:[%s9175_s11 + $0x60] sm:$0xff]  ;;  %v3194_v55 = vld [vmem:[%s9175_s11 + $0x68] sm:$0xff] }
 0x85e   : > { %v5779_v10 = vpack.c.bf16 %v3194_v55, %v3193_v23  ;;  %v3432_v23 = vld [vmem:[%s9177_s13] sm:$0xff]  ;;  %v3429_v55 = vld [vmem:[%s9176_s12 + $0x8] sm:$0xff] }
 0x85f   : > { %v4814_v13 = vmul.f32 -1.442695, %v3083_v30  ;;  %v4815_v12 = vmul.f32 -1.442695, %v3084_v35  ;;  %v3211_v30 = vld [vmem:[%s9175_s11 + $0xf0] sm:$0xff]  ;;  %v3212_v35 = vld [vmem:[%s9175_s11 + $0xf8] sm:$0xff] }
 0x861   : > { %6393 = vpow2.f32 %v4814_v13  ;;  %v5781_v13 = vpack.c.bf16 %v3212_v35, %v3211_v30 }
 0x862   : > { %6395 = vpow2.f32 %v4815_v12  ;;  %v3195_v12 = vld [vmem:[%s9175_s11 + $0x70] sm:$0xff] }
 0x86b   : > { %v6394_v58 = vpop.eup %6393 }
 0x86c   : > { %v6396_v53 = vpop.eup %6395  ;;  %v3091_v63 = vadd.f32 1.0, %v6394_v58  ;;  %v3196_v58 = vld [vmem:[%s9175_s11 + $0x78] sm:$0xff] }
 0x86d   : > { %v3092_v44 = vadd.f32 1.0, %v6396_v53  ;;  %v5783_v53 = vpack.c.bf16 %v3196_v58, %v3195_v12 }
 0x86e   : > { %6397 = vrcp.f32 %v3091_v63 }
 0x86f   : > { %6399 = vrcp.f32 %v3092_v44 }
 0x878   : > { %v6398_v33 = vpop.eup %6397 }
 0x879   : > { %v6400_v42 = vpop.eup %6399  ;;  %3099 = vperm.xlu0 %6208, %v6398_v33  }
 0x87a   : > { %3104 = vperm.xlu1 %6137, %v6400_v42  }
 0x8f8   : > { %v3100_v27 = vpop.permute.xlu0 %3099 }
 0x8f9   : > { %v8632_v15 = vmul.f32 %v3100_v27, %v3016_v34  ;;  %v8636_v17 = vmul.f32 %v3100_v27, %v3017_v6  ;;  %v8638_v5 = vmul.f32 %v3100_v27, %v3018_v22  ;;  %v3105_v37 = vpop.permute.xlu1 %3104  ;;  %v3199_v34 = vld [vmem:[%s9175_s11 + $0x90] sm:$0xff]  ;;  %v3200_v6 = vld [vmem:[%s9175_s11 + $0x98] sm:$0xff] }
 0x8fa   : > { %v8642_v48 = vmul.f32 %v3105_v37, %v3019_v36  ;;  %v8646_v49 = vmul.f32 %v3105_v37, %v3020_v45  ;;  %v5753_v36 = vpack.c.bf16 %v3198_v43, %v3197_v3  ;;  %v3182_v45 = vld [vmem:[%s9175_s11 + $0x8] sm:$0xff]  ;;  %v8672_v56 = vmul.f32 %v3105_v37, %v3021_v50  ;;  %v3183_v22 = vld [vmem:[%s9175_s11 + $0x10] sm:$0xff]  ;;  %v3213_v37 = vld [vmem:[%s9175_s11 + $0x100] sm:$0xff] }
 0x8fb   : > { %3123 = vrot.lane.b32.xlu0 %v8638_v5, %s9241_s29  ;;  %v6209_v25 = vpack.i.bf16 %v8632_v15, %v8636_v17  ;;  %v5755_v16 = vpack.c.bf16 %v3182_v45, %v3181_v18  ;;  %v5757_v19 = vpack.c.bf16 %v3200_v6, %v3199_v34  ;;  %v5759_v2 = vpack.c.bf16 %v3184_v9, %v3183_v22 }
 0x8fc   : > { %5754 = vmatprep.subr.bf16.mxu0 %v5753_v36  ;;  %v6214_v50 = vpack.i.bf16 %v8642_v48, %v8646_v49 }
 0x8fd   : > { %6210 = vrot.lane.b32.xlu1 %v6209_v25, %s9241_s29  ;;  %5756 = vmatpush3.bf16.msra.mxu0 %v5755_v16  ;;  %v3214_v25 = vld [vmem:[%s9175_s11 + $0x108] sm:$0x7] }
 0x8fe   : > { %5758 = vmatprep.subr.bf16.mxu0 %v5757_v19  ;;  %v5785_v43 = vpack.c.bf16 %v3214_v25, %v3213_v37 }
 0x8ff   : > { %3129 = vrot.lane.b32.xlu0 %v8672_v56, %s9241_s29 }
 0x901   : > { %6215 = vrot.lane.b32.xlu1 %v6214_v50, %s9241_s29  ;;  %5760 = vmatpush3.bf16.msra.mxu0 %v5759_v2 }
 0x902   : > { %5762 = vmatprep.subr.bf16.mxu0 %v5761_v8 }
 0x905   : > { %5764 = vmatpush3.bf16.msra.mxu0 %v5763_v57 }
 0x906   : > { %5766 = vmatprep.subr.bf16.mxu0 %v5765_v29 }
 0x909   : > { %5768 = vmatpush3.bf16.msra.mxu0 %v5767_v61 }
 0x90a   : > { %5770 = vmatprep.subr.bf16.mxu0 %v5769_v26 }
 0x90d   : > { %5772 = vmatpush3.bf16.msra.mxu0 %v5771_v21 }
 0x90e   : > { %5774 = vmatprep.subr.bf16.mxu0 %v5773_v40 }
 0x911   : > { %5776 = vmatpush3.bf16.msra.mxu0 %v5775_v31 }
 0x912   : > { %5778 = vmatprep.subr.bf16.mxu0 %v5777_v38  ;;  %v3433_v38 = vld [vmem:[%s9177_s13 + $0x8] sm:$0xff] }
 0x915   : > { %5780 = vmatpush3.bf16.msra.mxu0 %v5779_v10 }
 0x916   : > { %5782 = vmatprep.subr.bf16.mxu0 %v5781_v13 }
 0x919   : > { %5784 = vmatpush3.bf16.msra.mxu0 %v5783_v53 }
 0x91a   : > { %5787 = vmatprep.subr.msk.bf16.mxu0 %vm8426_vm15, %v5785_v43 }
 0x96d   : > { %v3124_v63 = vpop.permute.xlu0 %3123 }
 0x96e   : > { %v3143_v44 = vmax.f32 %v8638_v5, %v3124_v63 }
 0x96f   : > { %v6211_v33 = vpop.permute.xlu1 %6210 }
 0x970   : > { %v6213_v42 = vunpack.i.h.bf16 %v6211_v33  ;;  %v6212_v27 = vunpack.i.l.bf16 %v6211_v33  ;;  %3157 = vrot.lane.b32.xlu0 %v3143_v44, %s6538_s0 }
 0x971   : > { %v3130_v3 = vpop.permute.xlu0 %3129 }
 0x972   : > { %v3131_v18 = vsel %vm762_vm0, %v6213_v42, %v6212_v27  ;;  %v3132_v5 = vsel %vm762_vm0, %v6212_v27, %v3124_v63  ;;  %v3146_v36 = vmax.f32 %v8672_v56, %v3130_v3 }
 0x973   : > { %v3141_v45 = vmax.f32 %v8632_v15, %v3131_v18  ;;  %v3142_v34 = vmax.f32 %v8636_v17, %v3132_v5  ;;  %v6216_v6 = vpop.permute.xlu1 %6215 }
 0x974   : > { %v6218_v16 = vunpack.i.h.bf16 %v6216_v6  ;;  %v6217_v19 = vunpack.i.l.bf16 %v6216_v6  ;;  %3163 = vrot.lane.b32.xlu0 %v3146_v36, %s6538_s0 }
 0x975   : > { %v6219_v22 = vpack.i.bf16 %v3141_v45, %v3142_v34 }
 0x976   : > { %v3133_v9 = vsel %vm762_vm0, %v6218_v16, %v6217_v19  ;;  %v3134_v32 = vsel %vm762_vm0, %v6217_v19, %v3130_v3  ;;  %vm3215_vm0 = vcmask 89088  }
 0x977   : > { %v3144_v51 = vmax.f32 %v8642_v48, %v3133_v9  ;;  %v3145_v56 = vmax.f32 %v8646_v49, %v3134_v32  ;;  %6220 = vrot.lane.b32.xlu1 %v6219_v22, %s6538_s0 }
 0x979   : > { %v6224_v15 = vpack.i.bf16 %v3144_v51, %v3145_v56 }
 0x97b   : > { %6225 = vrot.lane.b32.xlu1 %v6224_v15, %s6538_s0  ;;  %s6543_s0 = smov 117  }
 0x9e2   : > { %v3158_v17 = vpop.permute.xlu0 %3157 }
 0x9e3   : > { %v3177_v61 = vmax.f32 %v3143_v44, %v3158_v17 }
 0x9e6   : > { %v3164_v54 = vpop.permute.xlu0 %3163 }
 0x9e7   : > { %v3180_v26 = vmax.f32 %v3146_v36, %v3164_v54 }
 0x9e9   : > { %v6221_v50 = vpop.permute.xlu1 %6220 }
 0x9ea   : > { %v6223_v2 = vunpack.i.h.bf16 %v6221_v50  ;;  %v6222_v8 = vunpack.i.l.bf16 %v6221_v50 }
 0x9ec   : > { %v3165_v7 = vsel %vm2779_vm3, %v6223_v2, %v6222_v8  ;;  %v3166_v28 = vsel %vm2779_vm3, %v6222_v8, %v3158_v17  ;;  %v3428_v2 = vld [vmem:[%s9176_s12] sm:$0xff]  ;;  %v3431_v8 = vld [vmem:[%s9176_s12 + $0x18] sm:$0xff] }
 0x9ed   : > { %v3175_v46 = vmax.f32 %v3141_v45, %v3165_v7  ;;  %v6226_v41 = vpop.permute.xlu1 %6225  ;;  %v3176_v57 = vmax.f32 %v3142_v34, %v3166_v28  ;;  %v3430_v7 = vld [vmem:[%s9176_s12 + $0x10] sm:$0xff] }
 0x9ee   : > { %v6228_v29 = vunpack.i.h.bf16 %v6226_v41  ;;  %v6227_v48 = vunpack.i.l.bf16 %v6226_v41 }
 0x9ef   : > { %3289 = vmatprep.mubr.f32.mxu0 %v3176_v57 }
 0x9f0   : > { %3290 = vmatmul.mubr.f32.vlgmr.msra.gmra.mrb[22].mxu0 %v3175_v46  ;;  %v3168_v49 = vsel %vm2779_vm3, %v6227_v48, %v3164_v54  ;;  %v3167_v11 = vsel %vm2779_vm3, %v6228_v29, %v6227_v48  ;;  %v4824_v29 = vld [vmem:[%s9178_s14] ss:$0 sm:$0xff]  ;;  %vm4504_vm3 = vcmask 48128  }
 0x9f1   : > { %5790 = vmatpush3.bf16.msk.msra.mxu0 %vm8426_vm15, %v5785_v43  ;;  %v3179_v4 = vmax.f32 %v3145_v56, %v3168_v49  ;;  %v3178_v52 = vmax.f32 %v3144_v51, %v3167_v11  ;;  %vm5862_vm15 = vmpackc.low %vm1494_vm12, %vm6537_vm14  ;;  %vm4066_vm14 = vcmask 121856  }
 0x9f2   : > { %5791 = vmatprep.subr.bf16.mxu0 %v6535_v24 }
 0x9f3   : > { %3294 = vmatprep.mubr.f32.mxu0 %v3179_v4 }
 0x9f4   : > { %3295 = vmatmul.mubr.f32.gmra.mrb[24].mxu0 %v3178_v52 }
 0x9f5   : > { %5196 = vmatprep.mubr.msk.f32.mxu0 %vm3215_vm0, %v3177_v61 }
 0x9f8   : > { %5197 = vmatmul.mubr.msk.f32.vlgmr.msra.gmra.mrb[26].mxu0 %vm3215_vm0, %v3180_v26 }
 0x9f9   : > { %4822 = vmatprep.mubr.msk.f32.mxu0 %vm3444_vm8, %v3429_v55 }
 0xac3   : > { %v5060_v0 = vpop.f32.mrb[22].mxu0 }
 0xac4   : > { %v5061_v39 = vpop.f32.mrb[23].mxu0 }
 0xac5   : > { %v5062_v21 = vadd.f32 %v5061_v39, %v5060_v0 }
 0xac7   : > { %v5063_v60 = vpop.f32.mrb[24].mxu0 }
 0xac8   : > { %v5064_v47 = vpop.f32.mrb[25].mxu0 }
 0xac9   : > { %v5065_v40 = vadd.f32 %v5064_v47, %v5063_v60  ;;  %v3560_v47 = vstv %s4819_s4  ;;  %s4848_s4 = sld [smem:[#allocation2 + $0x201]] }
 0xacb   : > { %v5198_v20 = vpop.f32.mrb[26].mxu0 }
 0xacc   : > { %v3372_v14 = vadd.f32 %v5198_v20, %v5065_v40  ;;  %v3366_v62 = vpop.f32.mrb[27].mxu0 }
 0xacd   : > { %v3367_v31 = vadd.f32 %v5062_v21, %v3366_v62 }
 0xacf   : > { %v6234_v1 = vpack.i.bf16 %v3372_v14, %v3367_v31  ;;  %v5792_v59 = vpack.c.bf16 %v3372_v14, %v3367_v31  ;;  %v3563_v14 = vstv %s4820_s25  ;;  %s6548_s25 = smov 121  }
 0xad1   : > { %6235 = vrot.lane.b32.xlu0 %v6234_v1, %s9244_s5  ;;  %6230 = vrot.lane.b32.xlu1 %v6234_v1, %s9241_s29 }
 0xad2   : > { %5793 = vmatpush1.bf16.msra.mxu0 %v5792_v59 }
 0xad3   : > { %5794 = vmatprep.subr.bf16.mxu0 %v6535_v24 }
 0xad5   : > { %6245 = vrot.lane.b32.xlu0 %v6234_v1, %s6543_s0  ;;  %6240 = vrot.lane.b32.xlu1 %v6234_v1, %s9211_s24  ;;  %s4821_s0 = sld [smem:[#allocation2 + $0x102]] }
 0xad9   : > { %6255 = vrot.lane.b32.xlu0 %v6234_v1, %s9246_s3  ;;  %6250 = vrot.lane.b32.xlu1 %v6234_v1, %s6545_s23  ;;  %s6550_s3 = smov 120  }
 0xadd   : > { %6265 = vrot.lane.b32.xlu0 %v6234_v1, %s6546_s2  ;;  %6260 = vrot.lane.b32.xlu1 %v6234_v1, %s6547_s28  ;;  %s6551_s2 = smov 114   ;;  %s6552_s28 = smov 115  }
 0xae1   : > { %3441 = vperm.xlu0 %6208, %v3433_v38   ;;  %3436 = vperm.xlu1 %6137, %v3432_v23   ;;  %v3568_v38 = vstv %s4821_s0  ;;  %s6549_s0 = smov 122  }
 0xb43   : > { %v6236_v10 = vpop.permute.xlu0 %6235  ;;  %v6231_v30 = vpop.permute.xlu1 %6230 }
 0xb44   : > { %v6233_v35 = vunpack.i.h.bf16 %v6231_v30  ;;  %v6232_v13 = vunpack.i.l.bf16 %v6231_v30  ;;  %v6238_v12 = vunpack.i.h.bf16 %v6236_v10  ;;  %v6237_v58 = vunpack.i.l.bf16 %v6236_v10 }
 0xb46   : > { %v5795_v53 = vpack.c.bf16 %v6233_v35, %v6232_v13  ;;  %v5798_v44 = vpack.c.bf16 %v6238_v12, %v6237_v58 }
 0xb47   : > { %v6241_v63 = vpop.permute.xlu1 %6240  ;;  %v6246_v27 = vpop.permute.xlu0 %6245 }
 0xb48   : > { %5796 = vmatpush1.bf16.msra.mxu0 %v5795_v53  ;;  %v6243_v33 = vunpack.i.h.bf16 %v6241_v63  ;;  %v6242_v42 = vunpack.i.l.bf16 %v6241_v63  ;;  %v6248_v37 = vunpack.i.h.bf16 %v6246_v27  ;;  %v6247_v25 = vunpack.i.l.bf16 %v6246_v27 }
 0xb49   : > { %5797 = vmatprep.subr.bf16.mxu0 %v6535_v24 }
 0xb4a   : > { %v5801_v3 = vpack.c.bf16 %v6243_v33, %v6242_v42  ;;  %v5804_v18 = vpack.c.bf16 %v6248_v37, %v6247_v25 }
 0xb4b   : > { %v6251_v43 = vpop.permute.xlu1 %6250  ;;  %v6256_v45 = vpop.permute.xlu0 %6255 }
 0xb4c   : > { %5799 = vmatpush1.bf16.msra.mxu0 %v5798_v44  ;;  %v6253_v5 = vunpack.i.h.bf16 %v6251_v43  ;;  %v6252_v36 = vunpack.i.l.bf16 %v6251_v43  ;;  %v6258_v34 = vunpack.i.h.bf16 %v6256_v45  ;;  %v6257_v6 = vunpack.i.l.bf16 %v6256_v45 }
 0xb4d   : > { %5800 = vmatprep.subr.bf16.mxu0 %v6535_v24 }
 0xb4e   : > { %v5807_v16 = vpack.c.bf16 %v6253_v5, %v6252_v36  ;;  %v5810_v22 = vpack.c.bf16 %v6258_v34, %v6257_v6  ;;  %v3617_v34 = vld [vmem:[%s9179_s15] sm:$0xff]  ;;  %v3618_v6 = vld [vmem:[%s9179_s15 + $0x8] sm:$0xff] }
 0xb4f   : > { %v6261_v19 = vpop.permute.xlu1 %6260  ;;  %v6266_v51 = vpop.permute.xlu0 %6265 }
 0xb50   : > { %5802 = vmatpush1.bf16.msra.mxu0 %v5801_v3  ;;  %v6263_v9 = vunpack.i.h.bf16 %v6261_v19  ;;  %v6262_v32 = vunpack.i.l.bf16 %v6261_v19  ;;  %v6268_v56 = vunpack.i.h.bf16 %v6266_v51  ;;  %v6267_v15 = vunpack.i.l.bf16 %v6266_v51  ;;  %v3622_v51 = vld [vmem:[%s9179_s15 + $0x28] sm:$0xff] }
 0xb51   : > { %5803 = vmatprep.subr.bf16.mxu0 %v6535_v24  ;;  %v5818_v19 = vpack.c.bf16 %v3618_v6, %v3617_v34 }
 0xb52   : > { %v5813_v17 = vpack.c.bf16 %v6263_v9, %v6262_v32  ;;  %v5816_v50 = vpack.c.bf16 %v6268_v56, %v6267_v15  ;;  %v3621_v32 = vld [vmem:[%s9179_s15 + $0x20] sm:$0xff] }
 0xb53   : > { %5819 = vmatprep.subr.bf16.mxu1 %v5818_v19  ;;  %v5826_v56 = vpack.c.bf16 %v3622_v51, %v3621_v32  ;;  %v3768_v32 = vld [vmem:[%s9180_s16 + $0x20] sm:$0xff]  ;;  %v3771_v51 = vld [vmem:[%s9180_s16 + $0x38] sm:$0xff] }
 0xb54   : > { %5805 = vmatpush1.bf16.msra.mxu0 %v5804_v18  ;;  %5821 = vmatpush3.bf16.msra.mxu1 %v5818_v19  ;;  %v3764_v19 = vld [vmem:[%s9180_s16] sm:$0xff] }
 0xb55   : > { %5806 = vmatprep.subr.bf16.mxu0 %v6535_v24 }
 0xb58   : > { %5808 = vmatpush1.bf16.msra.mxu0 %v5807_v16  ;;  %v3619_v16 = vld [vmem:[%s9179_s15 + $0x10] sm:$0xff] }
 0xb59   : > { %5809 = vmatprep.subr.bf16.mxu0 %v6535_v24 }
 0xb5c   : > { %5811 = vmatpush1.bf16.msra.mxu0 %v5810_v22  ;;  %v3620_v22 = vld [vmem:[%s9179_s15 + $0x18] sm:$0xff] }
 0xb5d   : > { %5812 = vmatprep.subr.bf16.mxu0 %v6535_v24  ;;  %v5822_v9 = vpack.c.bf16 %v3620_v22, %v3619_v16  ;;  %v3767_v22 = vld [vmem:[%s9180_s16 + $0x18] sm:$0xff] }
 0xb5f   : > { %5823 = vmatprep.subr.bf16.mxu1 %v5822_v9 }
 0xb60   : > { %5814 = vmatpush1.bf16.msra.mxu0 %v5813_v17  ;;  %v3437_v28 = vpop.permute.xlu1 %3436  ;;  %v3442_v54 = vpop.permute.xlu0 %3441  ;;  %v3623_v17 = vld [vmem:[%s9179_s15 + $0x30] sm:$0xff]  ;;  %5825 = vmatpush3.bf16.msra.mxu1 %v5822_v9 }
 0xb61   : > { %5815 = vmatprep.subr.bf16.mxu0 %v6535_v24  ;;  %5827 = vmatprep.subr.bf16.mxu1 %v5826_v56  ;;  %v3766_v9 = vld [vmem:[%s9180_s16 + $0x10] sm:$0xff] }
 0xb64   : > { %5817 = vmatpush1.bf16.msra.mxu0 %v5816_v50  ;;  %v3624_v50 = vld [vmem:[%s9179_s15 + $0x38] sm:$0xff]  ;;  %5829 = vmatpush3.bf16.msra.mxu1 %v5826_v56  ;;  %v3770_v56 = vld [vmem:[%s9180_s16 + $0x30] sm:$0xff] }
 0xb65   : > { %5834 = vmatprep.subr.bf16.mxu0 %v6535_v24 }
 0xb67   : > { %3516 = vmatmul.mubr.f32.vlgmr.msra.gmra.mrb[28].mxu0 %v3428_v2 }
 0xb68   : > { %4823 = vmatprep.mubr.msk.f32.mxu0 %vm3444_vm8, %v3431_v8 }
 0xb6b   : > { %3521 = vmatmul.mubr.f32.gmra.mrb[30].mxu0 %v3430_v7 }
 0xc3a   : > { %v3517_v46 = vpop.f32.mrb[28].mxu0 }
 0xc3b   : > { %v8821_v41 = vadd.f32 %v3517_v46, %v3437_v28  ;;  %v3519_v57 = vpop.f32.mrb[29].mxu0  ;;  %v5830_v28 = vpack.c.bf16 %v3624_v50, %v3623_v17  ;;  %v3625_v46 = vld [vmem:[%s9179_s15 + $0x40] sm:$0x7] }
 0xc3d   : > { %v3526_v48 = vmax.f32 %v8821_v41, 0.0  ;;  %5831 = vmatprep.subr.bf16.mxu1 %v5830_v28 }
 0xc3e   : > { %v3522_v49 = vpop.f32.mrb[30].mxu0  ;;  %5833 = vmatpush3.bf16.msra.mxu1 %v5830_v28 }
 0xc3f   : > { %v3535_v11 = vmul.f32 %v4824_v29, %v3526_v48  ;;  %v8829_v4 = vadd.f32 %v3522_v49, %v3442_v54  ;;  %v3524_v52 = vpop.f32.mrb[31].mxu0  ;;  %5215 = vmatprep.subr.msk.mxu1 %vm2030_vm13, %v3625_v46 }
 0xc41   : > { %v3527_v61 = vmax.f32 %v8829_v4, 0.0  ;;  %v3538_v26 = vsel %vm3537_vm9, %v3535_v11, 0.0 }
 0xc42   : > { %3539 = vadd.xlane.f32.xlu1 %v3538_v26  ;;  %5216 = vmatpush3.msk.msra.mxu1 %vm2030_vm13, %v3625_v46  ;;  %vm3908_vm13 = vcmask 179200  }
 0xc43   : > { %v3536_v0 = vmul.f32 %v4824_v29, %v3527_v61 }
 0xc45   : > { %v3541_v39 = vsel %vm3537_vm9, %v3536_v0, 0.0 }
 0xc46   : > { %3542 = vadd.xlane.f32.xlu0 %v3541_v39  ;;  %v3773_v39 = vld [vmem:[%s9181_s17 + $0x8] sm:$0xff] }
 0xccf   : > { %v3540_v21 = vpop.xlane.xlu1 %3539 }
 0xcd0   : > { %v3544_v60 = vmul.f32 0.015625, %v3540_v21  ;;  %v3772_v21 = vld [vmem:[%s9181_s17] sm:$0xff] }
 0xcd2   : > { %v3548_v40 = vrot.slane %v3544_v60, 7  ;;  %v3554_v59 = vrot.slane %v3544_v60, 1  ;;  %v3564_v10 = vmul.f32 %v3563_v14, %v3544_v60  ;;  %v3775_v60 = vld [vmem:[%s9181_s17 + $0x18] sm:$0xff] }
 0xcd3   : > { %v3543_v20 = vpop.xlane.xlu0 %3542 }
 0xcd4   : > { %v3553_v62 = vsel %vm1490_vm11, 0.0, %v3548_v40  ;;  %v3545_v31 = vmul.f32 0.015625, %v3543_v20 }
 0xcd5   : > { %v3561_v1 = vmul.f32 %v3560_v47, %v3553_v62 }
 0xcd6   : > { %v3549_v23 = vrot.slane %v3545_v31, 7  ;;  %v3555_v55 = vrot.slane %v3545_v31, 1  ;;  %v3565_v53 = vmul.f32 %v3563_v14, %v3545_v31 }
 0xcd7   : > { %v3566_v12 = vadd.f32 %v3564_v10, %v3561_v1 }
 0xcd8   : > { %v3550_v30 = vsel %vm1490_vm11, %v3548_v40, %v3549_v23  ;;  %v3556_v35 = vsel %vm1494_vm12, %v3554_v59, %v3555_v55  ;;  %v3559_v13 = vsel %vm1494_vm12, %v3555_v55, 0.0  ;;  %v3765_v40 = vld [vmem:[%s9180_s16 + $0x8] sm:$0xff] }
 0xcd9   : > { %v3562_v58 = vmul.f32 %v3560_v47, %v3550_v30  ;;  %v3569_v63 = vmul.f32 %v3568_v38, %v3556_v35  ;;  %v3570_v33 = vmul.f32 %v3568_v38, %v3559_v13  ;;  %v3774_v47 = vld [vmem:[%s9181_s17 + $0x10] sm:$0xff]  ;;  %4833 = vmatprep.mubr.msk.f32.mxu0 %vm3444_vm8, %v3765_v40 }
 0xcdb   : > { %v3567_v44 = vadd.f32 %v3565_v53, %v3562_v58  ;;  %v3571_v42 = vadd.f32 %v3569_v63, %v3566_v12 }
 0xcdd   : > { %v3572_v27 = vadd.f32 %v3570_v33, %v3567_v44  ;;  %v4825_v37 = vmul.f32 -1.442695, %v3571_v42 }
 0xcdf   : > { %6401 = vpow2.f32 %v4825_v37  ;;  %v4826_v25 = vmul.f32 -1.442695, %v3572_v27 }
 0xce1   : > { %6403 = vpow2.f32 %v4826_v25 }
 0xce9   : > { %v6402_v3 = vpop.eup %6401 }
 0xcea   : > { %v3579_v43 = vadd.f32 1.0, %v6402_v3 }
 0xceb   : > { %v6404_v18 = vpop.eup %6403 }
 0xcec   : > { %v3580_v5 = vadd.f32 1.0, %v6404_v18  ;;  %6405 = vrcp.f32 %v3579_v43 }
 0xcee   : > { %6407 = vrcp.f32 %v3580_v5 }
 0xcf6   : > { %v6406_v36 = vpop.eup %6405 }
 0xcf7   : > { %3587 = vperm.xlu0 %6208, %v6406_v36  }
 0xcf8   : > { %v6408_v45 = vpop.eup %6407 }
 0xcf9   : > { %3592 = vperm.xlu1 %6137, %v6408_v45  }
 0xd76   : > { %v3588_v15 = vpop.permute.xlu0 %3587 }
 0xd77   : > { %v3595_v2 = vmul.f32 %v3588_v15, %v3526_v48 }
 0xd78   : > { %v3593_v8 = vpop.permute.xlu1 %3592 }
 0xd79   : > { %v3596_v7 = vmul.f32 %v3593_v8, %v3527_v61  ;;  %3599 = vrot.lane.b32.xlu1 %v3595_v2, %s9241_s29  ;;  %v4837_v8 = vld [vmem:[%s9182_s18] ss:$0 sm:$0xff] }
 0xd7b   : > { %3601 = vrot.lane.b32.xlu0 %v3596_v7, %s9241_s29 }
 0xdeb   : > { %v3600_v41 = vpop.permute.xlu1 %3599 }
 0xdec   : > { %v3605_v57 = vmax.f32 %v3595_v2, %v3600_v41 }
 0xded   : > { %v3602_v29 = vpop.permute.xlu0 %3601 }
 0xdee   : > { %v3606_v48 = vmax.f32 %v3596_v7, %v3602_v29  ;;  %3609 = vrot.lane.b32.xlu1 %v3605_v57, %s9211_s24 }
 0xdf0   : > { %3611 = vrot.lane.b32.xlu0 %v3606_v48, %s9211_s24 }
 0xe60   : > { %v3610_v54 = vpop.permute.xlu1 %3609 }
 0xe61   : > { %v3615_v49 = vmax.f32 %v3605_v57, %v3610_v54 }
 0xe62   : > { %v3612_v11 = vpop.permute.xlu0 %3611 }
 0xe63   : > { %v3616_v4 = vmax.f32 %v3606_v48, %v3612_v11  ;;  %5217 = vmatprep.mubr.msk.f32.mxu1 %vm3626_vm10, %v3615_v49 }
 0xe65   : > { %5218 = vmatmul.mubr.msk.f32.vlgmr.msra.gmra.mrb[6].mxu1 %vm3626_vm10, %v3616_v4 }
 0xf38   : > { %v5219_v52 = vpop.f32.mrb[6].mxu1 }
 0xf39   : > { %v3702_v61 = vpop.f32.mrb[7].mxu1 }
 0xf3a   : > { %v6274_v26 = vpack.i.bf16 %v5219_v52, %v3702_v61  ;;  %v5835_v0 = vpack.c.bf16 %v5219_v52, %v3702_v61 }
 0xf3c   : > { %6275 = vrot.lane.b32.xlu0 %v6274_v26, %s9244_s5  ;;  %6270 = vrot.lane.b32.xlu1 %v6274_v26, %s9241_s29 }
 0xf3d   : > { %5836 = vmatpush1.bf16.msra.mxu0 %v5835_v0 }
 0xf3e   : > { %5837 = vmatprep.subr.bf16.mxu0 %v6535_v24 }
 0xf40   : > { %6285 = vrot.lane.b32.xlu0 %v6274_v26, %s6548_s25  ;;  %6280 = vrot.lane.b32.xlu1 %v6274_v26, %s6549_s0  ;;  %s4830_s25 = sld [smem:[#allocation2 + $0x180]] }
 0xf44   : > { %6295 = vrot.lane.b32.xlu0 %v6274_v26, %s6545_s23  ;;  %6290 = vrot.lane.b32.xlu1 %v6274_v26, %s6550_s3  ;;  %s4831_s23 = sld [smem:[#allocation2 + $0x181]] }
 0xf48   : > { %6305 = vrot.lane.b32.xlu0 %v6274_v26, %s6551_s2  ;;  %6300 = vrot.lane.b32.xlu1 %v6274_v26, %s6552_s28  ;;  %s4832_s2 = sld [smem:[#allocation2 + $0x182]] }
 0xf4c   : > { %3783 = vperm.xlu0 %6208, %v3773_v39   ;;  %3778 = vperm.xlu1 %6137, %v3772_v21  }
 0xf50   : > { %3793 = vperm.xlu0 %6208, %v3775_v60   ;;  %3788 = vperm.xlu1 %6137, %v3774_v47  }
 0xfae   : > { %v6276_v20 = vpop.permute.xlu0 %6275  ;;  %v6271_v14 = vpop.permute.xlu1 %6270 }
 0xfaf   : > { %v6273_v62 = vunpack.i.h.bf16 %v6271_v14  ;;  %v6272_v31 = vunpack.i.l.bf16 %v6271_v14  ;;  %v6278_v1 = vunpack.i.h.bf16 %v6276_v20  ;;  %v6277_v59 = vunpack.i.l.bf16 %v6276_v20 }
 0xfb1   : > { %v5838_v38 = vpack.c.bf16 %v6273_v62, %v6272_v31  ;;  %v5841_v55 = vpack.c.bf16 %v6278_v1, %v6277_v59 }
 0xfb2   : > { %v6281_v23 = vpop.permute.xlu1 %6280  ;;  %v6286_v35 = vpop.permute.xlu0 %6285 }
 0xfb3   : > { %5839 = vmatpush1.bf16.msra.mxu0 %v5838_v38  ;;  %v6283_v10 = vunpack.i.h.bf16 %v6281_v23  ;;  %v6282_v30 = vunpack.i.l.bf16 %v6281_v23  ;;  %v6288_v13 = vunpack.i.h.bf16 %v6286_v35  ;;  %v6287_v12 = vunpack.i.l.bf16 %v6286_v35 }
 0xfb4   : > { %5840 = vmatprep.subr.bf16.mxu0 %v6535_v24  ;;  %v3953_v38 = vstv %s4830_s25  ;;  %s4849_s25 = sld [smem:[#allocation2 + $0x202]] }
 0xfb5   : > { %v5844_v58 = vpack.c.bf16 %v6283_v10, %v6282_v30  ;;  %v5847_v63 = vpack.c.bf16 %v6288_v13, %v6287_v12  ;;  %v3958_v10 = vstv %s4831_s23  ;;  %s6555_s23 = smov 124  }
 0xfb6   : > { %v6291_v53 = vpop.permute.xlu1 %6290  ;;  %v6296_v42 = vpop.permute.xlu0 %6295 }
 0xfb7   : > { %5842 = vmatpush1.bf16.msra.mxu0 %v5841_v55  ;;  %v6293_v44 = vunpack.i.h.bf16 %v6291_v53  ;;  %v6292_v33 = vunpack.i.l.bf16 %v6291_v53  ;;  %v6298_v27 = vunpack.i.h.bf16 %v6296_v42  ;;  %v6297_v37 = vunpack.i.l.bf16 %v6296_v42 }
 0xfb8   : > { %5843 = vmatprep.subr.bf16.mxu0 %v6535_v24 }
 0xfb9   : > { %v5850_v25 = vpack.c.bf16 %v6293_v44, %v6292_v33  ;;  %v5853_v43 = vpack.c.bf16 %v6298_v27, %v6297_v37 }
 0xfba   : > { %v6301_v3 = vpop.permute.xlu1 %6300  ;;  %v6306_v36 = vpop.permute.xlu0 %6305 }
 0xfbb   : > { %5845 = vmatpush1.bf16.msra.mxu0 %v5844_v58  ;;  %v6303_v18 = vunpack.i.h.bf16 %v6301_v3  ;;  %v6302_v5 = vunpack.i.l.bf16 %v6301_v3  ;;  %v6308_v45 = vunpack.i.h.bf16 %v6306_v36  ;;  %v6307_v34 = vunpack.i.l.bf16 %v6306_v36 }
 0xfbc   : > { %5846 = vmatprep.subr.bf16.mxu0 %v6535_v24  ;;  %v3967_v58 = vstv %s4832_s2 }
 0xfbd   : > { %v5856_v6 = vpack.c.bf16 %v6303_v18, %v6302_v5  ;;  %v5859_v16 = vpack.c.bf16 %v6308_v45, %v6307_v34 }
 0xfbf   : > { %5848 = vmatpush1.bf16.msra.mxu0 %v5847_v63 }
 0xfc0   : > { %5849 = vmatprep.subr.bf16.mxu0 %v6535_v24 }
 0xfc3   : > { %5851 = vmatpush1.bf16.msra.mxu0 %v5850_v25 }
 0xfc4   : > { %5852 = vmatprep.subr.bf16.mxu0 %v6535_v24 }
 0xfc7   : > { %5854 = vmatpush1.bf16.msra.mxu0 %v5853_v43 }
 0xfc8   : > { %5855 = vmatprep.subr.bf16.mxu0 %v6535_v24 }
 0xfcb   : > { %5857 = vmatpush1.bf16.msra.mxu0 %v5856_v6  ;;  %v3779_v15 = vpop.permute.xlu1 %3778  ;;  %v3784_v28 = vpop.permute.xlu0 %3783 }
 0xfcc   : > { %5858 = vmatprep.subr.bf16.mxu0 %v6535_v24  ;;  %v3769_v24 = vld [vmem:[%s9180_s16 + $0x28] sm:$0xff] }
 0xfcf   : > { %5860 = vmatpush1.bf16.msra.mxu0 %v5859_v16  ;;  %v3789_v49 = vpop.permute.xlu1 %3788  ;;  %v3794_v39 = vpop.permute.xlu0 %3793 }
 0xfd2   : > { %3873 = vmatmul.mubr.f32.vlgmr.msra.gmra.mrb[32].mxu0 %v3764_v19 }
 0xfd3   : > { %4834 = vmatprep.mubr.msk.f32.mxu0 %vm3444_vm8, %v3767_v22 }
 0xfd6   : > { %3878 = vmatmul.mubr.f32.gmra.mrb[34].mxu0 %v3766_v9 }
 0xfd7   : > { %4835 = vmatprep.mubr.msk.f32.mxu0 %vm3444_vm8, %v3769_v24 }
 0xfda   : > { %3883 = vmatmul.mubr.f32.gmra.mrb[36].mxu0 %v3768_v32 }
 0xfdb   : > { %4836 = vmatprep.mubr.msk.f32.mxu0 %vm3444_vm8, %v3771_v51 }
 0xfde   : > { %3888 = vmatmul.mubr.f32.gmra.mrb[38].mxu0 %v3770_v56 }
0x10a5   : > { %v3874_v17 = vpop.f32.mrb[32].mxu0 }
0x10a6   : > { %v8928_v50 = vadd.f32 %v3874_v17, %v3779_v15  ;;  %v3876_v2 = vpop.f32.mrb[33].mxu0 }
0x10a8   : > { %v3893_v7 = vmax.f32 %v8928_v50, 0.0  ;;  %v4064_v50 = vld [vmem:[%s9183_s19] sm:$0xff] }
0x10a9   : > { %v3879_v46 = vpop.f32.mrb[34].mxu0 }
0x10aa   : > { %v3904_v41 = vmul.f32 %v4837_v8, %v3893_v7  ;;  %v8936_v57 = vadd.f32 %v3879_v46, %v3784_v28  ;;  %v3881_v29 = vpop.f32.mrb[35].mxu0 }
0x10ac   : > { %v3894_v48 = vmax.f32 %v8936_v57, 0.0  ;;  %v3909_v54 = vsel %vm3908_vm13, %v3904_v41, 0.0 }
0x10ad   : > { %v3884_v11 = vpop.f32.mrb[36].mxu0  ;;  %3910 = vadd.xlane.f32.xlu1 %v3909_v54 }
0x10ae   : > { %v3905_v4 = vmul.f32 %v4837_v8, %v3894_v48  ;;  %v8942_v52 = vadd.f32 %v3884_v11, %v3789_v49  ;;  %v3886_v61 = vpop.f32.mrb[37].mxu0 }
0x10b0   : > { %v3895_v26 = vmax.f32 %v8942_v52, 0.0  ;;  %v3912_v0 = vsel %vm3908_vm13, %v3905_v4, 0.0 }
0x10b1   : > { %v3889_v21 = vpop.f32.mrb[38].mxu0  ;;  %3913 = vadd.xlane.f32.xlu0 %v3912_v0 }
0x10b2   : > { %v3906_v60 = vmul.f32 %v4837_v8, %v3895_v26  ;;  %v8948_v47 = vadd.f32 %v3889_v21, %v3794_v39  ;;  %v3891_v40 = vpop.f32.mrb[39].mxu0 }
0x10b4   : > { %v3896_v20 = vmax.f32 %v8948_v47, 0.0  ;;  %v3915_v14 = vsel %vm3908_vm13, %v3906_v60, 0.0 }
0x10b5   : > { %3916 = vadd.xlane.f32.xlu0 %v3915_v14 }
0x10b6   : > { %v3907_v62 = vmul.f32 %v4837_v8, %v3896_v20 }
0x10b8   : > { %v3918_v31 = vsel %vm3908_vm13, %v3907_v62, 0.0 }
0x10b9   : > { %3919 = vadd.xlane.f32.xlu0 %v3918_v31 }
0x113a   : > { %v3911_v1 = vpop.xlane.xlu1 %3910 }
0x113b   : > { %v3921_v59 = vmul.f32 0.0625, %v3911_v1 }
0x113d   : > { %v3929_v23 = vrot.slane %v3921_v59, 7  ;;  %v3941_v12 = vrot.slane %v3921_v59, 1  ;;  %v3959_v44 = vmul.f32 %v3958_v10, %v3921_v59 }
0x113e   : > { %v3914_v55 = vpop.xlane.xlu0 %3913 }
0x113f   : > { %v3940_v30 = vsel %vm1490_vm11, 0.0, %v3929_v23  ;;  %v3922_v35 = vmul.f32 0.0625, %v3914_v55 }
0x1140   : > { %v3954_v13 = vmul.f32 %v3953_v38, %v3940_v30 }
0x1141   : > { %v3930_v53 = vrot.slane %v3922_v35, 7  ;;  %v3942_v63 = vrot.slane %v3922_v35, 1  ;;  %v3960_v36 = vmul.f32 %v3958_v10, %v3922_v35 }
0x1142   : > { %v3917_v33 = vpop.xlane.xlu0 %3916  ;;  %v3963_v25 = vadd.f32 %v3959_v44, %v3954_v13 }
0x1143   : > { %v3931_v42 = vsel %vm1490_vm11, %v3929_v23, %v3930_v53  ;;  %v3943_v27 = vsel %vm1494_vm12, %v3941_v12, %v3942_v63  ;;  %v3923_v37 = vmul.f32 0.0625, %v3917_v33 }
0x1144   : > { %v3955_v3 = vmul.f32 %v3953_v38, %v3931_v42  ;;  %v3968_v43 = vmul.f32 %v3967_v58, %v3943_v27 }
0x1145   : > { %v3932_v18 = vrot.slane %v3923_v37, 7  ;;  %v3944_v5 = vrot.slane %v3923_v37, 1  ;;  %v3961_v15 = vmul.f32 %v3958_v10, %v3923_v37 }
0x1146   : > { %v3972_v45 = vadd.f32 %v3968_v43, %v3963_v25  ;;  %v3920_v34 = vpop.xlane.xlu0 %3919  ;;  %v3964_v22 = vadd.f32 %v3960_v36, %v3955_v3 }
0x1147   : > { %v3933_v6 = vsel %vm1490_vm11, %v3930_v53, %v3932_v18  ;;  %v3945_v16 = vsel %vm1494_vm12, %v3942_v63, %v3944_v5  ;;  %v3924_v19 = vmul.f32 0.0625, %v3920_v34 }
0x1148   : > { %v4838_v9 = vmul.f32 -1.442695, %v3972_v45  ;;  %v3956_v24 = vmul.f32 %v3953_v38, %v3933_v6  ;;  %v3969_v32 = vmul.f32 %v3967_v58, %v3945_v16 }
0x1149   : > { %v3934_v51 = vrot.slane %v3924_v19, 7  ;;  %v3946_v56 = vrot.slane %v3924_v19, 1  ;;  %v3962_v46 = vmul.f32 %v3958_v10, %v3924_v19 }
0x114a   : > { %6409 = vpow2.f32 %v4838_v9  ;;  %v3973_v17 = vadd.f32 %v3969_v32, %v3964_v22  ;;  %v3965_v41 = vadd.f32 %v3961_v15, %v3956_v24  ;;  %v4272_v15 = vld [vmem:[%s9184_s20 + $0x10] sm:$0xff] }
0x114b   : > { %v3935_v2 = vsel %vm1490_vm11, %v3932_v18, %v3934_v51  ;;  %v3947_v8 = vsel %vm1494_vm12, %v3944_v5, %v3946_v56  ;;  %v3952_v28 = vsel %vm1494_vm12, %v3946_v56, 0.0  ;;  %v4271_v56 = vld [vmem:[%s9184_s20 + $0x8] sm:$0xff]  ;;  %5238 = vmatprep.mubr.msk.f32.mxu0 %vm4306_vm2, %v4272_v15 }
0x114c   : > { %v4839_v29 = vmul.f32 -1.442695, %v3973_v17  ;;  %v3957_v54 = vmul.f32 %v3953_v38, %v3935_v2  ;;  %v3970_v49 = vmul.f32 %v3967_v58, %v3947_v8  ;;  %v3971_v4 = vmul.f32 %v3967_v58, %v3952_v28  ;;  %v4282_v17 = vld [vmem:[%s9185_s21] sm:$0xff]  ;;  %v4284_v2 = vld [vmem:[%s9185_s21 + $0x10] sm:$0xff]  ;;  %v4283_v8 = vld [vmem:[%s9185_s21 + $0x8] sm:$0xff] }
0x114d   : > { %v4285_v28 = vld [vmem:[%s9185_s21 + $0x18] sm:$0xff] }
0x114e   : > { %6411 = vpow2.f32 %v4839_v29  ;;  %v3966_v11 = vadd.f32 %v3962_v46, %v3957_v54  ;;  %v3974_v61 = vadd.f32 %v3970_v49, %v3965_v41 }
0x1150   : > { %v3975_v0 = vadd.f32 %v3971_v4, %v3966_v11  ;;  %v4840_v39 = vmul.f32 -1.442695, %v3974_v61 }
0x1152   : > { %6413 = vpow2.f32 %v4840_v39  ;;  %v4841_v21 = vmul.f32 -1.442695, %v3975_v0 }
0x1154   : > { %v6410_v60 = vpop.eup %6409  ;;  %6415 = vpow2.f32 %v4841_v21 }
0x1155   : > { %v3988_v40 = vadd.f32 1.0, %v6410_v60 }
0x1157   : > { %6417 = vrcp.f32 %v3988_v40 }
0x1158   : > { %v6412_v14 = vpop.eup %6411 }
0x1159   : > { %v3989_v62 = vadd.f32 1.0, %v6412_v14 }
0x115b   : > { %6419 = vrcp.f32 %v3989_v62 }
0x115c   : > { %v6414_v31 = vpop.eup %6413 }
0x115d   : > { %v3990_v1 = vadd.f32 1.0, %v6414_v31 }
0x115e   : > { %v6416_v59 = vpop.eup %6415 }
0x115f   : > { %v3991_v38 = vadd.f32 1.0, %v6416_v59  ;;  %6421 = vrcp.f32 %v3990_v1 }
0x1161   : > { %v6418_v23 = vpop.eup %6417  ;;  %6423 = vrcp.f32 %v3991_v38 }
0x1162   : > { %4002 = vperm.xlu1 %6137, %v6418_v23  }
0x1165   : > { %v6420_v55 = vpop.eup %6419 }
0x1166   : > { %4007 = vperm.xlu0 %6208, %v6420_v55  }
0x1169   : > { %v6422_v10 = vpop.eup %6421 }
0x116a   : > { %4012 = vperm.xlu1 %6137, %v6422_v10  }
0x116b   : > { %v6424_v30 = vpop.eup %6423 }
0x116e   : > { %4017 = vperm.xlu1 %6137, %v6424_v30  }
0x11e1   : > { %v4003_v35 = vpop.permute.xlu1 %4002 }
0x11e2   : > { %v4020_v13 = vmul.f32 %v4003_v35, %v3893_v7  ;;  %v4065_v7 = vld [vmem:[%s9183_s19 + $0x8] sm:$0x7f] }
0x11e3   : > { %v5861_v57 = vpack.c.bf16 %v4065_v7, %v4064_v50 }
0x11e4   : > { %4028 = vrot.lane.b32.xlu1 %v4020_v13, %s9241_s29 }
0x11e5   : > { %v4008_v12 = vpop.permute.xlu0 %4007  ;;  %5863 = vmatprep.subr.msk.bf16.mxu1 %vm5862_vm15, %v5861_v57 }
0x11e6   : > { %v4021_v58 = vmul.f32 %v4008_v12, %v3894_v48  ;;  %5866 = vmatpush3.bf16.msk.msra.mxu1 %vm5862_vm15, %v5861_v57 }
0x11e8   : > { %4030 = vrot.lane.b32.xlu0 %v4021_v58, %s9241_s29 }
0x11e9   : > { %v4013_v53 = vpop.permute.xlu1 %4012 }
0x11ea   : > { %v4022_v63 = vmul.f32 %v4013_v53, %v3895_v26 }
0x11ec   : > { %4032 = vrot.lane.b32.xlu1 %v4022_v63, %s9241_s29 }
0x11ed   : > { %v4018_v44 = vpop.permute.xlu1 %4017 }
0x11ee   : > { %v4023_v33 = vmul.f32 %v4018_v44, %v3896_v20 }
0x11f0   : > { %4034 = vrot.lane.b32.xlu0 %v4023_v33, %s9241_s29 }
0x1256   : > { %v4029_v48 = vpop.permute.xlu1 %4028 }
0x1257   : > { %v4040_v52 = vmax.f32 %v4020_v13, %v4029_v48 }
0x1259   : > { %4048 = vrot.lane.b32.xlu1 %v4040_v52, %s6549_s0 }
0x125a   : > { %v4031_v26 = vpop.permute.xlu0 %4030 }
0x125b   : > { %v4041_v47 = vmax.f32 %v4021_v58, %v4031_v26 }
0x125d   : > { %4050 = vrot.lane.b32.xlu0 %v4041_v47, %s6549_s0 }
0x125e   : > { %v4033_v20 = vpop.permute.xlu1 %4032 }
0x125f   : > { %v4042_v42 = vmax.f32 %v4022_v63, %v4033_v20 }
0x1261   : > { %4052 = vrot.lane.b32.xlu1 %v4042_v42, %s6549_s0 }
0x1262   : > { %v4035_v27 = vpop.permute.xlu0 %4034 }
0x1263   : > { %v4043_v37 = vmax.f32 %v4023_v33, %v4035_v27 }
0x1265   : > { %4054 = vrot.lane.b32.xlu0 %v4043_v37, %s6549_s0 }
0x12cb   : > { %v4049_v25 = vpop.permute.xlu1 %4048 }
0x12cc   : > { %v4060_v3 = vmax.f32 %v4040_v52, %v4049_v25 }
0x12ce   : > { %5224 = vmatprep.mubr.msk.f32.mxu1 %vm4066_vm14, %v4060_v3 }
0x12cf   : > { %v4051_v43 = vpop.permute.xlu0 %4050 }
0x12d0   : > { %v4061_v18 = vmax.f32 %v4041_v47, %v4051_v43 }
0x12d2   : > { %5225 = vmatmul.mubr.msk.f32.vlgmr.msra.gmra.mrb[8].mxu1 %vm4066_vm14, %v4061_v18 }
0x12d3   : > { %v4053_v5 = vpop.permute.xlu1 %4052 }
0x12d4   : > { %v4062_v36 = vmax.f32 %v4042_v42, %v4053_v5 }
0x12d6   : > { %5227 = vmatprep.mubr.msk.f32.mxu1 %vm4066_vm14, %v4062_v36 }
0x12d7   : > { %v4055_v45 = vpop.permute.xlu0 %4054 }
0x12d8   : > { %v4063_v34 = vmax.f32 %v4043_v37, %v4055_v45 }
0x12da   : > { %5228 = vmatmul.mubr.msk.f32.gmra.mrb[10].mxu1 %vm4066_vm14, %v4063_v34 }
0x12db   : > { %4383 = vmatprep.mubr.f32.mxu1 %v4271_v56 }
0x13a5   : > { %v5226_v6 = vpop.f32.mrb[8].mxu1 }
0x13a6   : > { %v4148_v16 = vpop.f32.mrb[9].mxu1 }
0x13a7   : > { %v6309_v19 = vpack.i.bf16 %v5226_v6, %v4148_v16  ;;  %v5869_v22 = vpack.c.bf16 %v5226_v6, %v4148_v16 }
0x13a9   : > { %6310 = vrot.lane.b32.xlu1 %v6309_v19, %s6553_s27 }
0x13ad   : > { %6320 = vrot.lane.b32.xlu1 %v6309_v19, %s6549_s0  ;;  %v5229_v9 = vpop.f32.mrb[10].mxu1 }
0x13ae   : > { %v4158_v24 = vpop.f32.mrb[11].mxu1 }
0x13af   : > { %v6329_v32 = vpack.i.bf16 %v5229_v9, %v4158_v24  ;;  %v5873_v51 = vpack.c.bf16 %v5229_v9, %v4158_v24 }
0x13b1   : > { %6330 = vrot.lane.b32.xlu1 %v6329_v32, %s6549_s0  ;;  %6315 = vrot.lane.b32.xlu0 %v6329_v32, %s6553_s27  ;;  %s9247_s0 = smov 118   ;;  %s715_s27 = sand.u32 1, %s6514_s30  }
0x13b2   : > { %s716_s2 = scalar_lea.vmem [#allocation5], %s715_s27 }
0x13b3   : > { %s4719_s28 = sshll.u32 %s716_s2, 4  ;;  %s9124_s28 = int_to_ptr.vmem [resolvable:$true] %s4719_s28 }
0x13b5   : > { %6335 = vrot.lane.b32.xlu1 %v6309_v19, %s6550_s3  ;;  %6325 = vrot.lane.b32.xlu0 %v6309_v19, %s9241_s29 }
0x13b9   : > { %6350 = vrot.lane.b32.xlu1 %v6329_v32, %s6550_s3  ;;  %6340 = vrot.lane.b32.xlu0 %v6329_v32, %s9241_s29  ;;  %s9248_s3 = sld [smem:[#allocation18_spill]] }
0x13bd   : > { %6355 = vrot.lane.b32.xlu1 %v6309_v19, %s6554_s7  ;;  %6345 = vrot.lane.b32.xlu0 %v6309_v19, %s9244_s5 }
0x13c1   : > { %6370 = vrot.lane.b32.xlu1 %v6329_v32, %s6554_s7  ;;  %6360 = vrot.lane.b32.xlu0 %v6329_v32, %s9244_s5  ;;  %s4847_s7 = sld [smem:[#allocation2 + $0x200]]  ;;  %s9252_s5 = sld [smem:[#allocation24_spill]] }
0x13c5   : > { %6380 = vrot.lane.b32.xlu1 %v6309_v19, %s9247_s0  ;;  %6365 = vrot.lane.b32.xlu0 %v6309_v19, %s6555_s23 }
0x13c9   : > { %4288 = vperm.xlu1 %6137, %v4282_v17   ;;  %6375 = vrot.lane.b32.xlu0 %v6329_v32, %s6555_s23 }
0x13cd   : > { %4298 = vperm.xlu1 %6137, %v4284_v2   ;;  %6385 = vrot.lane.b32.xlu0 %v6329_v32, %s9247_s0  ;;  %s4859_s0 = sshll.u32 %s9249_s6, 4  ;;  %s6556_s6 = smov [#allocation5]  }
0x13ce   : > { %s9122_s1 = scalar_lea.hbm %s9252_s5, %s4859_s0 }
0x13d1   : > { %4293 = vperm.xlu0 %6208, %v4283_v8  }
0x13d5   : > { %4303 = vperm.xlu0 %6208, %v4285_v28   ;;  %v4270_v28 = vld [vmem:[%s9184_s20] sm:$0xff] }
0x141b   : > { %v6311_v46 = vpop.permute.xlu1 %6310 }
0x141c   : > { %v6313_v41 = vunpack.i.h.bf16 %v6311_v46  ;;  %v6312_v29 = vunpack.i.l.bf16 %v6311_v46 }
0x141e   : > { %v5867_v54 = vpack.c.bf16 %v6313_v41, %v6312_v29  ;;  %v4274_v41 = vld [vmem:[%s9184_s20 + $0x20] sm:$0xff]  ;;  %v4273_v29 = vld [vmem:[%s9184_s20 + $0x18] sm:$0xff] }
0x141f   : > { %v6321_v49 = vpop.permute.xlu1 %6320 }
0x1420   : > { %5868 = vmatprep.subr.bf16.mxu1 %v5867_v54  ;;  %v6323_v11 = vunpack.i.h.bf16 %v6321_v49  ;;  %v6322_v4 = vunpack.i.l.bf16 %v6321_v49  ;;  %v4275_v54 = vld [vmem:[%s9184_s20 + $0x28] sm:$0xff]  ;;  %v4277_v49 = vld [vmem:[%s9184_s20 + $0x38] sm:$0xff] }
0x1421   : > { %5870 = vmatpush3.bf16.msra.mxu1 %v5869_v22 }
0x1422   : > { %v5875_v40 = vpack.c.bf16 %v6323_v11, %v6322_v4  ;;  %v4278_v11 = vld [vmem:[%s9184_s20 + $0x40] sm:$0xff]  ;;  %v4276_v4 = vld [vmem:[%s9184_s20 + $0x30] sm:$0xff] }
0x1423   : > { %v6331_v61 = vpop.permute.xlu1 %6330  ;;  %v6316_v0 = vpop.permute.xlu0 %6315 }
0x1424   : > { %v6318_v39 = vunpack.i.h.bf16 %v6316_v0  ;;  %v6317_v21 = vunpack.i.l.bf16 %v6316_v0  ;;  %v6333_v31 = vunpack.i.h.bf16 %v6331_v61  ;;  %v6332_v1 = vunpack.i.l.bf16 %v6331_v61  ;;  %v4281_v61 = vld [vmem:[%s9184_s20 + $0x58] sm:$0xff]  ;;  %v4280_v0 = vld [vmem:[%s9184_s20 + $0x50] sm:$0xff] }
0x1426   : > { %v5871_v60 = vpack.c.bf16 %v6318_v39, %v6317_v21  ;;  %v5879_v13 = vpack.c.bf16 %v6333_v31, %v6332_v1  ;;  %v4279_v39 = vld [vmem:[%s9184_s20 + $0x48] sm:$0xff] }
0x1427   : > { %v6336_v14 = vpop.permute.xlu1 %6335  ;;  %v6326_v62 = vpop.permute.xlu0 %6325 }
0x1428   : > { %v6328_v59 = vunpack.i.h.bf16 %v6326_v62  ;;  %v6327_v38 = vunpack.i.l.bf16 %v6326_v62  ;;  %5872 = vmatprep.subr.bf16.mxu1 %v5871_v60  ;;  %v6338_v55 = vunpack.i.h.bf16 %v6336_v14  ;;  %v6337_v10 = vunpack.i.l.bf16 %v6336_v14 }
0x1429   : > { %5874 = vmatpush3.bf16.msra.mxu1 %v5873_v51 }
0x142a   : > { %v5877_v23 = vpack.c.bf16 %v6328_v59, %v6327_v38  ;;  %5876 = vmatprep.subr.bf16.mxu1 %v5875_v40  ;;  %v5883_v63 = vpack.c.bf16 %v6338_v55, %v6337_v10 }
0x142b   : > { %v6351_v30 = vpop.permute.xlu1 %6350  ;;  %v6341_v35 = vpop.permute.xlu0 %6340 }
0x142c   : > { %v6343_v12 = vunpack.i.h.bf16 %v6341_v35  ;;  %v6342_v58 = vunpack.i.l.bf16 %v6341_v35  ;;  %v6353_v50 = vunpack.i.h.bf16 %v6351_v30  ;;  %v6352_v7 = vunpack.i.l.bf16 %v6351_v30  ;;  %v4854_v30 = vld [vmem:[%s9186_s22] ss:$0 sm:$0xff] }
0x142d   : > { %5878 = vmatpush3.bf16.msra.mxu1 %v5877_v23 }
0x142e   : > { %v5881_v53 = vpack.c.bf16 %v6343_v12, %v6342_v58  ;;  %5880 = vmatprep.subr.bf16.mxu1 %v5879_v13  ;;  %v5887_v27 = vpack.c.bf16 %v6353_v50, %v6352_v7 }
0x142f   : > { %v6356_v44 = vpop.permute.xlu1 %6355  ;;  %v6346_v33 = vpop.permute.xlu0 %6345 }
0x1430   : > { %v6348_v57 = vunpack.i.h.bf16 %v6346_v33  ;;  %v6347_v48 = vunpack.i.l.bf16 %v6346_v33  ;;  %v6358_v26 = vunpack.i.h.bf16 %v6356_v44  ;;  %v6357_v47 = vunpack.i.l.bf16 %v6356_v44 }
0x1431   : > { %5882 = vmatpush3.bf16.msra.mxu1 %v5881_v53 }
0x1432   : > { %v5885_v52 = vpack.c.bf16 %v6348_v57, %v6347_v48  ;;  %5884 = vmatprep.subr.bf16.mxu1 %v5883_v63  ;;  %v5891_v43 = vpack.c.bf16 %v6358_v26, %v6357_v47 }
0x1433   : > { %v6371_v20 = vpop.permute.xlu1 %6370  ;;  %v6361_v42 = vpop.permute.xlu0 %6360 }
0x1434   : > { %v6363_v37 = vunpack.i.h.bf16 %v6361_v42  ;;  %v6362_v25 = vunpack.i.l.bf16 %v6361_v42  ;;  %v6373_v18 = vunpack.i.h.bf16 %v6371_v20  ;;  %v6372_v5 = vunpack.i.l.bf16 %v6371_v20 }
0x1435   : > { %5886 = vmatpush3.bf16.msra.mxu1 %v5885_v52 }
0x1436   : > { %v5889_v3 = vpack.c.bf16 %v6363_v37, %v6362_v25  ;;  %5888 = vmatprep.subr.bf16.mxu1 %v5887_v27  ;;  %v5895_v32 = vpack.c.bf16 %v6373_v18, %v6372_v5 }
0x1437   : > { %v6381_v36 = vpop.permute.xlu1 %6380  ;;  %v6366_v45 = vpop.permute.xlu0 %6365 }
0x1438   : > { %v6383_v34 = vunpack.i.h.bf16 %v6381_v36  ;;  %v6382_v6 = vunpack.i.l.bf16 %v6381_v36  ;;  %v6368_v16 = vunpack.i.h.bf16 %v6366_v45  ;;  %v6367_v19 = vunpack.i.l.bf16 %v6366_v45 }
0x1439   : > { %5890 = vmatpush3.bf16.msra.mxu1 %v5889_v3 }
0x143a   : > { %v5899_v22 = vpack.c.bf16 %v6383_v34, %v6382_v6  ;;  %v5893_v9 = vpack.c.bf16 %v6368_v16, %v6367_v19  ;;  %5892 = vmatprep.subr.bf16.mxu1 %v5891_v43 }
0x143b   : > { %v6376_v24 = vpop.permute.xlu0 %6375 }
0x143c   : > { %v6378_v51 = vunpack.i.h.bf16 %v6376_v24  ;;  %v6377_v56 = vunpack.i.l.bf16 %v6376_v24  ;;  %5900 = vmatprep.subr.bf16.mxu0 %v5899_v22 }
0x143d   : > { %5894 = vmatpush3.bf16.msra.mxu1 %v5893_v9  ;;  %5902 = vmatpush3.bf16.msra.mxu0 %v5899_v22  ;;  %v4549_v22 = vstv %s4847_s7 }
0x143e   : > { %v5897_v15 = vpack.c.bf16 %v6378_v51, %v6377_v56  ;;  %5896 = vmatprep.subr.bf16.mxu1 %v5895_v32  ;;  %v4554_v32 = vstv %s4848_s4  ;;  %s6456_s4 = scalar_lea.vmem %s9124_s28, 16 }
0x143f   : > { %v6386_v17 = vpop.permute.xlu0 %6385  ;;  %p6457_p9 = scmp.ne.s32.totalorder %s9124_s28, %s6456_s4 }
0x1440   : > { %v6388_v2 = vunpack.i.h.bf16 %v6386_v17  ;;  %v6387_v8 = vunpack.i.l.bf16 %v6386_v17 }
0x1441   : > { %5898 = vmatpush3.bf16.msra.mxu1 %v5897_v15  ;;  %p6458_p10 = pnand %p6457_p9, %p6715_p5 }
0x1442   : > { %v5903_v46 = vpack.c.bf16 %v6388_v2, %v6387_v8  ;;  %v4563_v2 = vstv %s4849_s25  ;;  %s6460_s25 = sshll.u32 %s6556_s6, 4  ;;  %s6461_s25 = int_to_ptr.vmem [resolvable:$false] %s6460_s25 }
0x1443   : > { %p6459_p12 = pneg %p6458_p10  ;;  %p6463_p13 = scmp.lt.s32.totalorder %s9124_s28, %s6461_s25 }
0x1444   : > { %4384 = vmatmul.mubr.f32.vlgmr.msra.gmra.mrb[12].mxu1 %v4270_v28  ;;  %5904 = vmatprep.subr.bf16.mxu0 %v5903_v46 }
0x1445   : > { %5906 = vmatpush3.bf16.msra.mxu0 %v5903_v46  ;;  %4388 = vmatprep.mubr.f32.mxu1 %v4274_v41 }
0x1448   : > { %4389 = vmatmul.mubr.f32.gmra.mrb[14].mxu1 %v4273_v29  ;;  %5239 = vmatmul.mubr.msk.f32.vlgmr.msra.gmra.mrb[40].mxu0 %vm4306_vm2, %v4275_v54  ;;  %v4289_v14 = vpop.permute.xlu1 %4288 }
0x1449   : > { %4393 = vmatprep.mubr.f32.mxu1 %v4277_v49  ;;  %5241 = vmatprep.mubr.msk.f32.mxu0 %vm4306_vm2, %v4278_v11 }
0x144c   : > { %4394 = vmatmul.mubr.f32.gmra.mrb[16].mxu1 %v4276_v4  ;;  %5242 = vmatmul.mubr.msk.f32.gmra.mrb[42].mxu0 %vm4306_vm2, %v4281_v61  ;;  %v4299_v7 = vpop.permute.xlu1 %4298 }
0x144d   : > { %4398 = vmatprep.mubr.f32.mxu1 %v4280_v0 }
0x1450   : > { %4399 = vmatmul.mubr.f32.gmra.mrb[18].mxu1 %v4279_v39  ;;  %v4294_v10 = vpop.permute.xlu0 %4293 }
0x1454   : > { %v4304_v37 = vpop.permute.xlu0 %4303 }
0x1517   : > { %v5119_v21 = vpop.f32.mrb[12].mxu1 }
0x1518   : > { %v5120_v60 = vpop.f32.mrb[13].mxu1 }
0x1519   : > { %v5121_v40 = vadd.f32 %v5120_v60, %v5119_v21 }
0x151b   : > { %v5122_v62 = vpop.f32.mrb[14].mxu1  ;;  %v5240_v31 = vpop.f32.mrb[40].mxu0  ;;  %v4386_v1 = vadd.f32 %v5121_v40, %v4289_v14 }
0x151c   : > { %v5123_v59 = vpop.f32.mrb[15].mxu1  ;;  %v4470_v38 = vpop.f32.mrb[41].mxu0 }
0x151d   : > { %v5124_v23 = vadd.f32 %v5123_v59, %v5122_v62  ;;  %v9051_v55 = vadd.f32 %v4470_v38, %v4386_v1 }
0x151f   : > { %v4391_v35 = vadd.f32 %v5124_v23, %v4294_v10  ;;  %v4489_v13 = vmax.f32 %v9051_v55, 0.0  ;;  %v5125_v12 = vpop.f32.mrb[16].mxu1  ;;  %v5243_v58 = vpop.f32.mrb[42].mxu0 }
0x1520   : > { %v5126_v53 = vpop.f32.mrb[17].mxu1  ;;  %v4480_v63 = vpop.f32.mrb[43].mxu0 }
0x1521   : > { %v9057_v44 = vadd.f32 %v5240_v31, %v4391_v35  ;;  %v4500_v33 = vmul.f32 %v4854_v30, %v4489_v13  ;;  %v5127_v50 = vadd.f32 %v5126_v53, %v5125_v12 }
0x1523   : > { %v4490_v57 = vmax.f32 %v9057_v44, 0.0  ;;  %v5128_v48 = vpop.f32.mrb[18].mxu1  ;;  %v4396_v52 = vadd.f32 %v5127_v50, %v4299_v7  ;;  %v4505_v26 = vsel %vm4504_vm3, %v4500_v33, 0.0 }
0x1524   : > { %v5129_v47 = vpop.f32.mrb[19].mxu1  ;;  %4506 = vadd.xlane.f32.xlu1 %v4505_v26 }
0x1525   : > { %v5130_v20 = vadd.f32 %v5129_v47, %v5128_v48  ;;  %v9063_v42 = vadd.f32 %v4480_v63, %v4396_v52  ;;  %v4501_v27 = vmul.f32 %v4854_v30, %v4490_v57 }
0x1527   : > { %v4401_v25 = vadd.f32 %v5130_v20, %v4304_v37  ;;  %v4491_v3 = vmax.f32 %v9063_v42, 0.0  ;;  %v4508_v43 = vsel %vm4504_vm3, %v4501_v27, 0.0 }
0x1528   : > { %4509 = vadd.xlane.f32.xlu0 %v4508_v43 }
0x1529   : > { %v9069_v18 = vadd.f32 %v5243_v58, %v4401_v25  ;;  %v4502_v5 = vmul.f32 %v4854_v30, %v4491_v3 }
0x152b   : > { %v4492_v36 = vmax.f32 %v9069_v18, 0.0  ;;  %v4511_v45 = vsel %vm4504_vm3, %v4502_v5, 0.0 }
0x152c   : > { %4512 = vadd.xlane.f32.xlu0 %v4511_v45 }
0x152d   : > { %v4503_v34 = vmul.f32 %v4854_v30, %v4492_v36 }
0x152f   : > { %v4514_v6 = vsel %vm4504_vm3, %v4503_v34, 0.0 }
0x1530   : > { %4515 = vadd.xlane.f32.xlu0 %v4514_v6 }
0x15b1   : > { %v4507_v16 = vpop.xlane.xlu1 %4506 }
0x15b2   : > { %v4517_v19 = vmul.f32 0.25, %v4507_v16 }
0x15b4   : > { %v4525_v9 = vrot.slane %v4517_v19, 7  ;;  %v4537_v17 = vrot.slane %v4517_v19, 1  ;;  %v4555_v46 = vmul.f32 %v4554_v32, %v4517_v19 }
0x15b5   : > { %v4510_v24 = vpop.xlane.xlu0 %4509 }
0x15b6   : > { %v4536_v51 = vsel %vm1490_vm11, 0.0, %v4525_v9  ;;  %v4518_v56 = vmul.f32 0.25, %v4510_v24 }
0x15b7   : > { %v4550_v15 = vmul.f32 %v4549_v22, %v4536_v51 }
0x15b8   : > { %v4526_v8 = vrot.slane %v4518_v56, 7  ;;  %v4538_v28 = vrot.slane %v4518_v56, 1  ;;  %v4556_v21 = vmul.f32 %v4554_v32, %v4518_v56 }
0x15b9   : > { %v4513_v41 = vpop.xlane.xlu0 %4512  ;;  %v4559_v11 = vadd.f32 %v4555_v46, %v4550_v15 }
0x15ba   : > { %v4527_v29 = vsel %vm1490_vm11, %v4525_v9, %v4526_v8  ;;  %v4539_v54 = vsel %vm1494_vm12, %v4537_v17, %v4538_v28  ;;  %v4519_v49 = vmul.f32 0.25, %v4513_v41 }
0x15bb   : > { %v4551_v4 = vmul.f32 %v4549_v22, %v4527_v29  ;;  %v4564_v61 = vmul.f32 %v4563_v2, %v4539_v54 }
0x15bc   : > { %v4528_v0 = vrot.slane %v4519_v49, 7  ;;  %v4540_v39 = vrot.slane %v4519_v49, 1  ;;  %v4557_v35 = vmul.f32 %v4554_v32, %v4519_v49 }
0x15bd   : > { %v4568_v60 = vadd.f32 %v4564_v61, %v4559_v11  ;;  %v4516_v40 = vpop.xlane.xlu0 %4515  ;;  %v4560_v1 = vadd.f32 %v4556_v21, %v4551_v4  ;;  %v4661_v21 = vld [vmem:[%s9248_s3 + $0x8] sm:$0xff] }
0x15be   : > { %v4529_v14 = vsel %vm1490_vm11, %v4526_v8, %v4528_v0  ;;  %v4541_v62 = vsel %vm1494_vm12, %v4538_v28, %v4540_v39  ;;  %v4520_v31 = vmul.f32 0.25, %v4516_v40 }
0x15bf   : > { %v4855_v59 = vmul.f32 -1.442695, %v4568_v60  ;;  %v4552_v38 = vmul.f32 %v4549_v22, %v4529_v14  ;;  %v4565_v23 = vmul.f32 %v4563_v2, %v4541_v62  ;;  %v4660_v60 = vld [vmem:[%s9248_s3] sm:$0xff] }
0x15c0   : > { %v4530_v10 = vrot.slane %v4520_v31, 7  ;;  %v4542_v30 = vrot.slane %v4520_v31, 1  ;;  %v4558_v33 = vmul.f32 %v4554_v32, %v4520_v31  ;;  %v4662_v31 = vld [vmem:[%s9248_s3 + $0x10] sm:$0xff] }
0x15c1   : > { %6425 = vpow2.f32 %v4855_v59  ;;  %v4569_v12 = vadd.f32 %v4565_v23, %v4560_v1  ;;  %v4561_v50 = vadd.f32 %v4557_v35, %v4552_v38 }
0x15c2   : > { %v4531_v58 = vsel %vm1490_vm11, %v4528_v0, %v4530_v10  ;;  %v4543_v53 = vsel %vm1494_vm12, %v4540_v39, %v4542_v30  ;;  %v4548_v63 = vsel %vm1494_vm12, %v4542_v30, 0.0  ;;  %vm4688_vm11 = vcmask 80896   ;;  %v4663_v10 = vld [vmem:[%s9248_s3 + $0x18] sm:$0xff]  ;;  %s4707_s3 = scalar_lea.sflag [#allocation3], %s715_s27 }
0x15c3   : > { %v4856_v7 = vmul.f32 -1.442695, %v4569_v12  ;;  %v4553_v48 = vmul.f32 %v4549_v22, %v4531_v58  ;;  %v4566_v52 = vmul.f32 %v4563_v2, %v4543_v53  ;;  %v4567_v47 = vmul.f32 %v4563_v2, %v4548_v63 }
0x15c4   : > { %vm4704_vm12 = vcmask 73728  }
0x15c5   : > { %6427 = vpow2.f32 %v4856_v7  ;;  %v4562_v26 = vadd.f32 %v4558_v33, %v4553_v48  ;;  %v4570_v20 = vadd.f32 %v4566_v52, %v4561_v50 }
0x15c7   : > { %v4571_v27 = vadd.f32 %v4567_v47, %v4562_v26  ;;  %v4857_v37 = vmul.f32 -1.442695, %v4570_v20 }
0x15c9   : > { %6429 = vpow2.f32 %v4857_v37  ;;  %v4858_v25 = vmul.f32 -1.442695, %v4571_v27 }
0x15cb   : > { %v6426_v43 = vpop.eup %6425  ;;  %6431 = vpow2.f32 %v4858_v25 }
0x15cc   : > { %v4584_v5 = vadd.f32 1.0, %v6426_v43 }
0x15ce   : > { %6433 = vrcp.f32 %v4584_v5 }
0x15cf   : > { %v6428_v45 = vpop.eup %6427 }
0x15d0   : > { %v4585_v34 = vadd.f32 1.0, %v6428_v45 }
0x15d2   : > { %6435 = vrcp.f32 %v4585_v34 }
0x15d3   : > { %v6430_v6 = vpop.eup %6429 }
0x15d4   : > { %v4586_v16 = vadd.f32 1.0, %v6430_v6 }
0x15d5   : > { %v6432_v19 = vpop.eup %6431 }
0x15d6   : > { %v4587_v22 = vadd.f32 1.0, %v6432_v19  ;;  %6437 = vrcp.f32 %v4586_v16 }
0x15d8   : > { %v6434_v9 = vpop.eup %6433  ;;  %6439 = vrcp.f32 %v4587_v22 }
0x15d9   : > { %4598 = vperm.xlu1 %6137, %v6434_v9  }
0x15dc   : > { %v6436_v24 = vpop.eup %6435 }
0x15dd   : > { %4603 = vperm.xlu0 %6208, %v6436_v24  }
0x15e0   : > { %v6438_v32 = vpop.eup %6437 }
0x15e1   : > { %4608 = vperm.xlu1 %6137, %v6438_v32  }
0x15e2   : > { %v6440_v51 = vpop.eup %6439 }
0x15e5   : > { %4613 = vperm.xlu1 %6137, %v6440_v51  }
0x1658   : > { %v4599_v56 = vpop.permute.xlu1 %4598 }
0x1659   : > { %v4616_v15 = vmul.f32 %v4599_v56, %v4489_v13 }
0x165b   : > { %4624 = vrot.lane.b32.xlu1 %v4616_v15, %s9241_s29 }
0x165c   : > { %v4604_v17 = vpop.permute.xlu0 %4603 }
0x165d   : > { %v4617_v2 = vmul.f32 %v4604_v17, %v4490_v57 }
0x165f   : > { %4626 = vrot.lane.b32.xlu0 %v4617_v2, %s9241_s29 }
0x1660   : > { %v4609_v8 = vpop.permute.xlu1 %4608 }
0x1661   : > { %v4618_v28 = vmul.f32 %v4609_v8, %v4491_v3 }
0x1663   : > { %4628 = vrot.lane.b32.xlu1 %v4618_v28, %s9241_s29 }
0x1664   : > { %v4614_v46 = vpop.permute.xlu1 %4613 }
0x1665   : > { %v4619_v41 = vmul.f32 %v4614_v46, %v4492_v36 }
0x1667   : > { %4630 = vrot.lane.b32.xlu0 %v4619_v41, %s9241_s29  ;;  %s9251_s29 = sld [smem:[#allocation19_spill]] }
0x166d   : > { %v4702_v20 = vld [vmem:[%s9251_s29] sm:$0x1]  ;;  %s6462_s29 = scalar_lea.vmem %s6461_s25, 32 }
0x166e   : > { %p6464_p0 = scmp.lt.s32.totalorder %s6462_s29, %s6456_s4 }
0x1670   : > { %p6465_p1 = por %p6464_p0, %p6463_p13 }
0x1672   : > { %p6466_p2 = pnand %p6465_p1, %p6459_p12 }
0x16cd   : > { %v4625_v55 = vpop.permute.xlu1 %4624 }
0x16ce   : > { %v4636_v13 = vmax.f32 %v4616_v15, %v4625_v55 }
0x16d0   : > { %4644 = vrot.lane.b32.xlu1 %v4636_v13, %s6555_s23 }
0x16d1   : > { %v4627_v44 = vpop.permute.xlu0 %4626 }
0x16d2   : > { %v4637_v57 = vmax.f32 %v4617_v2, %v4627_v44 }
0x16d4   : > { %4646 = vrot.lane.b32.xlu0 %v4637_v57, %s6555_s23 }
0x16d5   : > { %v4629_v29 = vpop.permute.xlu1 %4628 }
0x16d6   : > { %v4638_v54 = vmax.f32 %v4618_v28, %v4629_v29 }
0x16d8   : > { %4648 = vrot.lane.b32.xlu1 %v4638_v54, %s6555_s23 }
0x16d9   : > { %v4631_v42 = vpop.permute.xlu0 %4630 }
0x16da   : > { %v4639_v3 = vmax.f32 %v4619_v41, %v4631_v42 }
0x16dc   : > { %4650 = vrot.lane.b32.xlu0 %v4639_v3, %s6555_s23 }
0x1742   : > { %v4645_v18 = vpop.permute.xlu1 %4644 }
0x1743   : > { %v4656_v36 = vmax.f32 %v4636_v13, %v4645_v18 }
0x1745   : > { %4666 = vperm.xlu1 %6137, %v4656_v36  }
0x1746   : > { %v4647_v49 = vpop.permute.xlu0 %4646 }
0x1747   : > { %v4657_v11 = vmax.f32 %v4637_v57, %v4647_v49 }
0x1749   : > { %4671 = vperm.xlu0 %6208, %v4657_v11  }
0x174a   : > { %v4649_v4 = vpop.permute.xlu1 %4648 }
0x174b   : > { %v4658_v61 = vmax.f32 %v4638_v54, %v4649_v4 }
0x174d   : > { %4676 = vperm.xlu1 %6137, %v4658_v61  }
0x174e   : > { %v4651_v0 = vpop.permute.xlu0 %4650 }
0x174f   : > { %v4659_v39 = vmax.f32 %v4639_v3, %v4651_v0 }
0x1751   : > { %4681 = vperm.xlu0 %6208, %v4659_v39  }
0x17c4   : > { %v4667_v40 = vpop.permute.xlu1 %4666 }
0x17c5   : > { %v4684_v1 = vmul.f32 %v4667_v40, %v4660_v60 }
0x17c7   : > { %v4689_v30 = vsel %vm4688_vm11, %v4684_v1, 0.0 }
0x17c8   : > { %v4672_v14 = vpop.permute.xlu0 %4671 }
0x17c9   : > { %v4685_v62 = vmul.f32 %v4672_v14, %v4661_v21 }
0x17cb   : > { %v4690_v38 = vsel %vm4688_vm11, %v4685_v62, 0.0 }
0x17cc   : > { %v4677_v59 = vpop.permute.xlu1 %4676  ;;  %v4691_v12 = vadd.f32 %v4690_v38, %v4689_v30 }
0x17cd   : > { %v4686_v23 = vmul.f32 %v4677_v59, %v4662_v31 }
0x17cf   : > { %v4692_v35 = vsel %vm4688_vm11, %v4686_v23, 0.0 }
0x17d0   : > { %v4682_v58 = vpop.permute.xlu0 %4681  ;;  %v4693_v63 = vadd.f32 %v4692_v35, %v4691_v12 }
0x17d1   : > { %v4687_v53 = vmul.f32 %v4682_v58, %v4663_v10 }
0x17d3   : > { %v4694_v33 = vsel %vm4688_vm11, %v4687_v53, 0.0 }
0x17d4   : > { %v4695_v50 = vadd.f32 %v4694_v33, %v4693_v63 }
0x17d6   : > { %v4696_v7 = vrot.slane %v4695_v50, 4 }
0x17d8   : > { %v4697_v48 = vadd.f32 %v4696_v7, %v4695_v50 }
0x17da   : > { %v4698_v52 = vrot.slane %v4697_v48, 2 }
0x17dc   : > { %v4699_v26 = vadd.f32 %v4698_v52, %v4697_v48 }
0x17de   : > { %v4700_v47 = vrot.slane %v4699_v26, 1 }
0x17e0   : > { %v4701_v27 = vadd.f32 %v4700_v47, %v4699_v26 }
0x17e2   : > { %v4703_v37 = vadd.f32 %v4702_v20, %v4701_v27 }
0x17e4   : > { %4705 = vst.msk [vmem:[%s716_s2] sm:$0x1] %vm4704_vm12, %v4703_v37 }
0x17e5   : > { %6469 = shalt.err (!%p6466_p2)
}
0x17e6   : > { %s6470_s27 = scalar_lea.hbm %s9122_s1, 16  ;;  %s6474_s23 = scalar_lea.hbm %s9252_s5, 32 }
0x17e7   : > { %p6471_p3 = scmp.ne.s32.totalorder %s9122_s1, %s6470_s27  ;;  %p6475_p8 = scmp.lt.u32.totalorder %s9122_s1, %s9252_s5 }
0x17e8   : > { %p6476_p11 = scmp.lt.u32.totalorder %s6474_s23, %s6470_s27  ;;  %p6478_p10 = scmp.lt.u32.totalorder %s6470_s27, %s9122_s1 }
0x17e9   : > { %p6472_p4 = pnand %p6471_p3, %p6715_p5 }
0x17ea   : > { %p6477_p9 = por %p6476_p11, %p6475_p8 }
0x17eb   : > { %p6473_p7 = pneg %p6472_p4 }
0x17ec   : > { %p6479_p12 = por %p6478_p10, %p6477_p9 }
0x17ee   : > { %p6480_p13 = pnand %p6479_p12, %p6473_p7 }
0x17f0   : > { %6483 = shalt.err (!%p6480_p13)
}
0x17f1   : > { %5920 = dma.vmem_to_hbm [thread:$0]  (%p6715_p5), %s9124_s28, 16, %s9122_s1, %s4707_s3  }
0x17f2 PF: > { %s9253_s4 = sld [smem:[#allocation10_spill]]  ;;  %s9254_s25 = sld [smem:[#allocation8_spill]] }
0x17f8   : > { %p5932_p0 = scmp.ge.s32.totalorder %s9253_s4, 2  ;;  %s4731_s0 = sand.u32 1, %s9254_s25  }
0x17f9   : > { %s4732_s2 = scalar_lea.sflag [#allocation3], %s4731_s0 }
0x17fa   : > { %p5927_p1 = pnand %p5932_p0, %p6719_p6 }
0x17fc   : > { %6505 = dma.done.wait (!%p5927_p1), %s4732_s2, 16  }
0x17fd   : > { %6507 = vsyncadd (!%p5927_p1), %s4732_s2, 4294967280  ;;  %s9256_s25 = sld [smem:[#allocation12_spill]]  ;;  %s9257_s27 = sld [smem:[#allocation9_spill]] }
0x17fe   : > { %s9258_s24 = sld [smem:[#allocation13_spill]]  ;;  %s9259_s4 = smov %s6514_s30 }
0x1803   : > { %p34_p2 = scmp.ge.s32.totalorder %s9256_s25, 4   ;;  %s9260_s30 = smov %s9257_s27 }
0x1805   :  { %36 = sbr.rel (!%p34_p2) target bundleno = 14 (0xe), region = 152 }
0x180c   :  { %4736 = vsyncpa [#allocation3], 1 }
0x180d   :  { %4738 = vsyncpa [#allocation3 + $0x1], 1 }
0x180e   :  { %4739 = vsyncpa [#allocation4], 1 }
0x180f   :  { %4741 = vsyncpa [#allocation4 + $0x1], 1 }

</bundles_post_ra>
